<compile_context>
chip_gen: v6e
topology: v6e:2x2x1
jax: 0.10.0
libtpu: 0.0.40
codegen_flags: <defaults>
</compile_context>

<pallas_src>
import functools
import math

import jax
import jax.numpy as jnp
from jax.experimental import pallas as pl
from jax.experimental.pallas import tpu as pltpu

# ----------------------- model config (small, synthetic) -----------------------
PATCH = 4
IMG = 16
CHANNELS = 3
HIDDEN = 32
NUM_HEADS = 4
HEAD_DIM = HIDDEN // NUM_HEADS
MLP_DIM = 64
NUM_LAYERS = 2
LN_EPS = 1e-6
RETURN_TYPE = "cls_token"   # matches the module default

NUM_PATCHES = (IMG // PATCH) ** 2          # 16
SEQ = NUM_PATCHES + 1                      # 17 (CLS + patches)
SEQ_PAD = ((SEQ + 7) // 8) * 8             # 24: f32 sublane-multiple padding


# ------------------------------ fused Pallas kernel ----------------------------
def _fused_vit_kernel(
    patches_ref, pe_w_ref, add_ref,
    ln1_g_ref, ln1_b_ref,
    qkv_w_ref, qkv_b_ref,
    proj_w_ref, proj_b_ref, ls1_ref,
    ln2_g_ref, ln2_b_ref,
    fc1_w_ref, fc1_b_ref, fc2_w_ref, fc2_b_ref, ls2_ref,
    lnf_g_ref, lnf_b_ref,
    out_ref,
    *, B, S, SP, D, H, Dh, L, eps, return_type,
):
    bf16 = jnp.bfloat16
    gelu_c = math.sqrt(2.0 / math.pi)

    def mm(x_bf, w_bf):
        # bf16 MXU inputs (pre-cast by the caller, once per tensor), f32 acc.
        return jnp.dot(x_bf, w_bf, preferred_element_type=jnp.float32)

    def layernorm(x, g, b):
        mu = jnp.mean(x, axis=-1, keepdims=True)
        xc = x - mu
        var = jnp.mean(xc * xc, axis=-1, keepdims=True)
        return xc * jax.lax.rsqrt(var + eps) * g + b

    def gelu(x):
        # tanh approximation (EUP path; slight deviation vs torch's erf GELU)
        return 0.5 * x * (1.0 + jnp.tanh(gelu_c * (x + 0.044715 * (x * x * x))))

    # key-padding mask for the padded sequence rows (columns of the scores)
    col = jax.lax.broadcasted_iota(jnp.int32, (1, SP), 1)
    key_mask = jnp.where(col < S, 0.0, -1e30).astype(jnp.float32)   # (1, SP)

    # ---- patch embedding; cls token + positional embedding + patch-embed bias
    #      all folded into `add_ref` (row0 = cls+pos0, rows 1..S-1 = pe_b+pos,
    #      padded rows = 0; the CLS "patch" row is all-zero so its projection
    #      is 0 and the learned CLS embedding comes entirely from `add`).
    h = mm(patches_ref[...], pe_w_ref[...]) + add_ref[...]          # (B*SP, D) f32

    # ---- transformer layers (statically unrolled) ----
    for l in range(L):
        # layer weights read from VMEM exactly once (shared across batch rows)
        ln1_g = ln1_g_ref[l]; ln1_b = ln1_b_ref[l]
        qkv_w = qkv_w_ref[l]; qkv_b = qkv_b_ref[l]
        proj_w = proj_w_ref[l]; proj_b = proj_b_ref[l]; ls1 = ls1_ref[l]
        ln2_g = ln2_g_ref[l]; ln2_b = ln2_b_ref[l]
        fc1_w = fc1_w_ref[l]; fc1_b = fc1_b_ref[l]
        fc2_w = fc2_w_ref[l]; fc2_b = fc2_b_ref[l]; ls2 = ls2_ref[l]

        # --- attention block (pre-LN, DINOv2 LayerScale) ---
        hn = layernorm(h, ln1_g, ln1_b)
        hn_bf = hn.astype(bf16)                      # single cast
        # fused QKV: one (BS, D) @ (D, 3D) push; Q pre-scaled by 1/sqrt(Dh)
        qkv = mm(hn_bf, qkv_w) + qkv_b               # (BS, 3D) f32
        qkv_bf = qkv.astype(bf16)                    # single cast for score/PV

        batch_outs = []
        for b in range(B):
            r0 = b * SP
            head_outs = []
            for hd in range(H):
                c0 = hd * Dh
                q_h = qkv_bf[r0:r0 + SP, c0:c0 + Dh]
                k_h = qkv_bf[r0:r0 + SP, D + c0:D + c0 + Dh]
                v_h = qkv_bf[r0:r0 + SP, 2 * D + c0:2 * D + c0 + Dh]
                # q @ k^T without materializing the transpose
                s = jax.lax.dot_general(
                    q_h, k_h, (((1,), (1,)), ((), ())),
                    preferred_element_type=jnp.float32)              # (SP, SP)
                s = s + key_mask                      # mask padded key columns
                m = jnp.max(s, axis=-1, keepdims=True)
                p = jnp.exp(s - m)
                denom = jnp.sum(p, axis=-1, keepdims=True)
                p = p * pl.reciprocal(denom, approx=True)
                head_outs.append(mm(p.astype(bf16), v_h))            # (SP, Dh)
            # lane-contiguous head merge (matches concat_h layout of proj_w)
            batch_outs.append(jnp.concatenate(head_outs, axis=-1))   # (SP, D)
        attn = jnp.concatenate(batch_outs, axis=0)                   # (BS, D)

        # single output projection over the merged heads + LayerScale + residual
        attn_out = mm(attn.astype(bf16), proj_w) + proj_b
        h = h + ls1 * attn_out

        # --- MLP block (pre-LN) ---
        hn2 = layernorm(h, ln2_g, ln2_b)
        m1 = gelu(mm(hn2.astype(bf16), fc1_w) + fc1_b)
        m2 = mm(m1.astype(bf16), fc2_w) + fc2_b
        h = h + ls2 * m2

    # ---- final LayerNorm + readout (one dense (B, out_dim) store) ----
    out = layernorm(h, lnf_g_ref[...], lnf_b_ref[...])               # (BS, D)
    rows = []
    for b in range(B):
        r0 = b * SP
        cls_o = out[r0:r0 + 1, :]
        if return_type == "cls_token":
            rows.append(cls_o)
        else:  # "cls+mean": mean over the N real patch tokens only
            mean_o = jnp.mean(out[r0 + 1:r0 + S, :], axis=0, keepdims=True)
            rows.append(jnp.concatenate([cls_o, mean_o], axis=-1))
    out_ref[...] = jnp.concatenate(rows, axis=0)


# --------------------------- parameter initialization --------------------------
def init_params(key):
    seq = SEQ
    patch_dim = CHANNELS * PATCH * PATCH

    def nrm(k, shape, scale=0.02):
        return scale * jax.random.normal(k, shape, dtype=jnp.float32)

    keys = jax.random.split(key, 4 + NUM_LAYERS)
    params = {
        "pe_w": nrm(keys[0], (patch_dim, HIDDEN)),
        "pe_b": jnp.zeros((HIDDEN,), jnp.float32),
        "cls": nrm(keys[1], (1, 1, HIDDEN)),
        "pos": nrm(keys[2], (1, seq, HIDDEN)),
        "lnf_g": jnp.ones((HIDDEN,), jnp.float32),
        "lnf_b": jnp.zeros((HIDDEN,), jnp.float32),
        "layers": [],
    }
    for li in range(NUM_LAYERS):
        lk = jax.random.split(keys[4 + li], 4)
        params["layers"].append({
            "ln1_g": jnp.ones((HIDDEN,), jnp.float32),
            "ln1_b": jnp.zeros((HIDDEN,), jnp.float32),
            "qkv_w": nrm(lk[0], (HIDDEN, 3 * HIDDEN)),
            "qkv_b": jnp.zeros((3 * HIDDEN,), jnp.float32),
            "proj_w": nrm(lk[1], (HIDDEN, HIDDEN)),
            "proj_b": jnp.zeros((HIDDEN,), jnp.float32),
            "ls1": 1e-5 * jnp.ones((HIDDEN,), jnp.float32),   # DINOv2 LayerScale
            "ln2_g": jnp.ones((HIDDEN,), jnp.float32),
            "ln2_b": jnp.zeros((HIDDEN,), jnp.float32),
            "fc1_w": nrm(lk[2], (HIDDEN, MLP_DIM)),
            "fc1_b": jnp.zeros((MLP_DIM,), jnp.float32),
            "fc2_w": nrm(lk[3], (MLP_DIM, HIDDEN)),
            "fc2_b": jnp.zeros((HIDDEN,), jnp.float32),
            "ls2": 1e-5 * jnp.ones((HIDDEN,), jnp.float32),
        })
    return params


def pack_params(params):
    """One-time re-layout of weights for the fused kernel.

    * matmul weights cast to bf16 (f32 accumulation in-kernel)
    * QKV kept fused (D, 3D); the 1/sqrt(Dh) softmax scale is pre-folded into
      the Q weight/bias so the kernel never scales the (S,S) scores
    * cls token + positional embedding + patch-embed bias folded into one
      additive (SEQ_PAD, D) tensor (padded rows zero)
    """
    D = HIDDEN
    bf16 = jnp.bfloat16
    scale = 1.0 / math.sqrt(HEAD_DIM)

    cls = params["cls"][0]                       # (1, D)
    pos = params["pos"][0]                       # (S, D)
    pe_b = params["pe_b"][None, :]               # (1, D)
    embed_add = jnp.zeros((SEQ_PAD, D), jnp.float32)
    embed_add = embed_add.at[0:1].set(cls + pos[0:1])
    embed_add = embed_add.at[1:SEQ].set(pe_b + pos[1:])

    layers = params["layers"]

    def stack(fn):
        return jnp.stack([fn(l) for l in layers], axis=0)

    def scaled_qkv_w(l):
        return l["qkv_w"].at[:, :D].multiply(scale)

    def scaled_qkv_b(l):
        return l["qkv_b"].at[:D].multiply(scale)[None, :]

    packed = dict(
        pe_w=params["pe_w"].astype(bf16),
        embed_add=embed_add,
        ln1_g=stack(lambda l: l["ln1_g"][None, :]),
        ln1_b=stack(lambda l: l["ln1_b"][None, :]),
        qkv_w=stack(scaled_qkv_w).astype(bf16),            # (L, D, 3D)
        qkv_b=stack(scaled_qkv_b),                          # (L, 1, 3D)
        proj_w=stack(lambda l: l["proj_w"]).astype(bf16),   # (L, D, D)
        proj_b=stack(lambda l: l["proj_b"][None, :]),
        ls1=stack(lambda l: l["ls1"][None, :]),
        ln2_g=stack(lambda l: l["ln2_g"][None, :]),
        ln2_b=stack(lambda l: l["ln2_b"][None, :]),
        fc1_w=stack(lambda l: l["fc1_w"]).astype(bf16),
        fc1_b=stack(lambda l: l["fc1_b"][None, :]),
        fc2_w=stack(lambda l: l["fc2_w"]).astype(bf16),
        fc2_b=stack(lambda l: l["fc2_b"][None, :]),
        ls2=stack(lambda l: l["ls2"][None, :]),
        lnf_g=params["lnf_g"][None, :],
        lnf_b=params["lnf_b"][None, :],
    )
    return packed


# --------------------------------- forward pass --------------------------------
def midnight_forward(packed, x, return_type=RETURN_TYPE):
    """x: (B, C, H, W) float32, NCHW — same as the PyTorch module input."""
    if return_type not in ("cls_token", "cls+mean"):
        raise ValueError(f"unexpected return_type '{return_type}'")

    B, C, Himg, Wimg = x.shape
    nh, nw = Himg // PATCH, Wimg // PATCH
    N = nh * nw
    S = N + 1
    SP = SEQ_PAD
    patch_dim = C * PATCH * PATCH
    D, H, Dh, L = HIDDEN, NUM_HEADS, HEAD_DIM, NUM_LAYERS

    # patch "conv" (kernel == stride == PATCH) as unfold; matmul happens in-kernel
    patches = (
        x.reshape(B, C, nh, PATCH, nw, PATCH)
         .transpose(0, 2, 4, 1, 3, 5)              # (B, nh, nw, C, P, P)
         .reshape(B, N, patch_dim)
    )
    # row 0 per batch = zero "patch" for the CLS slot (its embedding comes from
    # `embed_add`); rows S..SP-1 = zero padding (masked as attention keys).
    patches_pad = jnp.zeros((B, SP, patch_dim), jnp.float32)
    patches_pad = patches_pad.at[:, 1:S, :].set(patches)
    patches_flat = patches_pad.reshape(B * SP, patch_dim).astype(jnp.bfloat16)

    # (SP, D) additive tensor tiled across the batch-folded row dimension
    add_full = jnp.tile(packed["embed_add"], (B, 1))               # (B*SP, D)

    inputs = [
        patches_flat, packed["pe_w"], add_full,
        packed["ln1_g"], packed["ln1_b"],
        packed["qkv_w"], packed["qkv_b"],
        packed["proj_w"], packed["proj_b"], packed["ls1"],
        packed["ln2_g"], packed["ln2_b"],
        packed["fc1_w"], packed["fc1_b"], packed["fc2_w"], packed["fc2_b"],
        packed["ls2"],
        packed["lnf_g"], packed["lnf_b"],
    ]

    def full_spec(a):
        nd = a.ndim
        return pl.BlockSpec(a.shape, lambda i, _nd=nd: (0,) * _nd)

    out_dim = D if return_type == "cls_token" else 2 * D
    kernel = functools.partial(
        _fused_vit_kernel,
        B=B, S=S, SP=SP, D=D, H=H, Dh=Dh, L=L, eps=LN_EPS,
        return_type=return_type)

    # Single fused kernel invocation: weights (<0.1 MiB) and activations (a few
    # KiB) live in VMEM for the whole forward pass.
    # TODO(synk): on v7x, make the batch a "parallel" grid axis so the second
    #             TensorCore is used; grid=(1,) keeps the fully fused form
    #             which is best on single-TC v5e/v6e.
    out = pl.pallas_call(
        kernel,
        out_shape=jax.ShapeDtypeStruct((B, out_dim), jnp.float32),
        grid=(1,),
        in_specs=[full_spec(a) for a in inputs],
        out_specs=pl.BlockSpec((B, out_dim), lambda i: (0, 0)),
        compiler_params=pltpu.CompilerParams(
            dimension_semantics=("arbitrary",)),
    )(*inputs)
    return out


# ------------------------------------ main -------------------------------------
if __name__ == "__main__":
    key = jax.random.PRNGKey(0)
    pkey, xkey = jax.random.split(key)
    params = init_params(pkey)
    packed = pack_params(params)                       # one-time weight re-layout
    x = jax.random.normal(xkey, (2, CHANNELS, IMG, IMG), dtype=jnp.float32)

    fwd = jax.jit(functools.partial(midnight_forward, return_type=RETURN_TYPE))
    z = fwd(packed, x)
    jax.block_until_ready(z)
    assert z.shape == (2, HIDDEN), z.shape
    print("KERNEL_OK")
</pallas_src>

<mosaic_0001>
module attributes {stable_mosaic.version = 11 : i64} {
  func.func @_fused_vit_kernel(%arg0: i32, %arg1: memref<48x48xbf16, #tpu.memory_space<vmem>>, %arg2: memref<48x32xbf16, #tpu.memory_space<vmem>>, %arg3: memref<48x32xf32, #tpu.memory_space<vmem>>, %arg4: memref<2x1x32xf32, #tpu.memory_space<vmem>>, %arg5: memref<2x1x32xf32, #tpu.memory_space<vmem>>, %arg6: memref<2x32x96xbf16, #tpu.memory_space<vmem>>, %arg7: memref<2x1x96xf32, #tpu.memory_space<vmem>>, %arg8: memref<2x32x32xbf16, #tpu.memory_space<vmem>>, %arg9: memref<2x1x32xf32, #tpu.memory_space<vmem>>, %arg10: memref<2x1x32xf32, #tpu.memory_space<vmem>>, %arg11: memref<2x1x32xf32, #tpu.memory_space<vmem>>, %arg12: memref<2x1x32xf32, #tpu.memory_space<vmem>>, %arg13: memref<2x32x64xbf16, #tpu.memory_space<vmem>>, %arg14: memref<2x1x64xf32, #tpu.memory_space<vmem>>, %arg15: memref<2x64x32xbf16, #tpu.memory_space<vmem>>, %arg16: memref<2x1x32xf32, #tpu.memory_space<vmem>>, %arg17: memref<2x1x32xf32, #tpu.memory_space<vmem>>, %arg18: memref<1x32xf32, #tpu.memory_space<vmem>>, %arg19: memref<1x32xf32, #tpu.memory_space<vmem>>, %arg20: memref<2x32xf32, #tpu.memory_space<vmem>>) attributes {dimension_semantics = [#tpu.dimension_semantics<arbitrary>], iteration_bounds = array<i64: 1>, scalar_prefetch = 0 : i64, scratch_operands = 0 : i64, tpu.core_type = #tpu.core_type<tc>, window_params = [{pipeline_mode = #tpu.pipeline_mode<synchronous>, transform_indices = @transform_0, window_bounds = array<i64: 48, 48>}, {pipeline_mode = #tpu.pipeline_mode<synchronous>, transform_indices = @transform_1, window_bounds = array<i64: 48, 32>}, {pipeline_mode = #tpu.pipeline_mode<synchronous>, transform_indices = @transform_2, window_bounds = array<i64: 48, 32>}, {pipeline_mode = #tpu.pipeline_mode<synchronous>, transform_indices = @transform_3, window_bounds = array<i64: 2, 1, 32>}, {pipeline_mode = #tpu.pipeline_mode<synchronous>, transform_indices = @transform_4, window_bounds = array<i64: 2, 1, 32>}, {pipeline_mode = #tpu.pipeline_mode<synchronous>, transform_indices = @transform_5, window_bounds = array<i64: 2, 32, 96>}, {pipeline_mode = #tpu.pipeline_mode<synchronous>, transform_indices = @transform_6, window_bounds = array<i64: 2, 1, 96>}, {pipeline_mode = #tpu.pipeline_mode<synchronous>, transform_indices = @transform_7, window_bounds = array<i64: 2, 32, 32>}, {pipeline_mode = #tpu.pipeline_mode<synchronous>, transform_indices = @transform_8, window_bounds = array<i64: 2, 1, 32>}, {pipeline_mode = #tpu.pipeline_mode<synchronous>, transform_indices = @transform_9, window_bounds = array<i64: 2, 1, 32>}, {pipeline_mode = #tpu.pipeline_mode<synchronous>, transform_indices = @transform_10, window_bounds = array<i64: 2, 1, 32>}, {pipeline_mode = #tpu.pipeline_mode<synchronous>, transform_indices = @transform_11, window_bounds = array<i64: 2, 1, 32>}, {pipeline_mode = #tpu.pipeline_mode<synchronous>, transform_indices = @transform_12, window_bounds = array<i64: 2, 32, 64>}, {pipeline_mode = #tpu.pipeline_mode<synchronous>, transform_indices = @transform_13, window_bounds = array<i64: 2, 1, 64>}, {pipeline_mode = #tpu.pipeline_mode<synchronous>, transform_indices = @transform_14, window_bounds = array<i64: 2, 64, 32>}, {pipeline_mode = #tpu.pipeline_mode<synchronous>, transform_indices = @transform_15, window_bounds = array<i64: 2, 1, 32>}, {pipeline_mode = #tpu.pipeline_mode<synchronous>, transform_indices = @transform_16, window_bounds = array<i64: 2, 1, 32>}, {pipeline_mode = #tpu.pipeline_mode<synchronous>, transform_indices = @transform_17, window_bounds = array<i64: 1, 32>}, {pipeline_mode = #tpu.pipeline_mode<synchronous>, transform_indices = @transform_18, window_bounds = array<i64: 1, 32>}, {pipeline_mode = #tpu.pipeline_mode<synchronous>, transform_indices = @transform_19, window_bounds = array<i64: 2, 32>}]} {
    %0 = tpu.iota {dimensions = array<i32: 1>} : vector<1x24xi32>
    %c17_i32 = arith.constant 17 : i32
    %1 = vector.broadcast %c17_i32 : i32 to vector<1x24xi32>
    %2 = arith.cmpi slt, %0, %1 : vector<1x24xi32>
    %cst = arith.constant 0.000000e+00 : f32
    %cst_0 = arith.constant -1.000000e+30 : f32
    %3 = vector.broadcast %cst : f32 to vector<1x24xf32>
    %4 = vector.broadcast %cst_0 : f32 to vector<1x24xf32>
    %5 = arith.select %2, %3, %4 : vector<1x24xi1>, vector<1x24xf32>
    %c0 = arith.constant 0 : index
    %c0_1 = arith.constant 0 : index
    %6 = vector.load %arg1[%c0, %c0_1] : memref<48x48xbf16, #tpu.memory_space<vmem>>, vector<48x48xbf16>
    %c0_2 = arith.constant 0 : index
    %c0_3 = arith.constant 0 : index
    %7 = vector.load %arg2[%c0_2, %c0_3] : memref<48x32xbf16, #tpu.memory_space<vmem>>, vector<48x32xbf16>
    %cst_4 = arith.constant dense<0.000000e+00> : vector<48x32xf32>
    %8 = tpu.matmul %6, %7, %cst_4 {dimension_numbers = #tpu.dot_dimension_numbers<[1], [0], [0], [1], [0, 0, 1, 1], [], []>} : vector<48x48xbf16>, vector<48x32xbf16>, vector<48x32xf32> -> vector<48x32xf32>
    %c0_5 = arith.constant 0 : index
    %c0_6 = arith.constant 0 : index
    %9 = vector.load %arg3[%c0_5, %c0_6] : memref<48x32xf32, #tpu.memory_space<vmem>>, vector<48x32xf32>
    %10 = arith.addf %8, %9 : vector<48x32xf32>
    %c0_7 = arith.constant 0 : index
    %c0_8 = arith.constant 0 : index
    %c0_9 = arith.constant 0 : index
    %11 = vector.load %arg4[%c0_7, %c0_8, %c0_9] : memref<2x1x32xf32, #tpu.memory_space<vmem>>, vector<1x1x32xf32>
    %12 = vector.shape_cast %11 : vector<1x1x32xf32> to vector<1x32xf32>
    %c0_10 = arith.constant 0 : index
    %c0_11 = arith.constant 0 : index
    %c0_12 = arith.constant 0 : index
    %13 = vector.load %arg5[%c0_10, %c0_11, %c0_12] : memref<2x1x32xf32, #tpu.memory_space<vmem>>, vector<1x1x32xf32>
    %14 = vector.shape_cast %13 : vector<1x1x32xf32> to vector<1x32xf32>
    %c0_13 = arith.constant 0 : index
    %c0_14 = arith.constant 0 : index
    %c0_15 = arith.constant 0 : index
    %15 = vector.load %arg6[%c0_13, %c0_14, %c0_15] : memref<2x32x96xbf16, #tpu.memory_space<vmem>>, vector<1x32x96xbf16>
    %16 = vector.shape_cast %15 : vector<1x32x96xbf16> to vector<32x96xbf16>
    %c0_16 = arith.constant 0 : index
    %c0_17 = arith.constant 0 : index
    %c0_18 = arith.constant 0 : index
    %17 = vector.load %arg7[%c0_16, %c0_17, %c0_18] : memref<2x1x96xf32, #tpu.memory_space<vmem>>, vector<1x1x96xf32>
    %18 = vector.shape_cast %17 : vector<1x1x96xf32> to vector<1x96xf32>
    %c0_19 = arith.constant 0 : index
    %c0_20 = arith.constant 0 : index
    %c0_21 = arith.constant 0 : index
    %19 = vector.load %arg8[%c0_19, %c0_20, %c0_21] : memref<2x32x32xbf16, #tpu.memory_space<vmem>>, vector<1x32x32xbf16>
    %20 = vector.shape_cast %19 : vector<1x32x32xbf16> to vector<32x32xbf16>
    %c0_22 = arith.constant 0 : index
    %c0_23 = arith.constant 0 : index
    %c0_24 = arith.constant 0 : index
    %21 = vector.load %arg9[%c0_22, %c0_23, %c0_24] : memref<2x1x32xf32, #tpu.memory_space<vmem>>, vector<1x1x32xf32>
    %22 = vector.shape_cast %21 : vector<1x1x32xf32> to vector<1x32xf32>
    %c0_25 = arith.constant 0 : index
    %c0_26 = arith.constant 0 : index
    %c0_27 = arith.constant 0 : index
    %23 = vector.load %arg10[%c0_25, %c0_26, %c0_27] : memref<2x1x32xf32, #tpu.memory_space<vmem>>, vector<1x1x32xf32>
    %24 = vector.shape_cast %23 : vector<1x1x32xf32> to vector<1x32xf32>
    %c0_28 = arith.constant 0 : index
    %c0_29 = arith.constant 0 : index
    %c0_30 = arith.constant 0 : index
    %25 = vector.load %arg11[%c0_28, %c0_29, %c0_30] : memref<2x1x32xf32, #tpu.memory_space<vmem>>, vector<1x1x32xf32>
    %26 = vector.shape_cast %25 : vector<1x1x32xf32> to vector<1x32xf32>
    %c0_31 = arith.constant 0 : index
    %c0_32 = arith.constant 0 : index
    %c0_33 = arith.constant 0 : index
    %27 = vector.load %arg12[%c0_31, %c0_32, %c0_33] : memref<2x1x32xf32, #tpu.memory_space<vmem>>, vector<1x1x32xf32>
    %28 = vector.shape_cast %27 : vector<1x1x32xf32> to vector<1x32xf32>
    %c0_34 = arith.constant 0 : index
    %c0_35 = arith.constant 0 : index
    %c0_36 = arith.constant 0 : index
    %29 = vector.load %arg13[%c0_34, %c0_35, %c0_36] : memref<2x32x64xbf16, #tpu.memory_space<vmem>>, vector<1x32x64xbf16>
    %30 = vector.shape_cast %29 : vector<1x32x64xbf16> to vector<32x64xbf16>
    %c0_37 = arith.constant 0 : index
    %c0_38 = arith.constant 0 : index
    %c0_39 = arith.constant 0 : index
    %31 = vector.load %arg14[%c0_37, %c0_38, %c0_39] : memref<2x1x64xf32, #tpu.memory_space<vmem>>, vector<1x1x64xf32>
    %32 = vector.shape_cast %31 : vector<1x1x64xf32> to vector<1x64xf32>
    %c0_40 = arith.constant 0 : index
    %c0_41 = arith.constant 0 : index
    %c0_42 = arith.constant 0 : index
    %33 = vector.load %arg15[%c0_40, %c0_41, %c0_42] : memref<2x64x32xbf16, #tpu.memory_space<vmem>>, vector<1x64x32xbf16>
    %34 = vector.shape_cast %33 : vector<1x64x32xbf16> to vector<64x32xbf16>
    %c0_43 = arith.constant 0 : index
    %c0_44 = arith.constant 0 : index
    %c0_45 = arith.constant 0 : index
    %35 = vector.load %arg16[%c0_43, %c0_44, %c0_45] : memref<2x1x32xf32, #tpu.memory_space<vmem>>, vector<1x1x32xf32>
    %36 = vector.shape_cast %35 : vector<1x1x32xf32> to vector<1x32xf32>
    %c0_46 = arith.constant 0 : index
    %c0_47 = arith.constant 0 : index
    %c0_48 = arith.constant 0 : index
    %37 = vector.load %arg17[%c0_46, %c0_47, %c0_48] : memref<2x1x32xf32, #tpu.memory_space<vmem>>, vector<1x1x32xf32>
    %38 = vector.shape_cast %37 : vector<1x1x32xf32> to vector<1x32xf32>
    %cst_49 = arith.constant dense<0.000000e+00> : vector<48xf32>
    %39 = vector.multi_reduction <add>, %10, %cst_49 [1] : vector<48x32xf32> to vector<48xf32>
    %40 = vector.shape_cast %39 : vector<48xf32> to vector<48x1xf32>
    %cst_50 = arith.constant 3.200000e+01 : f32
    %41 = vector.broadcast %cst_50 : f32 to vector<48x1xf32>
    %42 = arith.divf %40, %41 : vector<48x1xf32>
    %43 = vector.broadcast %42 : vector<48x1xf32> to vector<48x32xf32>
    %44 = arith.subf %10, %43 : vector<48x32xf32>
    %45 = arith.mulf %44, %44 : vector<48x32xf32>
    %cst_51 = arith.constant dense<0.000000e+00> : vector<48xf32>
    %46 = vector.multi_reduction <add>, %45, %cst_51 [1] : vector<48x32xf32> to vector<48xf32>
    %47 = vector.shape_cast %46 : vector<48xf32> to vector<48x1xf32>
    %cst_52 = arith.constant 3.200000e+01 : f32
    %48 = vector.broadcast %cst_52 : f32 to vector<48x1xf32>
    %49 = arith.divf %47, %48 : vector<48x1xf32>
    %cst_53 = arith.constant 9.99999997E-7 : f32
    %50 = vector.broadcast %cst_53 : f32 to vector<48x1xf32>
    %51 = arith.addf %49, %50 : vector<48x1xf32>
    %52 = math.rsqrt %51 : vector<48x1xf32>
    %53 = vector.broadcast %52 : vector<48x1xf32> to vector<48x32xf32>
    %54 = arith.mulf %44, %53 : vector<48x32xf32>
    %55 = vector.broadcast %12 : vector<1x32xf32> to vector<48x32xf32>
    %56 = arith.mulf %54, %55 : vector<48x32xf32>
    %57 = vector.broadcast %14 : vector<1x32xf32> to vector<48x32xf32>
    %58 = arith.addf %56, %57 : vector<48x32xf32>
    %59 = arith.truncf %58 : vector<48x32xf32> to vector<48x32xbf16>
    %cst_54 = arith.constant dense<0.000000e+00> : vector<48x96xf32>
    %60 = tpu.matmul %59, %16, %cst_54 {dimension_numbers = #tpu.dot_dimension_numbers<[1], [0], [0], [1], [0, 0, 1, 1], [], []>} : vector<48x32xbf16>, vector<32x96xbf16>, vector<48x96xf32> -> vector<48x96xf32>
    %61 = vector.broadcast %18 : vector<1x96xf32> to vector<48x96xf32>
    %62 = arith.addf %60, %61 : vector<48x96xf32>
    %63 = arith.truncf %62 : vector<48x96xf32> to vector<48x96xbf16>
    %64 = vector.extract_strided_slice %63 {offsets = [0, 0], sizes = [24, 8], strides = [1, 1]} : vector<48x96xbf16> to vector<24x8xbf16>
    %65 = vector.extract_strided_slice %63 {offsets = [0, 32], sizes = [24, 8], strides = [1, 1]} : vector<48x96xbf16> to vector<24x8xbf16>
    %66 = vector.extract_strided_slice %63 {offsets = [0, 64], sizes = [24, 8], strides = [1, 1]} : vector<48x96xbf16> to vector<24x8xbf16>
    %cst_55 = arith.constant dense<0.000000e+00> : vector<24x24xf32>
    %67 = tpu.matmul %64, %65, %cst_55 {dimension_numbers = #tpu.dot_dimension_numbers<[1], [1], [0], [0], [0, 0, 1, 0], [], []>} : vector<24x8xbf16>, vector<24x8xbf16>, vector<24x24xf32> -> vector<24x24xf32>
    %68 = vector.broadcast %5 : vector<1x24xf32> to vector<24x24xf32>
    %69 = arith.addf %67, %68 : vector<24x24xf32>
    %cst_56 = arith.constant dense<0xFF800000> : vector<24xf32>
    %70 = vector.multi_reduction <maximumf>, %69, %cst_56 [1] : vector<24x24xf32> to vector<24xf32>
    %71 = vector.shape_cast %70 : vector<24xf32> to vector<24x1xf32>
    %72 = vector.broadcast %71 : vector<24x1xf32> to vector<24x24xf32>
    %73 = arith.subf %69, %72 : vector<24x24xf32>
    %74 = math.exp %73 : vector<24x24xf32>
    %cst_57 = arith.constant dense<0.000000e+00> : vector<24xf32>
    %75 = vector.multi_reduction <add>, %74, %cst_57 [1] : vector<24x24xf32> to vector<24xf32>
    %76 = vector.shape_cast %75 : vector<24xf32> to vector<24x1xf32>
    %77 = tpu.reciprocal %76 {approx = true} : vector<24x1xf32> -> vector<24x1xf32>
    %78 = vector.broadcast %77 : vector<24x1xf32> to vector<24x24xf32>
    %79 = arith.mulf %74, %78 : vector<24x24xf32>
    %80 = arith.truncf %79 : vector<24x24xf32> to vector<24x24xbf16>
    %cst_58 = arith.constant dense<0.000000e+00> : vector<24x8xf32>
    %81 = tpu.matmul %80, %66, %cst_58 {dimension_numbers = #tpu.dot_dimension_numbers<[1], [0], [0], [1], [0, 0, 1, 1], [], []>} : vector<24x24xbf16>, vector<24x8xbf16>, vector<24x8xf32> -> vector<24x8xf32>
    %82 = vector.extract_strided_slice %63 {offsets = [0, 8], sizes = [24, 8], strides = [1, 1]} : vector<48x96xbf16> to vector<24x8xbf16>
    %83 = vector.extract_strided_slice %63 {offsets = [0, 40], sizes = [24, 8], strides = [1, 1]} : vector<48x96xbf16> to vector<24x8xbf16>
    %84 = vector.extract_strided_slice %63 {offsets = [0, 72], sizes = [24, 8], strides = [1, 1]} : vector<48x96xbf16> to vector<24x8xbf16>
    %cst_59 = arith.constant dense<0.000000e+00> : vector<24x24xf32>
    %85 = tpu.matmul %82, %83, %cst_59 {dimension_numbers = #tpu.dot_dimension_numbers<[1], [1], [0], [0], [0, 0, 1, 0], [], []>} : vector<24x8xbf16>, vector<24x8xbf16>, vector<24x24xf32> -> vector<24x24xf32>
    %86 = vector.broadcast %5 : vector<1x24xf32> to vector<24x24xf32>
    %87 = arith.addf %85, %86 : vector<24x24xf32>
    %cst_60 = arith.constant dense<0xFF800000> : vector<24xf32>
    %88 = vector.multi_reduction <maximumf>, %87, %cst_60 [1] : vector<24x24xf32> to vector<24xf32>
    %89 = vector.shape_cast %88 : vector<24xf32> to vector<24x1xf32>
    %90 = vector.broadcast %89 : vector<24x1xf32> to vector<24x24xf32>
    %91 = arith.subf %87, %90 : vector<24x24xf32>
    %92 = math.exp %91 : vector<24x24xf32>
    %cst_61 = arith.constant dense<0.000000e+00> : vector<24xf32>
    %93 = vector.multi_reduction <add>, %92, %cst_61 [1] : vector<24x24xf32> to vector<24xf32>
    %94 = vector.shape_cast %93 : vector<24xf32> to vector<24x1xf32>
    %95 = tpu.reciprocal %94 {approx = true} : vector<24x1xf32> -> vector<24x1xf32>
    %96 = vector.broadcast %95 : vector<24x1xf32> to vector<24x24xf32>
    %97 = arith.mulf %92, %96 : vector<24x24xf32>
    %98 = arith.truncf %97 : vector<24x24xf32> to vector<24x24xbf16>
    %cst_62 = arith.constant dense<0.000000e+00> : vector<24x8xf32>
    %99 = tpu.matmul %98, %84, %cst_62 {dimension_numbers = #tpu.dot_dimension_numbers<[1], [0], [0], [1], [0, 0, 1, 1], [], []>} : vector<24x24xbf16>, vector<24x8xbf16>, vector<24x8xf32> -> vector<24x8xf32>
    %100 = vector.extract_strided_slice %63 {offsets = [0, 16], sizes = [24, 8], strides = [1, 1]} : vector<48x96xbf16> to vector<24x8xbf16>
    %101 = vector.extract_strided_slice %63 {offsets = [0, 48], sizes = [24, 8], strides = [1, 1]} : vector<48x96xbf16> to vector<24x8xbf16>
    %102 = vector.extract_strided_slice %63 {offsets = [0, 80], sizes = [24, 8], strides = [1, 1]} : vector<48x96xbf16> to vector<24x8xbf16>
    %cst_63 = arith.constant dense<0.000000e+00> : vector<24x24xf32>
    %103 = tpu.matmul %100, %101, %cst_63 {dimension_numbers = #tpu.dot_dimension_numbers<[1], [1], [0], [0], [0, 0, 1, 0], [], []>} : vector<24x8xbf16>, vector<24x8xbf16>, vector<24x24xf32> -> vector<24x24xf32>
    %104 = vector.broadcast %5 : vector<1x24xf32> to vector<24x24xf32>
    %105 = arith.addf %103, %104 : vector<24x24xf32>
    %cst_64 = arith.constant dense<0xFF800000> : vector<24xf32>
    %106 = vector.multi_reduction <maximumf>, %105, %cst_64 [1] : vector<24x24xf32> to vector<24xf32>
    %107 = vector.shape_cast %106 : vector<24xf32> to vector<24x1xf32>
    %108 = vector.broadcast %107 : vector<24x1xf32> to vector<24x24xf32>
    %109 = arith.subf %105, %108 : vector<24x24xf32>
    %110 = math.exp %109 : vector<24x24xf32>
    %cst_65 = arith.constant dense<0.000000e+00> : vector<24xf32>
    %111 = vector.multi_reduction <add>, %110, %cst_65 [1] : vector<24x24xf32> to vector<24xf32>
    %112 = vector.shape_cast %111 : vector<24xf32> to vector<24x1xf32>
    %113 = tpu.reciprocal %112 {approx = true} : vector<24x1xf32> -> vector<24x1xf32>
    %114 = vector.broadcast %113 : vector<24x1xf32> to vector<24x24xf32>
    %115 = arith.mulf %110, %114 : vector<24x24xf32>
    %116 = arith.truncf %115 : vector<24x24xf32> to vector<24x24xbf16>
    %cst_66 = arith.constant dense<0.000000e+00> : vector<24x8xf32>
    %117 = tpu.matmul %116, %102, %cst_66 {dimension_numbers = #tpu.dot_dimension_numbers<[1], [0], [0], [1], [0, 0, 1, 1], [], []>} : vector<24x24xbf16>, vector<24x8xbf16>, vector<24x8xf32> -> vector<24x8xf32>
    %118 = vector.extract_strided_slice %63 {offsets = [0, 24], sizes = [24, 8], strides = [1, 1]} : vector<48x96xbf16> to vector<24x8xbf16>
    %119 = vector.extract_strided_slice %63 {offsets = [0, 56], sizes = [24, 8], strides = [1, 1]} : vector<48x96xbf16> to vector<24x8xbf16>
    %120 = vector.extract_strided_slice %63 {offsets = [0, 88], sizes = [24, 8], strides = [1, 1]} : vector<48x96xbf16> to vector<24x8xbf16>
    %cst_67 = arith.constant dense<0.000000e+00> : vector<24x24xf32>
    %121 = tpu.matmul %118, %119, %cst_67 {dimension_numbers = #tpu.dot_dimension_numbers<[1], [1], [0], [0], [0, 0, 1, 0], [], []>} : vector<24x8xbf16>, vector<24x8xbf16>, vector<24x24xf32> -> vector<24x24xf32>
    %122 = vector.broadcast %5 : vector<1x24xf32> to vector<24x24xf32>
    %123 = arith.addf %121, %122 : vector<24x24xf32>
    %cst_68 = arith.constant dense<0xFF800000> : vector<24xf32>
    %124 = vector.multi_reduction <maximumf>, %123, %cst_68 [1] : vector<24x24xf32> to vector<24xf32>
    %125 = vector.shape_cast %124 : vector<24xf32> to vector<24x1xf32>
    %126 = vector.broadcast %125 : vector<24x1xf32> to vector<24x24xf32>
    %127 = arith.subf %123, %126 : vector<24x24xf32>
    %128 = math.exp %127 : vector<24x24xf32>
    %cst_69 = arith.constant dense<0.000000e+00> : vector<24xf32>
    %129 = vector.multi_reduction <add>, %128, %cst_69 [1] : vector<24x24xf32> to vector<24xf32>
    %130 = vector.shape_cast %129 : vector<24xf32> to vector<24x1xf32>
    %131 = tpu.reciprocal %130 {approx = true} : vector<24x1xf32> -> vector<24x1xf32>
    %132 = vector.broadcast %131 : vector<24x1xf32> to vector<24x24xf32>
    %133 = arith.mulf %128, %132 : vector<24x24xf32>
    %134 = arith.truncf %133 : vector<24x24xf32> to vector<24x24xbf16>
    %cst_70 = arith.constant dense<0.000000e+00> : vector<24x8xf32>
    %135 = tpu.matmul %134, %120, %cst_70 {dimension_numbers = #tpu.dot_dimension_numbers<[1], [0], [0], [1], [0, 0, 1, 1], [], []>} : vector<24x24xbf16>, vector<24x8xbf16>, vector<24x8xf32> -> vector<24x8xf32>
    %136 = tpu.concatenate %81, %99, %117, %135 in 1 : vector<24x8xf32>, vector<24x8xf32>, vector<24x8xf32>, vector<24x8xf32> -> vector<24x32xf32>
    %137 = vector.extract_strided_slice %63 {offsets = [24, 0], sizes = [24, 8], strides = [1, 1]} : vector<48x96xbf16> to vector<24x8xbf16>
    %138 = vector.extract_strided_slice %63 {offsets = [24, 32], sizes = [24, 8], strides = [1, 1]} : vector<48x96xbf16> to vector<24x8xbf16>
    %139 = vector.extract_strided_slice %63 {offsets = [24, 64], sizes = [24, 8], strides = [1, 1]} : vector<48x96xbf16> to vector<24x8xbf16>
    %cst_71 = arith.constant dense<0.000000e+00> : vector<24x24xf32>
    %140 = tpu.matmul %137, %138, %cst_71 {dimension_numbers = #tpu.dot_dimension_numbers<[1], [1], [0], [0], [0, 0, 1, 0], [], []>} : vector<24x8xbf16>, vector<24x8xbf16>, vector<24x24xf32> -> vector<24x24xf32>
    %141 = vector.broadcast %5 : vector<1x24xf32> to vector<24x24xf32>
    %142 = arith.addf %140, %141 : vector<24x24xf32>
    %cst_72 = arith.constant dense<0xFF800000> : vector<24xf32>
    %143 = vector.multi_reduction <maximumf>, %142, %cst_72 [1] : vector<24x24xf32> to vector<24xf32>
    %144 = vector.shape_cast %143 : vector<24xf32> to vector<24x1xf32>
    %145 = vector.broadcast %144 : vector<24x1xf32> to vector<24x24xf32>
    %146 = arith.subf %142, %145 : vector<24x24xf32>
    %147 = math.exp %146 : vector<24x24xf32>
    %cst_73 = arith.constant dense<0.000000e+00> : vector<24xf32>
    %148 = vector.multi_reduction <add>, %147, %cst_73 [1] : vector<24x24xf32> to vector<24xf32>
    %149 = vector.shape_cast %148 : vector<24xf32> to vector<24x1xf32>
    %150 = tpu.reciprocal %149 {approx = true} : vector<24x1xf32> -> vector<24x1xf32>
    %151 = vector.broadcast %150 : vector<24x1xf32> to vector<24x24xf32>
    %152 = arith.mulf %147, %151 : vector<24x24xf32>
    %153 = arith.truncf %152 : vector<24x24xf32> to vector<24x24xbf16>
    %cst_74 = arith.constant dense<0.000000e+00> : vector<24x8xf32>
    %154 = tpu.matmul %153, %139, %cst_74 {dimension_numbers = #tpu.dot_dimension_numbers<[1], [0], [0], [1], [0, 0, 1, 1], [], []>} : vector<24x24xbf16>, vector<24x8xbf16>, vector<24x8xf32> -> vector<24x8xf32>
    %155 = vector.extract_strided_slice %63 {offsets = [24, 8], sizes = [24, 8], strides = [1, 1]} : vector<48x96xbf16> to vector<24x8xbf16>
    %156 = vector.extract_strided_slice %63 {offsets = [24, 40], sizes = [24, 8], strides = [1, 1]} : vector<48x96xbf16> to vector<24x8xbf16>
    %157 = vector.extract_strided_slice %63 {offsets = [24, 72], sizes = [24, 8], strides = [1, 1]} : vector<48x96xbf16> to vector<24x8xbf16>
    %cst_75 = arith.constant dense<0.000000e+00> : vector<24x24xf32>
    %158 = tpu.matmul %155, %156, %cst_75 {dimension_numbers = #tpu.dot_dimension_numbers<[1], [1], [0], [0], [0, 0, 1, 0], [], []>} : vector<24x8xbf16>, vector<24x8xbf16>, vector<24x24xf32> -> vector<24x24xf32>
    %159 = vector.broadcast %5 : vector<1x24xf32> to vector<24x24xf32>
    %160 = arith.addf %158, %159 : vector<24x24xf32>
    %cst_76 = arith.constant dense<0xFF800000> : vector<24xf32>
    %161 = vector.multi_reduction <maximumf>, %160, %cst_76 [1] : vector<24x24xf32> to vector<24xf32>
    %162 = vector.shape_cast %161 : vector<24xf32> to vector<24x1xf32>
    %163 = vector.broadcast %162 : vector<24x1xf32> to vector<24x24xf32>
    %164 = arith.subf %160, %163 : vector<24x24xf32>
    %165 = math.exp %164 : vector<24x24xf32>
    %cst_77 = arith.constant dense<0.000000e+00> : vector<24xf32>
    %166 = vector.multi_reduction <add>, %165, %cst_77 [1] : vector<24x24xf32> to vector<24xf32>
    %167 = vector.shape_cast %166 : vector<24xf32> to vector<24x1xf32>
    %168 = tpu.reciprocal %167 {approx = true} : vector<24x1xf32> -> vector<24x1xf32>
    %169 = vector.broadcast %168 : vector<24x1xf32> to vector<24x24xf32>
    %170 = arith.mulf %165, %169 : vector<24x24xf32>
    %171 = arith.truncf %170 : vector<24x24xf32> to vector<24x24xbf16>
    %cst_78 = arith.constant dense<0.000000e+00> : vector<24x8xf32>
    %172 = tpu.matmul %171, %157, %cst_78 {dimension_numbers = #tpu.dot_dimension_numbers<[1], [0], [0], [1], [0, 0, 1, 1], [], []>} : vector<24x24xbf16>, vector<24x8xbf16>, vector<24x8xf32> -> vector<24x8xf32>
    %173 = vector.extract_strided_slice %63 {offsets = [24, 16], sizes = [24, 8], strides = [1, 1]} : vector<48x96xbf16> to vector<24x8xbf16>
    %174 = vector.extract_strided_slice %63 {offsets = [24, 48], sizes = [24, 8], strides = [1, 1]} : vector<48x96xbf16> to vector<24x8xbf16>
    %175 = vector.extract_strided_slice %63 {offsets = [24, 80], sizes = [24, 8], strides = [1, 1]} : vector<48x96xbf16> to vector<24x8xbf16>
    %cst_79 = arith.constant dense<0.000000e+00> : vector<24x24xf32>
    %176 = tpu.matmul %173, %174, %cst_79 {dimension_numbers = #tpu.dot_dimension_numbers<[1], [1], [0], [0], [0, 0, 1, 0], [], []>} : vector<24x8xbf16>, vector<24x8xbf16>, vector<24x24xf32> -> vector<24x24xf32>
    %177 = vector.broadcast %5 : vector<1x24xf32> to vector<24x24xf32>
    %178 = arith.addf %176, %177 : vector<24x24xf32>
    %cst_80 = arith.constant dense<0xFF800000> : vector<24xf32>
    %179 = vector.multi_reduction <maximumf>, %178, %cst_80 [1] : vector<24x24xf32> to vector<24xf32>
    %180 = vector.shape_cast %179 : vector<24xf32> to vector<24x1xf32>
    %181 = vector.broadcast %180 : vector<24x1xf32> to vector<24x24xf32>
    %182 = arith.subf %178, %181 : vector<24x24xf32>
    %183 = math.exp %182 : vector<24x24xf32>
    %cst_81 = arith.constant dense<0.000000e+00> : vector<24xf32>
    %184 = vector.multi_reduction <add>, %183, %cst_81 [1] : vector<24x24xf32> to vector<24xf32>
    %185 = vector.shape_cast %184 : vector<24xf32> to vector<24x1xf32>
    %186 = tpu.reciprocal %185 {approx = true} : vector<24x1xf32> -> vector<24x1xf32>
    %187 = vector.broadcast %186 : vector<24x1xf32> to vector<24x24xf32>
    %188 = arith.mulf %183, %187 : vector<24x24xf32>
    %189 = arith.truncf %188 : vector<24x24xf32> to vector<24x24xbf16>
    %cst_82 = arith.constant dense<0.000000e+00> : vector<24x8xf32>
    %190 = tpu.matmul %189, %175, %cst_82 {dimension_numbers = #tpu.dot_dimension_numbers<[1], [0], [0], [1], [0, 0, 1, 1], [], []>} : vector<24x24xbf16>, vector<24x8xbf16>, vector<24x8xf32> -> vector<24x8xf32>
    %191 = vector.extract_strided_slice %63 {offsets = [24, 24], sizes = [24, 8], strides = [1, 1]} : vector<48x96xbf16> to vector<24x8xbf16>
    %192 = vector.extract_strided_slice %63 {offsets = [24, 56], sizes = [24, 8], strides = [1, 1]} : vector<48x96xbf16> to vector<24x8xbf16>
    %193 = vector.extract_strided_slice %63 {offsets = [24, 88], sizes = [24, 8], strides = [1, 1]} : vector<48x96xbf16> to vector<24x8xbf16>
    %cst_83 = arith.constant dense<0.000000e+00> : vector<24x24xf32>
    %194 = tpu.matmul %191, %192, %cst_83 {dimension_numbers = #tpu.dot_dimension_numbers<[1], [1], [0], [0], [0, 0, 1, 0], [], []>} : vector<24x8xbf16>, vector<24x8xbf16>, vector<24x24xf32> -> vector<24x24xf32>
    %195 = vector.broadcast %5 : vector<1x24xf32> to vector<24x24xf32>
    %196 = arith.addf %194, %195 : vector<24x24xf32>
    %cst_84 = arith.constant dense<0xFF800000> : vector<24xf32>
    %197 = vector.multi_reduction <maximumf>, %196, %cst_84 [1] : vector<24x24xf32> to vector<24xf32>
    %198 = vector.shape_cast %197 : vector<24xf32> to vector<24x1xf32>
    %199 = vector.broadcast %198 : vector<24x1xf32> to vector<24x24xf32>
    %200 = arith.subf %196, %199 : vector<24x24xf32>
    %201 = math.exp %200 : vector<24x24xf32>
    %cst_85 = arith.constant dense<0.000000e+00> : vector<24xf32>
    %202 = vector.multi_reduction <add>, %201, %cst_85 [1] : vector<24x24xf32> to vector<24xf32>
    %203 = vector.shape_cast %202 : vector<24xf32> to vector<24x1xf32>
    %204 = tpu.reciprocal %203 {approx = true} : vector<24x1xf32> -> vector<24x1xf32>
    %205 = vector.broadcast %204 : vector<24x1xf32> to vector<24x24xf32>
    %206 = arith.mulf %201, %205 : vector<24x24xf32>
    %207 = arith.truncf %206 : vector<24x24xf32> to vector<24x24xbf16>
    %cst_86 = arith.constant dense<0.000000e+00> : vector<24x8xf32>
    %208 = tpu.matmul %207, %193, %cst_86 {dimension_numbers = #tpu.dot_dimension_numbers<[1], [0], [0], [1], [0, 0, 1, 1], [], []>} : vector<24x24xbf16>, vector<24x8xbf16>, vector<24x8xf32> -> vector<24x8xf32>
    %209 = tpu.concatenate %154, %172, %190, %208 in 1 : vector<24x8xf32>, vector<24x8xf32>, vector<24x8xf32>, vector<24x8xf32> -> vector<24x32xf32>
    %210 = tpu.concatenate %136, %209 in 0 : vector<24x32xf32>, vector<24x32xf32> -> vector<48x32xf32>
    %211 = arith.truncf %210 : vector<48x32xf32> to vector<48x32xbf16>
    %cst_87 = arith.constant dense<0.000000e+00> : vector<48x32xf32>
    %212 = tpu.matmul %211, %20, %cst_87 {dimension_numbers = #tpu.dot_dimension_numbers<[1], [0], [0], [1], [0, 0, 1, 1], [], []>} : vector<48x32xbf16>, vector<32x32xbf16>, vector<48x32xf32> -> vector<48x32xf32>
    %213 = vector.broadcast %22 : vector<1x32xf32> to vector<48x32xf32>
    %214 = arith.addf %212, %213 : vector<48x32xf32>
    %215 = vector.broadcast %24 : vector<1x32xf32> to vector<48x32xf32>
    %216 = arith.mulf %215, %214 : vector<48x32xf32>
    %217 = arith.addf %10, %216 : vector<48x32xf32>
    %cst_88 = arith.constant dense<0.000000e+00> : vector<48xf32>
    %218 = vector.multi_reduction <add>, %217, %cst_88 [1] : vector<48x32xf32> to vector<48xf32>
    %219 = vector.shape_cast %218 : vector<48xf32> to vector<48x1xf32>
    %cst_89 = arith.constant 3.200000e+01 : f32
    %220 = vector.broadcast %cst_89 : f32 to vector<48x1xf32>
    %221 = arith.divf %219, %220 : vector<48x1xf32>
    %222 = vector.broadcast %221 : vector<48x1xf32> to vector<48x32xf32>
    %223 = arith.subf %217, %222 : vector<48x32xf32>
    %224 = arith.mulf %223, %223 : vector<48x32xf32>
    %cst_90 = arith.constant dense<0.000000e+00> : vector<48xf32>
    %225 = vector.multi_reduction <add>, %224, %cst_90 [1] : vector<48x32xf32> to vector<48xf32>
    %226 = vector.shape_cast %225 : vector<48xf32> to vector<48x1xf32>
    %cst_91 = arith.constant 3.200000e+01 : f32
    %227 = vector.broadcast %cst_91 : f32 to vector<48x1xf32>
    %228 = arith.divf %226, %227 : vector<48x1xf32>
    %cst_92 = arith.constant 9.99999997E-7 : f32
    %229 = vector.broadcast %cst_92 : f32 to vector<48x1xf32>
    %230 = arith.addf %228, %229 : vector<48x1xf32>
    %231 = math.rsqrt %230 : vector<48x1xf32>
    %232 = vector.broadcast %231 : vector<48x1xf32> to vector<48x32xf32>
    %233 = arith.mulf %223, %232 : vector<48x32xf32>
    %234 = vector.broadcast %26 : vector<1x32xf32> to vector<48x32xf32>
    %235 = arith.mulf %233, %234 : vector<48x32xf32>
    %236 = vector.broadcast %28 : vector<1x32xf32> to vector<48x32xf32>
    %237 = arith.addf %235, %236 : vector<48x32xf32>
    %238 = arith.truncf %237 : vector<48x32xf32> to vector<48x32xbf16>
    %cst_93 = arith.constant dense<0.000000e+00> : vector<48x64xf32>
    %239 = tpu.matmul %238, %30, %cst_93 {dimension_numbers = #tpu.dot_dimension_numbers<[1], [0], [0], [1], [0, 0, 1, 1], [], []>} : vector<48x32xbf16>, vector<32x64xbf16>, vector<48x64xf32> -> vector<48x64xf32>
    %240 = vector.broadcast %32 : vector<1x64xf32> to vector<48x64xf32>
    %241 = arith.addf %239, %240 : vector<48x64xf32>
    %cst_94 = arith.constant 5.000000e-01 : f32
    %242 = vector.broadcast %cst_94 : f32 to vector<48x64xf32>
    %243 = arith.mulf %242, %241 : vector<48x64xf32>
    %244 = arith.mulf %241, %241 : vector<48x64xf32>
    %245 = arith.mulf %244, %241 : vector<48x64xf32>
    %cst_95 = arith.constant 4.471500e-02 : f32
    %246 = vector.broadcast %cst_95 : f32 to vector<48x64xf32>
    %247 = arith.mulf %246, %245 : vector<48x64xf32>
    %248 = arith.addf %241, %247 : vector<48x64xf32>
    %cst_96 = arith.constant 0.797884583 : f32
    %249 = vector.broadcast %cst_96 : f32 to vector<48x64xf32>
    %250 = arith.mulf %249, %248 : vector<48x64xf32>
    %251 = math.tanh %250 : vector<48x64xf32>
    %cst_97 = arith.constant 1.000000e+00 : f32
    %252 = vector.broadcast %cst_97 : f32 to vector<48x64xf32>
    %253 = arith.addf %252, %251 : vector<48x64xf32>
    %254 = arith.mulf %243, %253 : vector<48x64xf32>
    %255 = arith.truncf %254 : vector<48x64xf32> to vector<48x64xbf16>
    %cst_98 = arith.constant dense<0.000000e+00> : vector<48x32xf32>
    %256 = tpu.matmul %255, %34, %cst_98 {dimension_numbers = #tpu.dot_dimension_numbers<[1], [0], [0], [1], [0, 0, 1, 1], [], []>} : vector<48x64xbf16>, vector<64x32xbf16>, vector<48x32xf32> -> vector<48x32xf32>
    %257 = vector.broadcast %36 : vector<1x32xf32> to vector<48x32xf32>
    %258 = arith.addf %256, %257 : vector<48x32xf32>
    %259 = vector.broadcast %38 : vector<1x32xf32> to vector<48x32xf32>
    %260 = arith.mulf %259, %258 : vector<48x32xf32>
    %261 = arith.addf %217, %260 : vector<48x32xf32>
    %c1 = arith.constant 1 : index
    %c0_99 = arith.constant 0 : index
    %c0_100 = arith.constant 0 : index
    %262 = vector.load %arg4[%c1, %c0_99, %c0_100] : memref<2x1x32xf32, #tpu.memory_space<vmem>>, vector<1x1x32xf32>
    %263 = vector.shape_cast %262 : vector<1x1x32xf32> to vector<1x32xf32>
    %c1_101 = arith.constant 1 : index
    %c0_102 = arith.constant 0 : index
    %c0_103 = arith.constant 0 : index
    %264 = vector.load %arg5[%c1_101, %c0_102, %c0_103] : memref<2x1x32xf32, #tpu.memory_space<vmem>>, vector<1x1x32xf32>
    %265 = vector.shape_cast %264 : vector<1x1x32xf32> to vector<1x32xf32>
    %c1_104 = arith.constant 1 : index
    %c0_105 = arith.constant 0 : index
    %c0_106 = arith.constant 0 : index
    %266 = vector.load %arg6[%c1_104, %c0_105, %c0_106] : memref<2x32x96xbf16, #tpu.memory_space<vmem>>, vector<1x32x96xbf16>
    %267 = vector.shape_cast %266 : vector<1x32x96xbf16> to vector<32x96xbf16>
    %c1_107 = arith.constant 1 : index
    %c0_108 = arith.constant 0 : index
    %c0_109 = arith.constant 0 : index
    %268 = vector.load %arg7[%c1_107, %c0_108, %c0_109] : memref<2x1x96xf32, #tpu.memory_space<vmem>>, vector<1x1x96xf32>
    %269 = vector.shape_cast %268 : vector<1x1x96xf32> to vector<1x96xf32>
    %c1_110 = arith.constant 1 : index
    %c0_111 = arith.constant 0 : index
    %c0_112 = arith.constant 0 : index
    %270 = vector.load %arg8[%c1_110, %c0_111, %c0_112] : memref<2x32x32xbf16, #tpu.memory_space<vmem>>, vector<1x32x32xbf16>
    %271 = vector.shape_cast %270 : vector<1x32x32xbf16> to vector<32x32xbf16>
    %c1_113 = arith.constant 1 : index
    %c0_114 = arith.constant 0 : index
    %c0_115 = arith.constant 0 : index
    %272 = vector.load %arg9[%c1_113, %c0_114, %c0_115] : memref<2x1x32xf32, #tpu.memory_space<vmem>>, vector<1x1x32xf32>
    %273 = vector.shape_cast %272 : vector<1x1x32xf32> to vector<1x32xf32>
    %c1_116 = arith.constant 1 : index
    %c0_117 = arith.constant 0 : index
    %c0_118 = arith.constant 0 : index
    %274 = vector.load %arg10[%c1_116, %c0_117, %c0_118] : memref<2x1x32xf32, #tpu.memory_space<vmem>>, vector<1x1x32xf32>
    %275 = vector.shape_cast %274 : vector<1x1x32xf32> to vector<1x32xf32>
    %c1_119 = arith.constant 1 : index
    %c0_120 = arith.constant 0 : index
    %c0_121 = arith.constant 0 : index
    %276 = vector.load %arg11[%c1_119, %c0_120, %c0_121] : memref<2x1x32xf32, #tpu.memory_space<vmem>>, vector<1x1x32xf32>
    %277 = vector.shape_cast %276 : vector<1x1x32xf32> to vector<1x32xf32>
    %c1_122 = arith.constant 1 : index
    %c0_123 = arith.constant 0 : index
    %c0_124 = arith.constant 0 : index
    %278 = vector.load %arg12[%c1_122, %c0_123, %c0_124] : memref<2x1x32xf32, #tpu.memory_space<vmem>>, vector<1x1x32xf32>
    %279 = vector.shape_cast %278 : vector<1x1x32xf32> to vector<1x32xf32>
    %c1_125 = arith.constant 1 : index
    %c0_126 = arith.constant 0 : index
    %c0_127 = arith.constant 0 : index
    %280 = vector.load %arg13[%c1_125, %c0_126, %c0_127] : memref<2x32x64xbf16, #tpu.memory_space<vmem>>, vector<1x32x64xbf16>
    %281 = vector.shape_cast %280 : vector<1x32x64xbf16> to vector<32x64xbf16>
    %c1_128 = arith.constant 1 : index
    %c0_129 = arith.constant 0 : index
    %c0_130 = arith.constant 0 : index
    %282 = vector.load %arg14[%c1_128, %c0_129, %c0_130] : memref<2x1x64xf32, #tpu.memory_space<vmem>>, vector<1x1x64xf32>
    %283 = vector.shape_cast %282 : vector<1x1x64xf32> to vector<1x64xf32>
    %c1_131 = arith.constant 1 : index
    %c0_132 = arith.constant 0 : index
    %c0_133 = arith.constant 0 : index
    %284 = vector.load %arg15[%c1_131, %c0_132, %c0_133] : memref<2x64x32xbf16, #tpu.memory_space<vmem>>, vector<1x64x32xbf16>
    %285 = vector.shape_cast %284 : vector<1x64x32xbf16> to vector<64x32xbf16>
    %c1_134 = arith.constant 1 : index
    %c0_135 = arith.constant 0 : index
    %c0_136 = arith.constant 0 : index
    %286 = vector.load %arg16[%c1_134, %c0_135, %c0_136] : memref<2x1x32xf32, #tpu.memory_space<vmem>>, vector<1x1x32xf32>
    %287 = vector.shape_cast %286 : vector<1x1x32xf32> to vector<1x32xf32>
    %c1_137 = arith.constant 1 : index
    %c0_138 = arith.constant 0 : index
    %c0_139 = arith.constant 0 : index
    %288 = vector.load %arg17[%c1_137, %c0_138, %c0_139] : memref<2x1x32xf32, #tpu.memory_space<vmem>>, vector<1x1x32xf32>
    %289 = vector.shape_cast %288 : vector<1x1x32xf32> to vector<1x32xf32>
    %cst_140 = arith.constant dense<0.000000e+00> : vector<48xf32>
    %290 = vector.multi_reduction <add>, %261, %cst_140 [1] : vector<48x32xf32> to vector<48xf32>
    %291 = vector.shape_cast %290 : vector<48xf32> to vector<48x1xf32>
    %cst_141 = arith.constant 3.200000e+01 : f32
    %292 = vector.broadcast %cst_141 : f32 to vector<48x1xf32>
    %293 = arith.divf %291, %292 : vector<48x1xf32>
    %294 = vector.broadcast %293 : vector<48x1xf32> to vector<48x32xf32>
    %295 = arith.subf %261, %294 : vector<48x32xf32>
    %296 = arith.mulf %295, %295 : vector<48x32xf32>
    %cst_142 = arith.constant dense<0.000000e+00> : vector<48xf32>
    %297 = vector.multi_reduction <add>, %296, %cst_142 [1] : vector<48x32xf32> to vector<48xf32>
    %298 = vector.shape_cast %297 : vector<48xf32> to vector<48x1xf32>
    %cst_143 = arith.constant 3.200000e+01 : f32
    %299 = vector.broadcast %cst_143 : f32 to vector<48x1xf32>
    %300 = arith.divf %298, %299 : vector<48x1xf32>
    %cst_144 = arith.constant 9.99999997E-7 : f32
    %301 = vector.broadcast %cst_144 : f32 to vector<48x1xf32>
    %302 = arith.addf %300, %301 : vector<48x1xf32>
    %303 = math.rsqrt %302 : vector<48x1xf32>
    %304 = vector.broadcast %303 : vector<48x1xf32> to vector<48x32xf32>
    %305 = arith.mulf %295, %304 : vector<48x32xf32>
    %306 = vector.broadcast %263 : vector<1x32xf32> to vector<48x32xf32>
    %307 = arith.mulf %305, %306 : vector<48x32xf32>
    %308 = vector.broadcast %265 : vector<1x32xf32> to vector<48x32xf32>
    %309 = arith.addf %307, %308 : vector<48x32xf32>
    %310 = arith.truncf %309 : vector<48x32xf32> to vector<48x32xbf16>
    %cst_145 = arith.constant dense<0.000000e+00> : vector<48x96xf32>
    %311 = tpu.matmul %310, %267, %cst_145 {dimension_numbers = #tpu.dot_dimension_numbers<[1], [0], [0], [1], [0, 0, 1, 1], [], []>} : vector<48x32xbf16>, vector<32x96xbf16>, vector<48x96xf32> -> vector<48x96xf32>
    %312 = vector.broadcast %269 : vector<1x96xf32> to vector<48x96xf32>
    %313 = arith.addf %311, %312 : vector<48x96xf32>
    %314 = arith.truncf %313 : vector<48x96xf32> to vector<48x96xbf16>
    %315 = vector.extract_strided_slice %314 {offsets = [0, 0], sizes = [24, 8], strides = [1, 1]} : vector<48x96xbf16> to vector<24x8xbf16>
    %316 = vector.extract_strided_slice %314 {offsets = [0, 32], sizes = [24, 8], strides = [1, 1]} : vector<48x96xbf16> to vector<24x8xbf16>
    %317 = vector.extract_strided_slice %314 {offsets = [0, 64], sizes = [24, 8], strides = [1, 1]} : vector<48x96xbf16> to vector<24x8xbf16>
    %cst_146 = arith.constant dense<0.000000e+00> : vector<24x24xf32>
    %318 = tpu.matmul %315, %316, %cst_146 {dimension_numbers = #tpu.dot_dimension_numbers<[1], [1], [0], [0], [0, 0, 1, 0], [], []>} : vector<24x8xbf16>, vector<24x8xbf16>, vector<24x24xf32> -> vector<24x24xf32>
    %319 = vector.broadcast %5 : vector<1x24xf32> to vector<24x24xf32>
    %320 = arith.addf %318, %319 : vector<24x24xf32>
    %cst_147 = arith.constant dense<0xFF800000> : vector<24xf32>
    %321 = vector.multi_reduction <maximumf>, %320, %cst_147 [1] : vector<24x24xf32> to vector<24xf32>
    %322 = vector.shape_cast %321 : vector<24xf32> to vector<24x1xf32>
    %323 = vector.broadcast %322 : vector<24x1xf32> to vector<24x24xf32>
    %324 = arith.subf %320, %323 : vector<24x24xf32>
    %325 = math.exp %324 : vector<24x24xf32>
    %cst_148 = arith.constant dense<0.000000e+00> : vector<24xf32>
    %326 = vector.multi_reduction <add>, %325, %cst_148 [1] : vector<24x24xf32> to vector<24xf32>
    %327 = vector.shape_cast %326 : vector<24xf32> to vector<24x1xf32>
    %328 = tpu.reciprocal %327 {approx = true} : vector<24x1xf32> -> vector<24x1xf32>
    %329 = vector.broadcast %328 : vector<24x1xf32> to vector<24x24xf32>
    %330 = arith.mulf %325, %329 : vector<24x24xf32>
    %331 = arith.truncf %330 : vector<24x24xf32> to vector<24x24xbf16>
    %cst_149 = arith.constant dense<0.000000e+00> : vector<24x8xf32>
    %332 = tpu.matmul %331, %317, %cst_149 {dimension_numbers = #tpu.dot_dimension_numbers<[1], [0], [0], [1], [0, 0, 1, 1], [], []>} : vector<24x24xbf16>, vector<24x8xbf16>, vector<24x8xf32> -> vector<24x8xf32>
    %333 = vector.extract_strided_slice %314 {offsets = [0, 8], sizes = [24, 8], strides = [1, 1]} : vector<48x96xbf16> to vector<24x8xbf16>
    %334 = vector.extract_strided_slice %314 {offsets = [0, 40], sizes = [24, 8], strides = [1, 1]} : vector<48x96xbf16> to vector<24x8xbf16>
    %335 = vector.extract_strided_slice %314 {offsets = [0, 72], sizes = [24, 8], strides = [1, 1]} : vector<48x96xbf16> to vector<24x8xbf16>
    %cst_150 = arith.constant dense<0.000000e+00> : vector<24x24xf32>
    %336 = tpu.matmul %333, %334, %cst_150 {dimension_numbers = #tpu.dot_dimension_numbers<[1], [1], [0], [0], [0, 0, 1, 0], [], []>} : vector<24x8xbf16>, vector<24x8xbf16>, vector<24x24xf32> -> vector<24x24xf32>
    %337 = vector.broadcast %5 : vector<1x24xf32> to vector<24x24xf32>
    %338 = arith.addf %336, %337 : vector<24x24xf32>
    %cst_151 = arith.constant dense<0xFF800000> : vector<24xf32>
    %339 = vector.multi_reduction <maximumf>, %338, %cst_151 [1] : vector<24x24xf32> to vector<24xf32>
    %340 = vector.shape_cast %339 : vector<24xf32> to vector<24x1xf32>
    %341 = vector.broadcast %340 : vector<24x1xf32> to vector<24x24xf32>
    %342 = arith.subf %338, %341 : vector<24x24xf32>
    %343 = math.exp %342 : vector<24x24xf32>
    %cst_152 = arith.constant dense<0.000000e+00> : vector<24xf32>
    %344 = vector.multi_reduction <add>, %343, %cst_152 [1] : vector<24x24xf32> to vector<24xf32>
    %345 = vector.shape_cast %344 : vector<24xf32> to vector<24x1xf32>
    %346 = tpu.reciprocal %345 {approx = true} : vector<24x1xf32> -> vector<24x1xf32>
    %347 = vector.broadcast %346 : vector<24x1xf32> to vector<24x24xf32>
    %348 = arith.mulf %343, %347 : vector<24x24xf32>
    %349 = arith.truncf %348 : vector<24x24xf32> to vector<24x24xbf16>
    %cst_153 = arith.constant dense<0.000000e+00> : vector<24x8xf32>
    %350 = tpu.matmul %349, %335, %cst_153 {dimension_numbers = #tpu.dot_dimension_numbers<[1], [0], [0], [1], [0, 0, 1, 1], [], []>} : vector<24x24xbf16>, vector<24x8xbf16>, vector<24x8xf32> -> vector<24x8xf32>
    %351 = vector.extract_strided_slice %314 {offsets = [0, 16], sizes = [24, 8], strides = [1, 1]} : vector<48x96xbf16> to vector<24x8xbf16>
    %352 = vector.extract_strided_slice %314 {offsets = [0, 48], sizes = [24, 8], strides = [1, 1]} : vector<48x96xbf16> to vector<24x8xbf16>
    %353 = vector.extract_strided_slice %314 {offsets = [0, 80], sizes = [24, 8], strides = [1, 1]} : vector<48x96xbf16> to vector<24x8xbf16>
    %cst_154 = arith.constant dense<0.000000e+00> : vector<24x24xf32>
    %354 = tpu.matmul %351, %352, %cst_154 {dimension_numbers = #tpu.dot_dimension_numbers<[1], [1], [0], [0], [0, 0, 1, 0], [], []>} : vector<24x8xbf16>, vector<24x8xbf16>, vector<24x24xf32> -> vector<24x24xf32>
    %355 = vector.broadcast %5 : vector<1x24xf32> to vector<24x24xf32>
    %356 = arith.addf %354, %355 : vector<24x24xf32>
    %cst_155 = arith.constant dense<0xFF800000> : vector<24xf32>
    %357 = vector.multi_reduction <maximumf>, %356, %cst_155 [1] : vector<24x24xf32> to vector<24xf32>
    %358 = vector.shape_cast %357 : vector<24xf32> to vector<24x1xf32>
    %359 = vector.broadcast %358 : vector<24x1xf32> to vector<24x24xf32>
    %360 = arith.subf %356, %359 : vector<24x24xf32>
    %361 = math.exp %360 : vector<24x24xf32>
    %cst_156 = arith.constant dense<0.000000e+00> : vector<24xf32>
    %362 = vector.multi_reduction <add>, %361, %cst_156 [1] : vector<24x24xf32> to vector<24xf32>
    %363 = vector.shape_cast %362 : vector<24xf32> to vector<24x1xf32>
    %364 = tpu.reciprocal %363 {approx = true} : vector<24x1xf32> -> vector<24x1xf32>
    %365 = vector.broadcast %364 : vector<24x1xf32> to vector<24x24xf32>
    %366 = arith.mulf %361, %365 : vector<24x24xf32>
    %367 = arith.truncf %366 : vector<24x24xf32> to vector<24x24xbf16>
    %cst_157 = arith.constant dense<0.000000e+00> : vector<24x8xf32>
    %368 = tpu.matmul %367, %353, %cst_157 {dimension_numbers = #tpu.dot_dimension_numbers<[1], [0], [0], [1], [0, 0, 1, 1], [], []>} : vector<24x24xbf16>, vector<24x8xbf16>, vector<24x8xf32> -> vector<24x8xf32>
    %369 = vector.extract_strided_slice %314 {offsets = [0, 24], sizes = [24, 8], strides = [1, 1]} : vector<48x96xbf16> to vector<24x8xbf16>
    %370 = vector.extract_strided_slice %314 {offsets = [0, 56], sizes = [24, 8], strides = [1, 1]} : vector<48x96xbf16> to vector<24x8xbf16>
    %371 = vector.extract_strided_slice %314 {offsets = [0, 88], sizes = [24, 8], strides = [1, 1]} : vector<48x96xbf16> to vector<24x8xbf16>
    %cst_158 = arith.constant dense<0.000000e+00> : vector<24x24xf32>
    %372 = tpu.matmul %369, %370, %cst_158 {dimension_numbers = #tpu.dot_dimension_numbers<[1], [1], [0], [0], [0, 0, 1, 0], [], []>} : vector<24x8xbf16>, vector<24x8xbf16>, vector<24x24xf32> -> vector<24x24xf32>
    %373 = vector.broadcast %5 : vector<1x24xf32> to vector<24x24xf32>
    %374 = arith.addf %372, %373 : vector<24x24xf32>
    %cst_159 = arith.constant dense<0xFF800000> : vector<24xf32>
    %375 = vector.multi_reduction <maximumf>, %374, %cst_159 [1] : vector<24x24xf32> to vector<24xf32>
    %376 = vector.shape_cast %375 : vector<24xf32> to vector<24x1xf32>
    %377 = vector.broadcast %376 : vector<24x1xf32> to vector<24x24xf32>
    %378 = arith.subf %374, %377 : vector<24x24xf32>
    %379 = math.exp %378 : vector<24x24xf32>
    %cst_160 = arith.constant dense<0.000000e+00> : vector<24xf32>
    %380 = vector.multi_reduction <add>, %379, %cst_160 [1] : vector<24x24xf32> to vector<24xf32>
    %381 = vector.shape_cast %380 : vector<24xf32> to vector<24x1xf32>
    %382 = tpu.reciprocal %381 {approx = true} : vector<24x1xf32> -> vector<24x1xf32>
    %383 = vector.broadcast %382 : vector<24x1xf32> to vector<24x24xf32>
    %384 = arith.mulf %379, %383 : vector<24x24xf32>
    %385 = arith.truncf %384 : vector<24x24xf32> to vector<24x24xbf16>
    %cst_161 = arith.constant dense<0.000000e+00> : vector<24x8xf32>
    %386 = tpu.matmul %385, %371, %cst_161 {dimension_numbers = #tpu.dot_dimension_numbers<[1], [0], [0], [1], [0, 0, 1, 1], [], []>} : vector<24x24xbf16>, vector<24x8xbf16>, vector<24x8xf32> -> vector<24x8xf32>
    %387 = tpu.concatenate %332, %350, %368, %386 in 1 : vector<24x8xf32>, vector<24x8xf32>, vector<24x8xf32>, vector<24x8xf32> -> vector<24x32xf32>
    %388 = vector.extract_strided_slice %314 {offsets = [24, 0], sizes = [24, 8], strides = [1, 1]} : vector<48x96xbf16> to vector<24x8xbf16>
    %389 = vector.extract_strided_slice %314 {offsets = [24, 32], sizes = [24, 8], strides = [1, 1]} : vector<48x96xbf16> to vector<24x8xbf16>
    %390 = vector.extract_strided_slice %314 {offsets = [24, 64], sizes = [24, 8], strides = [1, 1]} : vector<48x96xbf16> to vector<24x8xbf16>
    %cst_162 = arith.constant dense<0.000000e+00> : vector<24x24xf32>
    %391 = tpu.matmul %388, %389, %cst_162 {dimension_numbers = #tpu.dot_dimension_numbers<[1], [1], [0], [0], [0, 0, 1, 0], [], []>} : vector<24x8xbf16>, vector<24x8xbf16>, vector<24x24xf32> -> vector<24x24xf32>
    %392 = vector.broadcast %5 : vector<1x24xf32> to vector<24x24xf32>
    %393 = arith.addf %391, %392 : vector<24x24xf32>
    %cst_163 = arith.constant dense<0xFF800000> : vector<24xf32>
    %394 = vector.multi_reduction <maximumf>, %393, %cst_163 [1] : vector<24x24xf32> to vector<24xf32>
    %395 = vector.shape_cast %394 : vector<24xf32> to vector<24x1xf32>
    %396 = vector.broadcast %395 : vector<24x1xf32> to vector<24x24xf32>
    %397 = arith.subf %393, %396 : vector<24x24xf32>
    %398 = math.exp %397 : vector<24x24xf32>
    %cst_164 = arith.constant dense<0.000000e+00> : vector<24xf32>
    %399 = vector.multi_reduction <add>, %398, %cst_164 [1] : vector<24x24xf32> to vector<24xf32>
    %400 = vector.shape_cast %399 : vector<24xf32> to vector<24x1xf32>
    %401 = tpu.reciprocal %400 {approx = true} : vector<24x1xf32> -> vector<24x1xf32>
    %402 = vector.broadcast %401 : vector<24x1xf32> to vector<24x24xf32>
    %403 = arith.mulf %398, %402 : vector<24x24xf32>
    %404 = arith.truncf %403 : vector<24x24xf32> to vector<24x24xbf16>
    %cst_165 = arith.constant dense<0.000000e+00> : vector<24x8xf32>
    %405 = tpu.matmul %404, %390, %cst_165 {dimension_numbers = #tpu.dot_dimension_numbers<[1], [0], [0], [1], [0, 0, 1, 1], [], []>} : vector<24x24xbf16>, vector<24x8xbf16>, vector<24x8xf32> -> vector<24x8xf32>
    %406 = vector.extract_strided_slice %314 {offsets = [24, 8], sizes = [24, 8], strides = [1, 1]} : vector<48x96xbf16> to vector<24x8xbf16>
    %407 = vector.extract_strided_slice %314 {offsets = [24, 40], sizes = [24, 8], strides = [1, 1]} : vector<48x96xbf16> to vector<24x8xbf16>
    %408 = vector.extract_strided_slice %314 {offsets = [24, 72], sizes = [24, 8], strides = [1, 1]} : vector<48x96xbf16> to vector<24x8xbf16>
    %cst_166 = arith.constant dense<0.000000e+00> : vector<24x24xf32>
    %409 = tpu.matmul %406, %407, %cst_166 {dimension_numbers = #tpu.dot_dimension_numbers<[1], [1], [0], [0], [0, 0, 1, 0], [], []>} : vector<24x8xbf16>, vector<24x8xbf16>, vector<24x24xf32> -> vector<24x24xf32>
    %410 = vector.broadcast %5 : vector<1x24xf32> to vector<24x24xf32>
    %411 = arith.addf %409, %410 : vector<24x24xf32>
    %cst_167 = arith.constant dense<0xFF800000> : vector<24xf32>
    %412 = vector.multi_reduction <maximumf>, %411, %cst_167 [1] : vector<24x24xf32> to vector<24xf32>
    %413 = vector.shape_cast %412 : vector<24xf32> to vector<24x1xf32>
    %414 = vector.broadcast %413 : vector<24x1xf32> to vector<24x24xf32>
    %415 = arith.subf %411, %414 : vector<24x24xf32>
    %416 = math.exp %415 : vector<24x24xf32>
    %cst_168 = arith.constant dense<0.000000e+00> : vector<24xf32>
    %417 = vector.multi_reduction <add>, %416, %cst_168 [1] : vector<24x24xf32> to vector<24xf32>
    %418 = vector.shape_cast %417 : vector<24xf32> to vector<24x1xf32>
    %419 = tpu.reciprocal %418 {approx = true} : vector<24x1xf32> -> vector<24x1xf32>
    %420 = vector.broadcast %419 : vector<24x1xf32> to vector<24x24xf32>
    %421 = arith.mulf %416, %420 : vector<24x24xf32>
    %422 = arith.truncf %421 : vector<24x24xf32> to vector<24x24xbf16>
    %cst_169 = arith.constant dense<0.000000e+00> : vector<24x8xf32>
    %423 = tpu.matmul %422, %408, %cst_169 {dimension_numbers = #tpu.dot_dimension_numbers<[1], [0], [0], [1], [0, 0, 1, 1], [], []>} : vector<24x24xbf16>, vector<24x8xbf16>, vector<24x8xf32> -> vector<24x8xf32>
    %424 = vector.extract_strided_slice %314 {offsets = [24, 16], sizes = [24, 8], strides = [1, 1]} : vector<48x96xbf16> to vector<24x8xbf16>
    %425 = vector.extract_strided_slice %314 {offsets = [24, 48], sizes = [24, 8], strides = [1, 1]} : vector<48x96xbf16> to vector<24x8xbf16>
    %426 = vector.extract_strided_slice %314 {offsets = [24, 80], sizes = [24, 8], strides = [1, 1]} : vector<48x96xbf16> to vector<24x8xbf16>
    %cst_170 = arith.constant dense<0.000000e+00> : vector<24x24xf32>
    %427 = tpu.matmul %424, %425, %cst_170 {dimension_numbers = #tpu.dot_dimension_numbers<[1], [1], [0], [0], [0, 0, 1, 0], [], []>} : vector<24x8xbf16>, vector<24x8xbf16>, vector<24x24xf32> -> vector<24x24xf32>
    %428 = vector.broadcast %5 : vector<1x24xf32> to vector<24x24xf32>
    %429 = arith.addf %427, %428 : vector<24x24xf32>
    %cst_171 = arith.constant dense<0xFF800000> : vector<24xf32>
    %430 = vector.multi_reduction <maximumf>, %429, %cst_171 [1] : vector<24x24xf32> to vector<24xf32>
    %431 = vector.shape_cast %430 : vector<24xf32> to vector<24x1xf32>
    %432 = vector.broadcast %431 : vector<24x1xf32> to vector<24x24xf32>
    %433 = arith.subf %429, %432 : vector<24x24xf32>
    %434 = math.exp %433 : vector<24x24xf32>
    %cst_172 = arith.constant dense<0.000000e+00> : vector<24xf32>
    %435 = vector.multi_reduction <add>, %434, %cst_172 [1] : vector<24x24xf32> to vector<24xf32>
    %436 = vector.shape_cast %435 : vector<24xf32> to vector<24x1xf32>
    %437 = tpu.reciprocal %436 {approx = true} : vector<24x1xf32> -> vector<24x1xf32>
    %438 = vector.broadcast %437 : vector<24x1xf32> to vector<24x24xf32>
    %439 = arith.mulf %434, %438 : vector<24x24xf32>
    %440 = arith.truncf %439 : vector<24x24xf32> to vector<24x24xbf16>
    %cst_173 = arith.constant dense<0.000000e+00> : vector<24x8xf32>
    %441 = tpu.matmul %440, %426, %cst_173 {dimension_numbers = #tpu.dot_dimension_numbers<[1], [0], [0], [1], [0, 0, 1, 1], [], []>} : vector<24x24xbf16>, vector<24x8xbf16>, vector<24x8xf32> -> vector<24x8xf32>
    %442 = vector.extract_strided_slice %314 {offsets = [24, 24], sizes = [24, 8], strides = [1, 1]} : vector<48x96xbf16> to vector<24x8xbf16>
    %443 = vector.extract_strided_slice %314 {offsets = [24, 56], sizes = [24, 8], strides = [1, 1]} : vector<48x96xbf16> to vector<24x8xbf16>
    %444 = vector.extract_strided_slice %314 {offsets = [24, 88], sizes = [24, 8], strides = [1, 1]} : vector<48x96xbf16> to vector<24x8xbf16>
    %cst_174 = arith.constant dense<0.000000e+00> : vector<24x24xf32>
    %445 = tpu.matmul %442, %443, %cst_174 {dimension_numbers = #tpu.dot_dimension_numbers<[1], [1], [0], [0], [0, 0, 1, 0], [], []>} : vector<24x8xbf16>, vector<24x8xbf16>, vector<24x24xf32> -> vector<24x24xf32>
    %446 = vector.broadcast %5 : vector<1x24xf32> to vector<24x24xf32>
    %447 = arith.addf %445, %446 : vector<24x24xf32>
    %cst_175 = arith.constant dense<0xFF800000> : vector<24xf32>
    %448 = vector.multi_reduction <maximumf>, %447, %cst_175 [1] : vector<24x24xf32> to vector<24xf32>
    %449 = vector.shape_cast %448 : vector<24xf32> to vector<24x1xf32>
    %450 = vector.broadcast %449 : vector<24x1xf32> to vector<24x24xf32>
    %451 = arith.subf %447, %450 : vector<24x24xf32>
    %452 = math.exp %451 : vector<24x24xf32>
    %cst_176 = arith.constant dense<0.000000e+00> : vector<24xf32>
    %453 = vector.multi_reduction <add>, %452, %cst_176 [1] : vector<24x24xf32> to vector<24xf32>
    %454 = vector.shape_cast %453 : vector<24xf32> to vector<24x1xf32>
    %455 = tpu.reciprocal %454 {approx = true} : vector<24x1xf32> -> vector<24x1xf32>
    %456 = vector.broadcast %455 : vector<24x1xf32> to vector<24x24xf32>
    %457 = arith.mulf %452, %456 : vector<24x24xf32>
    %458 = arith.truncf %457 : vector<24x24xf32> to vector<24x24xbf16>
    %cst_177 = arith.constant dense<0.000000e+00> : vector<24x8xf32>
    %459 = tpu.matmul %458, %444, %cst_177 {dimension_numbers = #tpu.dot_dimension_numbers<[1], [0], [0], [1], [0, 0, 1, 1], [], []>} : vector<24x24xbf16>, vector<24x8xbf16>, vector<24x8xf32> -> vector<24x8xf32>
    %460 = tpu.concatenate %405, %423, %441, %459 in 1 : vector<24x8xf32>, vector<24x8xf32>, vector<24x8xf32>, vector<24x8xf32> -> vector<24x32xf32>
    %461 = tpu.concatenate %387, %460 in 0 : vector<24x32xf32>, vector<24x32xf32> -> vector<48x32xf32>
    %462 = arith.truncf %461 : vector<48x32xf32> to vector<48x32xbf16>
    %cst_178 = arith.constant dense<0.000000e+00> : vector<48x32xf32>
    %463 = tpu.matmul %462, %271, %cst_178 {dimension_numbers = #tpu.dot_dimension_numbers<[1], [0], [0], [1], [0, 0, 1, 1], [], []>} : vector<48x32xbf16>, vector<32x32xbf16>, vector<48x32xf32> -> vector<48x32xf32>
    %464 = vector.broadcast %273 : vector<1x32xf32> to vector<48x32xf32>
    %465 = arith.addf %463, %464 : vector<48x32xf32>
    %466 = vector.broadcast %275 : vector<1x32xf32> to vector<48x32xf32>
    %467 = arith.mulf %466, %465 : vector<48x32xf32>
    %468 = arith.addf %261, %467 : vector<48x32xf32>
    %cst_179 = arith.constant dense<0.000000e+00> : vector<48xf32>
    %469 = vector.multi_reduction <add>, %468, %cst_179 [1] : vector<48x32xf32> to vector<48xf32>
    %470 = vector.shape_cast %469 : vector<48xf32> to vector<48x1xf32>
    %cst_180 = arith.constant 3.200000e+01 : f32
    %471 = vector.broadcast %cst_180 : f32 to vector<48x1xf32>
    %472 = arith.divf %470, %471 : vector<48x1xf32>
    %473 = vector.broadcast %472 : vector<48x1xf32> to vector<48x32xf32>
    %474 = arith.subf %468, %473 : vector<48x32xf32>
    %475 = arith.mulf %474, %474 : vector<48x32xf32>
    %cst_181 = arith.constant dense<0.000000e+00> : vector<48xf32>
    %476 = vector.multi_reduction <add>, %475, %cst_181 [1] : vector<48x32xf32> to vector<48xf32>
    %477 = vector.shape_cast %476 : vector<48xf32> to vector<48x1xf32>
    %cst_182 = arith.constant 3.200000e+01 : f32
    %478 = vector.broadcast %cst_182 : f32 to vector<48x1xf32>
    %479 = arith.divf %477, %478 : vector<48x1xf32>
    %cst_183 = arith.constant 9.99999997E-7 : f32
    %480 = vector.broadcast %cst_183 : f32 to vector<48x1xf32>
    %481 = arith.addf %479, %480 : vector<48x1xf32>
    %482 = math.rsqrt %481 : vector<48x1xf32>
    %483 = vector.broadcast %482 : vector<48x1xf32> to vector<48x32xf32>
    %484 = arith.mulf %474, %483 : vector<48x32xf32>
    %485 = vector.broadcast %277 : vector<1x32xf32> to vector<48x32xf32>
    %486 = arith.mulf %484, %485 : vector<48x32xf32>
    %487 = vector.broadcast %279 : vector<1x32xf32> to vector<48x32xf32>
    %488 = arith.addf %486, %487 : vector<48x32xf32>
    %489 = arith.truncf %488 : vector<48x32xf32> to vector<48x32xbf16>
    %cst_184 = arith.constant dense<0.000000e+00> : vector<48x64xf32>
    %490 = tpu.matmul %489, %281, %cst_184 {dimension_numbers = #tpu.dot_dimension_numbers<[1], [0], [0], [1], [0, 0, 1, 1], [], []>} : vector<48x32xbf16>, vector<32x64xbf16>, vector<48x64xf32> -> vector<48x64xf32>
    %491 = vector.broadcast %283 : vector<1x64xf32> to vector<48x64xf32>
    %492 = arith.addf %490, %491 : vector<48x64xf32>
    %cst_185 = arith.constant 5.000000e-01 : f32
    %493 = vector.broadcast %cst_185 : f32 to vector<48x64xf32>
    %494 = arith.mulf %493, %492 : vector<48x64xf32>
    %495 = arith.mulf %492, %492 : vector<48x64xf32>
    %496 = arith.mulf %495, %492 : vector<48x64xf32>
    %cst_186 = arith.constant 4.471500e-02 : f32
    %497 = vector.broadcast %cst_186 : f32 to vector<48x64xf32>
    %498 = arith.mulf %497, %496 : vector<48x64xf32>
    %499 = arith.addf %492, %498 : vector<48x64xf32>
    %cst_187 = arith.constant 0.797884583 : f32
    %500 = vector.broadcast %cst_187 : f32 to vector<48x64xf32>
    %501 = arith.mulf %500, %499 : vector<48x64xf32>
    %502 = math.tanh %501 : vector<48x64xf32>
    %cst_188 = arith.constant 1.000000e+00 : f32
    %503 = vector.broadcast %cst_188 : f32 to vector<48x64xf32>
    %504 = arith.addf %503, %502 : vector<48x64xf32>
    %505 = arith.mulf %494, %504 : vector<48x64xf32>
    %506 = arith.truncf %505 : vector<48x64xf32> to vector<48x64xbf16>
    %cst_189 = arith.constant dense<0.000000e+00> : vector<48x32xf32>
    %507 = tpu.matmul %506, %285, %cst_189 {dimension_numbers = #tpu.dot_dimension_numbers<[1], [0], [0], [1], [0, 0, 1, 1], [], []>} : vector<48x64xbf16>, vector<64x32xbf16>, vector<48x32xf32> -> vector<48x32xf32>
    %508 = vector.broadcast %287 : vector<1x32xf32> to vector<48x32xf32>
    %509 = arith.addf %507, %508 : vector<48x32xf32>
    %510 = vector.broadcast %289 : vector<1x32xf32> to vector<48x32xf32>
    %511 = arith.mulf %510, %509 : vector<48x32xf32>
    %512 = arith.addf %468, %511 : vector<48x32xf32>
    %c0_190 = arith.constant 0 : index
    %c0_191 = arith.constant 0 : index
    %513 = vector.load %arg18[%c0_190, %c0_191] : memref<1x32xf32, #tpu.memory_space<vmem>>, vector<1x32xf32>
    %c0_192 = arith.constant 0 : index
    %c0_193 = arith.constant 0 : index
    %514 = vector.load %arg19[%c0_192, %c0_193] : memref<1x32xf32, #tpu.memory_space<vmem>>, vector<1x32xf32>
    %cst_194 = arith.constant dense<0.000000e+00> : vector<48xf32>
    %515 = vector.multi_reduction <add>, %512, %cst_194 [1] : vector<48x32xf32> to vector<48xf32>
    %516 = vector.shape_cast %515 : vector<48xf32> to vector<48x1xf32>
    %cst_195 = arith.constant 3.200000e+01 : f32
    %517 = vector.broadcast %cst_195 : f32 to vector<48x1xf32>
    %518 = arith.divf %516, %517 : vector<48x1xf32>
    %519 = vector.broadcast %518 : vector<48x1xf32> to vector<48x32xf32>
    %520 = arith.subf %512, %519 : vector<48x32xf32>
    %521 = arith.mulf %520, %520 : vector<48x32xf32>
    %cst_196 = arith.constant dense<0.000000e+00> : vector<48xf32>
    %522 = vector.multi_reduction <add>, %521, %cst_196 [1] : vector<48x32xf32> to vector<48xf32>
    %523 = vector.shape_cast %522 : vector<48xf32> to vector<48x1xf32>
    %cst_197 = arith.constant 3.200000e+01 : f32
    %524 = vector.broadcast %cst_197 : f32 to vector<48x1xf32>
    %525 = arith.divf %523, %524 : vector<48x1xf32>
    %cst_198 = arith.constant 9.99999997E-7 : f32
    %526 = vector.broadcast %cst_198 : f32 to vector<48x1xf32>
    %527 = arith.addf %525, %526 : vector<48x1xf32>
    %528 = math.rsqrt %527 : vector<48x1xf32>
    %529 = vector.broadcast %528 : vector<48x1xf32> to vector<48x32xf32>
    %530 = arith.mulf %520, %529 : vector<48x32xf32>
    %531 = vector.broadcast %513 : vector<1x32xf32> to vector<48x32xf32>
    %532 = arith.mulf %530, %531 : vector<48x32xf32>
    %533 = vector.broadcast %514 : vector<1x32xf32> to vector<48x32xf32>
    %534 = arith.addf %532, %533 : vector<48x32xf32>
    %535 = vector.extract_strided_slice %534 {offsets = [0, 0], sizes = [1, 32], strides = [1, 1]} : vector<48x32xf32> to vector<1x32xf32>
    %536 = vector.extract_strided_slice %534 {offsets = [24, 0], sizes = [1, 32], strides = [1, 1]} : vector<48x32xf32> to vector<1x32xf32>
    %537 = tpu.concatenate %535, %536 in 0 : vector<1x32xf32>, vector<1x32xf32> -> vector<2x32xf32>
    %c0_199 = arith.constant 0 : index
    %c0_200 = arith.constant 0 : index
    %538 = vector.load %arg20[%c0_199, %c0_200] : memref<2x32xf32, #tpu.memory_space<vmem>>, vector<2x32xf32>
    tpu.vector_store %arg20[%c0_199, %c0_200], %537 {strides = array<i32>} : memref<2x32xf32, #tpu.memory_space<vmem>>, vector<2x32xf32>,
    return
  }
  func.func @transform_0(%arg0: i32) -> (i32, i32) {
    %c0_i32 = arith.constant 0 : i32
    %c0_i32_0 = arith.constant 0 : i32
    %c0_i32_1 = arith.constant 0 : i32
    return %c0_i32, %c0_i32_0 : i32, i32
  }
  func.func @transform_1(%arg0: i32) -> (i32, i32) {
    %c0_i32 = arith.constant 0 : i32
    %c0_i32_0 = arith.constant 0 : i32
    %c0_i32_1 = arith.constant 0 : i32
    return %c0_i32, %c0_i32_0 : i32, i32
  }
  func.func @transform_2(%arg0: i32) -> (i32, i32) {
    %c0_i32 = arith.constant 0 : i32
    %c0_i32_0 = arith.constant 0 : i32
    %c0_i32_1 = arith.constant 0 : i32
    return %c0_i32, %c0_i32_0 : i32, i32
  }
  func.func @transform_3(%arg0: i32) -> (i32, i32, i32) {
    %c0_i32 = arith.constant 0 : i32
    %c0_i32_0 = arith.constant 0 : i32
    %c0_i32_1 = arith.constant 0 : i32
    %c0_i32_2 = arith.constant 0 : i32
    return %c0_i32, %c0_i32_0, %c0_i32_1 : i32, i32, i32
  }
  func.func @transform_4(%arg0: i32) -> (i32, i32, i32) {
    %c0_i32 = arith.constant 0 : i32
    %c0_i32_0 = arith.constant 0 : i32
    %c0_i32_1 = arith.constant 0 : i32
    %c0_i32_2 = arith.constant 0 : i32
    return %c0_i32, %c0_i32_0, %c0_i32_1 : i32, i32, i32
  }
  func.func @transform_5(%arg0: i32) -> (i32, i32, i32) {
    %c0_i32 = arith.constant 0 : i32
    %c0_i32_0 = arith.constant 0 : i32
    %c0_i32_1 = arith.constant 0 : i32
    %c0_i32_2 = arith.constant 0 : i32
    return %c0_i32, %c0_i32_0, %c0_i32_1 : i32, i32, i32
  }
  func.func @transform_6(%arg0: i32) -> (i32, i32, i32) {
    %c0_i32 = arith.constant 0 : i32
    %c0_i32_0 = arith.constant 0 : i32
    %c0_i32_1 = arith.constant 0 : i32
    %c0_i32_2 = arith.constant 0 : i32
    return %c0_i32, %c0_i32_0, %c0_i32_1 : i32, i32, i32
  }
  func.func @transform_7(%arg0: i32) -> (i32, i32, i32) {
    %c0_i32 = arith.constant 0 : i32
    %c0_i32_0 = arith.constant 0 : i32
    %c0_i32_1 = arith.constant 0 : i32
    %c0_i32_2 = arith.constant 0 : i32
    return %c0_i32, %c0_i32_0, %c0_i32_1 : i32, i32, i32
  }
  func.func @transform_8(%arg0: i32) -> (i32, i32, i32) {
    %c0_i32 = arith.constant 0 : i32
    %c0_i32_0 = arith.constant 0 : i32
    %c0_i32_1 = arith.constant 0 : i32
    %c0_i32_2 = arith.constant 0 : i32
    return %c0_i32, %c0_i32_0, %c0_i32_1 : i32, i32, i32
  }
  func.func @transform_9(%arg0: i32) -> (i32, i32, i32) {
    %c0_i32 = arith.constant 0 : i32
    %c0_i32_0 = arith.constant 0 : i32
    %c0_i32_1 = arith.constant 0 : i32
    %c0_i32_2 = arith.constant 0 : i32
    return %c0_i32, %c0_i32_0, %c0_i32_1 : i32, i32, i32
  }
  func.func @transform_10(%arg0: i32) -> (i32, i32, i32) {
    %c0_i32 = arith.constant 0 : i32
    %c0_i32_0 = arith.constant 0 : i32
    %c0_i32_1 = arith.constant 0 : i32
    %c0_i32_2 = arith.constant 0 : i32
    return %c0_i32, %c0_i32_0, %c0_i32_1 : i32, i32, i32
  }
  func.func @transform_11(%arg0: i32) -> (i32, i32, i32) {
    %c0_i32 = arith.constant 0 : i32
    %c0_i32_0 = arith.constant 0 : i32
    %c0_i32_1 = arith.constant 0 : i32
    %c0_i32_2 = arith.constant 0 : i32
    return %c0_i32, %c0_i32_0, %c0_i32_1 : i32, i32, i32
  }
  func.func @transform_12(%arg0: i32) -> (i32, i32, i32) {
    %c0_i32 = arith.constant 0 : i32
    %c0_i32_0 = arith.constant 0 : i32
    %c0_i32_1 = arith.constant 0 : i32
    %c0_i32_2 = arith.constant 0 : i32
    return %c0_i32, %c0_i32_0, %c0_i32_1 : i32, i32, i32
  }
  func.func @transform_13(%arg0: i32) -> (i32, i32, i32) {
    %c0_i32 = arith.constant 0 : i32
    %c0_i32_0 = arith.constant 0 : i32
    %c0_i32_1 = arith.constant 0 : i32
    %c0_i32_2 = arith.constant 0 : i32
    return %c0_i32, %c0_i32_0, %c0_i32_1 : i32, i32, i32
  }
  func.func @transform_14(%arg0: i32) -> (i32, i32, i32) {
    %c0_i32 = arith.constant 0 : i32
    %c0_i32_0 = arith.constant 0 : i32
    %c0_i32_1 = arith.constant 0 : i32
    %c0_i32_2 = arith.constant 0 : i32
    return %c0_i32, %c0_i32_0, %c0_i32_1 : i32, i32, i32
  }
  func.func @transform_15(%arg0: i32) -> (i32, i32, i32) {
    %c0_i32 = arith.constant 0 : i32
    %c0_i32_0 = arith.constant 0 : i32
    %c0_i32_1 = arith.constant 0 : i32
    %c0_i32_2 = arith.constant 0 : i32
    return %c0_i32, %c0_i32_0, %c0_i32_1 : i32, i32, i32
  }
  func.func @transform_16(%arg0: i32) -> (i32, i32, i32) {
    %c0_i32 = arith.constant 0 : i32
    %c0_i32_0 = arith.constant 0 : i32
    %c0_i32_1 = arith.constant 0 : i32
    %c0_i32_2 = arith.constant 0 : i32
    return %c0_i32, %c0_i32_0, %c0_i32_1 : i32, i32, i32
  }
  func.func @transform_17(%arg0: i32) -> (i32, i32) {
    %c0_i32 = arith.constant 0 : i32
    %c0_i32_0 = arith.constant 0 : i32
    %c0_i32_1 = arith.constant 0 : i32
    return %c0_i32, %c0_i32_0 : i32, i32
  }
  func.func @transform_18(%arg0: i32) -> (i32, i32) {
    %c0_i32 = arith.constant 0 : i32
    %c0_i32_0 = arith.constant 0 : i32
    %c0_i32_1 = arith.constant 0 : i32
    return %c0_i32, %c0_i32_0 : i32, i32
  }
  func.func @transform_19(%arg0: i32) -> (i32, i32) {
    %c0_i32 = arith.constant 0 : i32
    %c0_i32_0 = arith.constant 0 : i32
    %c0_i32_1 = arith.constant 0 : i32
    return %c0_i32, %c0_i32_0 : i32, i32
  }
}

</mosaic_0001>

<bundles_post_ra>
// kernel: midnight_forward.1
= control target key start
LH: loop header
LB: loop body
LE: loop exit
PB: predicated region body
PF: predicated region fallthrough
CT: control target
= control target key end

     0   :  { %s7148_s0 = inlined_call_operand.vmem [shape: bf16[48,48], index: 0, kind: input, shape index: {}]   ;;  %s7149_s1 = inlined_call_operand.vmem [shape: bf16[48,32], index: 1, kind: input, shape index: {}]   ;;  %s7150_s2 = inlined_call_operand.vmem [shape: f32[48,32], index: 2, kind: input, shape index: {}]   ;;  %s7151_s3 = inlined_call_operand.vmem [shape: f32[2,1,32], index: 3, kind: input, shape index: {}]   ;;  %s7152_s4 = inlined_call_operand.vmem [shape: f32[2,1,32], index: 4, kind: input, shape index: {}]   ;;  %s7153_s5 = inlined_call_operand.vmem [shape: bf16[2,32,96], index: 5, kind: input, shape index: {}]   ;;  %s7154_s6 = inlined_call_operand.vmem [shape: f32[2,1,96], index: 6, kind: input, shape index: {}]   ;;  %s7155_s7 = inlined_call_operand.vmem [shape: bf16[2,32,32], index: 7, kind: input, shape index: {}]   ;;  %s7156_s8 = inlined_call_operand.vmem [shape: f32[2,1,32], index: 8, kind: input, shape index: {}]   ;;  %s7157_s9 = inlined_call_operand.vmem [shape: f32[2,1,32], index: 9, kind: input, shape index: {}]   ;;  %s7158_s10 = inlined_call_operand.vmem [shape: f32[2,1,32], index: 10, kind: input, shape index: {}]   ;;  %s7159_s11 = inlined_call_operand.vmem [shape: f32[2,1,32], index: 11, kind: input, shape index: {}]   ;;  %s7160_s12 = inlined_call_operand.vmem [shape: bf16[2,32,64], index: 12, kind: input, shape index: {}]   ;;  %s7161_s13 = inlined_call_operand.vmem [shape: f32[2,1,64], index: 13, kind: input, shape index: {}]   ;;  %s7162_s14 = inlined_call_operand.vmem [shape: bf16[2,64,32], index: 14, kind: input, shape index: {}]   ;;  %s7163_s15 = inlined_call_operand.vmem [shape: f32[2,1,32], index: 15, kind: input, shape index: {}]   ;;  %s7164_s16 = inlined_call_operand.vmem [shape: f32[2,1,32], index: 16, kind: input, shape index: {}]   ;;  %s7165_s17 = inlined_call_operand.vmem [shape: f32[1,32], index: 17, kind: input, shape index: {}]   ;;  %s7166_s18 = inlined_call_operand.vmem [shape: f32[1,32], index: 18, kind: input, shape index: {}]   ;;  %s7167_s19 = inlined_call_operand.hbm [shape: f32[2,32], index: 19, kind: output, shape index: {}]  }
   0x1   :  { %7186 = sst [smem:[#allocation5_spill]] %s7148_s0 }
   0x2   :  { %7187 = sst [smem:[#allocation6_spill]] %s7149_s1 }
   0x3   :  { %7188 = sst [smem:[#allocation7_spill]] %s7150_s2 }
   0x4   :  { %7189 = sst [smem:[#allocation8_spill]] %s7151_s3 }
   0x5   :  { %s7190_s20 = sld [smem:[#allocation6_spill]]  ;;  %v5680_v1 = vmov 0.0   ;;  %vm5681_vm0 = vmmov 0   ;;  %vm119_vm1 = vcmask 392192  }
   0x6   :  { %4798 = vmatprep.subr.bf16.mxu0 %v5680_v1  ;;  %4816 = vmatprep.subr.bf16.mxu1 %v5680_v1  ;;  %s7191_s25 = sld [smem:[#allocation5_spill]] }
   0x7   :  { %4804 = vmatprep.mubr.msk.bf16.mxu0 %vm5681_vm0, %v5680_v1  ;;  %4820 = vmatprep.mubr.msk.bf16.mxu1 %vm5681_vm0, %v5680_v1 }
   0xb   :  { %v5364_v0 = vld [vmem:[%s7190_s20 + $0x10] sm:$0xff]   ;;  %v5365_v2 = vld [vmem:[%s7190_s20 + $0x8] sm:$0xff]   ;;  %v5366_v3 = vld [vmem:[%s7190_s20] sm:$0xff]  }
   0xc   :  { %4799 = vmatpush3.bf16.msra.mxu0 %v5364_v0  ;;  %v5367_v4 = vld [vmem:[%s7191_s25] sm:$0xff]   ;;  %v5368_v5 = vld [vmem:[%s7191_s25 + $0x8] sm:$0xff]  }
   0xd   :  { %4800 = vmatprep.subr.bf16.mxu0 %v5680_v1 }
  0x10   :  { %4801 = vmatpush3.bf16.msra.mxu0 %v5365_v2 }
  0x11   :  { %4802 = vmatprep.subr.bf16.mxu0 %v5680_v1 }
  0x14   :  { %4803 = vmatpush3.bf16.msra.mxu0 %v5366_v3 }
  0x17   :  { %4805 = vmatmul.mubr.msk.bf16.vlgmr.msra.gmra.mxu0 %vm119_vm1, %v5367_v4 }
  0x18   :  { %4808 = vmatprep.mubr.msk.bf16.mxu0 %vm5681_vm0, %v5680_v1 }
  0x19   :  { %24 = vsyncpa [#allocation3], 0  ;;  %v5369_v6 = vld [vmem:[%s7191_s25 + $0x10] sm:$0xff]   ;;  %s7192_s30 = sld [smem:[#allocation7_spill]]  ;;  %vm216_vm2 = vcmask 261120   ;;  %v5370_v57 = vld [vmem:[%s7153_s5 + $0x8] sm:$0xff]  }
  0x1a   :  { %4817 = vmatpush3.bf16.msra.mxu1 %v5370_v57  ;;  %v5371_v58 = vld [vmem:[%s7153_s5] sm:$0xff]   ;;  %s7193_s21 = sld [smem:[#allocation8_spill]]  ;;  %vm416_vm3 = vcmask 64512   ;;  %s5682_s24 = smov 96   ;;  %vm477_vm5 = vcmask 195584   ;;  %vm524_vm6 = vcmask 1043456  }
  0x1b   :  { %4818 = vmatprep.subr.bf16.mxu1 %v5680_v1  ;;  %s5683_s25 = smov 88   ;;  %s5684_s3 = smov 120   ;;  %vm1110_vm7 = vcmask 130048   ;;  %vm2204_vm8 = vcmask 523264   ;;  %vm4433_vm9 = vcmask 1040384   ;;  %vm4435_vm10 = vcmask 254976  }
  0x1c   :  { %s5686_s26 = smov 64   ;;  %s5687_s27 = smov 56  }
  0x1d   :  { %s5688_s28 = smov 80   ;;  %s5689_s29 = smov 112  }
  0x1e   :  { %4819 = vmatpush3.bf16.msra.mxu1 %v5371_v58  ;;  %s7178_s0 = smov 48   ;;  %s7174_s20 = smov 104  }
  0x1f   :  { %4809 = vmatmul.mubr.msk.bf16.gmra.mxu0 %vm119_vm1, %v5368_v5  ;;  %v80_v7 = vld [vmem:[%s7192_s30] sm:$0xff]  ;;  %v81_v11 = vld [vmem:[%s7192_s30 + $0x8] sm:$0xff]  ;;  %v82_v16 = vld [vmem:[%s7192_s30 + $0x10] sm:$0xff]  ;;  %s7172_s1 = smov 40   ;;  %s7184_s22 = smov 8  }
  0x20   :  { %4812 = vmatprep.mubr.msk.bf16.mxu0 %vm5681_vm0, %v5680_v1  ;;  %v83_v21 = vld [vmem:[%s7192_s30 + $0x18] sm:$0xff]  ;;  %v84_v42 = vld [vmem:[%s7192_s30 + $0x20] sm:$0xff]  ;;  %v85_v49 = vld [vmem:[%s7192_s30 + $0x28] sm:$0xff]  ;;  %s7176_s30 = smov 72   ;;  %s7182_s2 = smov 16  }
  0x21   :  { %s7180_s23 = smov 24  }
  0x27   :  { %4813 = vmatmul.mubr.msk.bf16.gmra.mxu0 %vm119_vm1, %v5369_v6 }
  0xd7   :  { %v163_v8 = vpop.f32.mrf.mxu0 }
  0xd8   :  { %v5831_v9 = vadd.f32 %v163_v8, %v80_v7 }
  0xd9   :  { %v4806_v10 = vpop.f32.mrf.mxu0 }
  0xda   :  { %v217_v12 = vsel %vm216_vm2, %v5831_v9, 0.0 }
  0xdb   :  { %218 = vadd.xlane.f32.xlu0 %v217_v12  ;;  %v166_v13 = vpop.f32.mrf.mxu0 }
  0xdc   :  { %v5838_v14 = vadd.f32 %v166_v13, %v81_v11 }
  0xdd   :  { %v4807_v15 = vpop.f32.mrf.mxu0 }
  0xde   :  { %v220_v17 = vsel %vm216_vm2, %v5838_v14, 0.0 }
  0xdf   :  { %221 = vadd.xlane.f32.xlu0 %v220_v17  ;;  %v171_v18 = vpop.f32.mrf.mxu0 }
  0xe0   :  { %v5845_v19 = vadd.f32 %v171_v18, %v82_v16 }
  0xe1   :  { %v4810_v20 = vpop.f32.mrf.mxu0 }
  0xe2   :  { %v223_v22 = vsel %vm216_vm2, %v5845_v19, 0.0 }
  0xe3   :  { %224 = vadd.xlane.f32.xlu1 %v223_v22  ;;  %v174_v23 = vpop.f32.mrf.mxu0 }
  0xe4   :  { %v5852_v24 = vadd.f32 %v174_v23, %v83_v21  ;;  %v4460_v21 = vld [vmem:[%s7193_s21] ss:$0 sm:$0xff] }
  0xe5   :  { %v4811_v25 = vpop.f32.mrf.mxu0 }
  0xe6   :  { %v226_v26 = vsel %vm216_vm2, %v5852_v24, 0.0 }
  0xe7   :  { %227 = vadd.xlane.f32.xlu1 %v226_v26  ;;  %v179_v27 = vpop.f32.mrf.mxu0 }
  0xe8   :  { %v5868_v48 = vadd.f32 %v179_v27, %v84_v42 }
  0xe9   :  { %v4814_v28 = vpop.f32.mrf.mxu0 }
  0xea   :  { %v229_v53 = vsel %vm216_vm2, %v5868_v48, 0.0  ;;  %v4461_v28 = vld [vmem:[%s7152_s4] ss:$0 sm:$0xff] }
  0xeb   :  { %v182_v29 = vpop.f32.mrf.mxu0 }
  0xec   :  { %v5877_v54 = vadd.f32 %v182_v29, %v85_v49 }
  0xed   :  { %v4815_v30 = vpop.f32.mrf.mxu0 }
  0xee   :  { %v232_v56 = vsel %vm216_vm2, %v5877_v54, 0.0 }
 0x164   :  { %v219_v31 = vpop.xlane.xlu0 %218 }
 0x165   :  { %v236_v32 = vmul.f32 0.03125, %v219_v31 }
 0x167   :  { %v242_v33 = vsub.f32 %v5831_v9, %v236_v32 }
 0x168   :  { %v222_v34 = vpop.xlane.xlu0 %221 }
 0x169   :  { %v237_v35 = vmul.f32 0.03125, %v222_v34  ;;  %v248_v36 = vmul.f32 %v242_v33, %v242_v33 }
 0x16b   :  { %v243_v37 = vsub.f32 %v5838_v14, %v237_v35  ;;  %v254_v38 = vsel %vm216_vm2, %v248_v36, 0.0 }
 0x16c   :  { %255 = vadd.xlane.f32.xlu0 %v254_v38  ;;  %v225_v39 = vpop.xlane.xlu1 %224 }
 0x16d   :  { %v238_v40 = vmul.f32 0.03125, %v225_v39  ;;  %v249_v41 = vmul.f32 %v243_v37, %v243_v37 }
 0x16f   :  { %v5863_v43 = vsub.f32 %v5845_v19, %v238_v40  ;;  %v257_v44 = vsel %vm216_vm2, %v249_v41, 0.0 }
 0x170   :  { %258 = vadd.xlane.f32.xlu1 %v257_v44  ;;  %v228_v45 = vpop.xlane.xlu1 %227 }
 0x171   :  { %v239_v46 = vmul.f32 0.03125, %v228_v45  ;;  %v250_v47 = vmul.f32 %v5863_v43, %v5863_v43 }
 0x173   :  { %v245_v50 = vsub.f32 %v5852_v24, %v239_v46  ;;  %v260_v51 = vsel %vm216_vm2, %v250_v47, 0.0 }
 0x174   :  { %261 = vadd.xlane.f32.xlu0 %v260_v51 }
 0x175   :  { %v251_v52 = vmul.f32 %v245_v50, %v245_v50 }
 0x177   :  { %v263_v55 = vsel %vm216_vm2, %v251_v52, 0.0 }
 0x178   :  { %264 = vadd.xlane.f32.xlu1 %v263_v55  ;;  %230 = vadd.xlane.f32.xlu0 %v229_v53 }
 0x17c   :  { %233 = vadd.xlane.f32.xlu1 %v232_v56 }
 0x1f5   :  { %v256_v59 = vpop.xlane.xlu0 %255 }
 0x1f6   :  { %v272_v60 = vmul.f32 0.03125, %v256_v59 }
 0x1f8   :  { %v278_v61 = vadd.f32 1e-06, %v272_v60  ;;  %v4462_v60 = vld [vmem:[%s7154_s6] ss:$0 sm:$0xff] }
 0x1f9   :  { %v259_v62 = vpop.xlane.xlu1 %258 }
 0x1fa   :  { %5390 = vrsqrt.f32 %v278_v61  ;;  %v273_v63 = vmul.f32 0.03125, %v259_v62 }
 0x1fc   :  { %v279_v0 = vadd.f32 1e-06, %v273_v63 }
 0x1fd   :  { %v262_v2 = vpop.xlane.xlu0 %261 }
 0x1fe   :  { %5392 = vrsqrt.f32 %v279_v0  ;;  %v274_v3 = vmul.f32 0.03125, %v262_v2 }
 0x200   :  { %v280_v4 = vadd.f32 1e-06, %v274_v3 }
 0x201   :  { %v265_v5 = vpop.xlane.xlu1 %264  ;;  %v231_v6 = vpop.xlane.xlu0 %230 }
 0x202   :  { %5394 = vrsqrt.f32 %v280_v4  ;;  %v275_v7 = vmul.f32 0.03125, %v265_v5  ;;  %v240_v8 = vmul.f32 0.03125, %v231_v6 }
 0x204   :  { %v281_v10 = vadd.f32 1e-06, %v275_v7  ;;  %v246_v11 = vsub.f32 %v5868_v48, %v240_v8 }
 0x205   :  { %v234_v12 = vpop.xlane.xlu1 %233 }
 0x206   :  { %5396 = vrsqrt.f32 %v281_v10  ;;  %v241_v13 = vmul.f32 0.03125, %v234_v12  ;;  %v252_v15 = vmul.f32 %v246_v11, %v246_v11 }
 0x207   :  { %v5391_v16 = vpop.eup %5390 }
 0x208   :  { %v247_v17 = vsub.f32 %v5877_v54, %v241_v13  ;;  %v266_v18 = vsel %vm216_vm2, %v252_v15, 0.0  ;;  %v290_v20 = vmul.f32 %v5391_v16, %v242_v33 }
 0x209   :  { %267 = vadd.xlane.f32.xlu0 %v266_v18 }
 0x20a   :  { %v253_v22 = vmul.f32 %v247_v17, %v247_v17  ;;  %v302_v27 = vmul.f32 %v4460_v21, %v290_v20 }
 0x20b   :  { %v5393_v23 = vpop.eup %5392 }
 0x20c   :  { %v269_v25 = vsel %vm216_vm2, %v253_v22, 0.0  ;;  %v291_v26 = vmul.f32 %v5393_v23, %v243_v37  ;;  %v314_v31 = vadd.f32 %v4461_v28, %v302_v27 }
 0x20d   :  { %270 = vadd.xlane.f32.xlu1 %v269_v25 }
 0x20e   :  { %v303_v29 = vmul.f32 %v4460_v21, %v291_v26 }
 0x20f   :  { %v5395_v30 = vpop.eup %5394 }
 0x210   :  { %v315_v32 = vadd.f32 %v4461_v28, %v303_v29  ;;  %v292_v33 = vmul.f32 %v5395_v30, %v5863_v43 }
 0x212   :  { %v320_v34 = vpack.c.bf16 %v315_v32, %v314_v31  ;;  %v304_v38 = vmul.f32 %v4460_v21, %v292_v33  ;;  %v64_v32 = vlaneseq }
 0x213   :  { %v5397_v35 = vpop.eup %5396 }
 0x214   :  { %4821 = vmatmul.mubr.msk.bf16.vlgmr.msra.gmra.mxu1 %vm216_vm2, %v320_v34  ;;  %v293_v36 = vmul.f32 %v5397_v35, %v245_v50  ;;  %v316_v39 = vadd.f32 %v4461_v28, %v304_v38  ;;  %v65_v33 = vand.u32 127, %v64_v32 }
 0x215   :  { %4824 = vmatprep.mubr.msk.bf16.mxu1 %vm5681_vm0, %v5680_v1 }
 0x216   :  { %v305_v37 = vmul.f32 %v4460_v21, %v293_v36  ;;  %vm66_vm4 = vcmp.lt.s32.totalorder %v65_v33, 17  ;;  %v5685_v36 = vmov -1e+30  }
 0x217   :  { %v5946_v38 = vsel %vm66_vm4, 0.0, %v5685_v36 }
 0x218   :  { %v317_v40 = vadd.f32 %v4461_v28, %v305_v37 }
 0x21a   :  { %v321_v41 = vpack.c.bf16 %v317_v40, %v316_v39 }
 0x21c   :  { %4825 = vmatmul.mubr.msk.bf16.gmra.mxu1 %vm216_vm2, %v321_v41 }
 0x21d   :  { %4828 = vmatprep.mubr.msk.bf16.mxu1 %vm5681_vm0, %v5680_v1 }
 0x292   :  { %v268_v42 = vpop.xlane.xlu0 %267 }
 0x293   :  { %v276_v43 = vmul.f32 0.03125, %v268_v42 }
 0x295   :  { %v282_v44 = vadd.f32 1e-06, %v276_v43 }
 0x296   :  { %v271_v45 = vpop.xlane.xlu1 %270 }
 0x297   :  { %5398 = vrsqrt.f32 %v282_v44  ;;  %v277_v46 = vmul.f32 0.03125, %v271_v45 }
 0x299   :  { %v283_v47 = vadd.f32 1e-06, %v277_v46 }
 0x29b   :  { %5400 = vrsqrt.f32 %v283_v47 }
 0x2a4   :  { %v5399_v49 = vpop.eup %5398 }
 0x2a5   :  { %v294_v50 = vmul.f32 %v5399_v49, %v246_v11 }
 0x2a7   :  { %v306_v53 = vmul.f32 %v4460_v21, %v294_v50 }
 0x2a8   :  { %v5401_v51 = vpop.eup %5400 }
 0x2a9   :  { %v295_v52 = vmul.f32 %v5401_v51, %v247_v17  ;;  %v318_v56 = vadd.f32 %v4461_v28, %v306_v53 }
 0x2ab   :  { %v307_v55 = vmul.f32 %v4460_v21, %v295_v52 }
 0x2ad   :  { %v319_v57 = vadd.f32 %v4461_v28, %v307_v55 }
 0x2af   :  { %v322_v58 = vpack.c.bf16 %v319_v57, %v318_v56 }
 0x2b1   :  { %4829 = vmatmul.mubr.msk.bf16.gmra.mxu1 %vm216_vm2, %v322_v58 }
 0x2d4   :  { %v384_v59 = vpop.f32.mrf.mxu1 }
 0x2d5   :  { %v385_v63 = vadd.f32 %v4462_v60, %v384_v59 }
 0x2d6   :  { %v4822_v61 = vpop.f32.mrf.mxu1 }
 0x2d8   :  { %v387_v62 = vpop.f32.mrf.mxu1 }
 0x2d9   :  { %v388_v0 = vadd.f32 %v4462_v60, %v387_v62 }
 0x2da   :  { %v4823_v2 = vpop.f32.mrf.mxu1 }
 0x2db   :  { %v5910_v3 = vpack.c.bf16 %v388_v0, %v385_v63 }
 0x2dc   :  { %v392_v4 = vpop.f32.mrf.mxu1 }
 0x2dd   :  { %4836 = vmatprep.mubr.msk.bf16.mxu0 %vm416_vm3, %v5910_v3  ;;  %412 = vrot.lane.b32.xlu1 %v5910_v3, %s5682_s24  ;;  %v393_v7 = vadd.f32 %v4462_v60, %v392_v4 }
 0x2de   :  { %v4826_v5 = vpop.f32.mrf.mxu1 }
 0x2e0   :  { %v395_v6 = vpop.f32.mrf.mxu1 }
 0x2e1   :  { %v396_v8 = vadd.f32 %v4462_v60, %v395_v6 }
 0x2e2   :  { %v4827_v10 = vpop.f32.mrf.mxu1 }
 0x2e3   :  { %v5916_v11 = vpack.c.bf16 %v396_v8, %v393_v7 }
 0x2e5   :  { %414 = vrot.lane.b32.xlu0 %v5916_v11, %s5682_s24  ;;  %582 = vrot.lane.b32.xlu1 %v5916_v11, %s5683_s25 }
 0x2e9   :  { %576 = vrot.lane.b32.xlu0 %v5910_v3, %s5684_s3  ;;  %580 = vrot.lane.b32.xlu1 %v5910_v3, %s5683_s25 }
 0x2ed   :  { %578 = vrot.lane.b32.xlu1 %v5916_v11, %s5684_s3 }
 0x34f   :  { %v413_v12 = vpop.permute.xlu1 %412 }
 0x350   :  { %v424_v21 = vsel %vm416_vm3, %v413_v12, 0 }
 0x357   :  { %v415_v13 = vpop.permute.xlu0 %414  ;;  %v583_v15 = vpop.permute.xlu1 %582 }
 0x358   :  { %5208 = vmatprep.subr.msk.bf16.mxu0 %vm416_vm3, %v415_v13  ;;  %5211 = vmatprep.subr.msk.bf16.mxu1 %vm416_vm3, %v583_v15  ;;  %v427_v16 = vsel %vm416_vm3, %v415_v13, 0  ;;  %v594_v17 = vsel %vm416_vm3, %v583_v15, 0 }
 0x359   :  { %4833 = vmatpush3.bf16.xpose.msra.mxu0 %v427_v16  ;;  %4849 = vmatpush3.bf16.xpose.msra.mxu1 %v594_v17 }
 0x35a   :  { %5209 = vmatprep.subr.msk.bf16.mxu0 %vm416_vm3, %v413_v12 }
 0x35b   :  { %v577_v18 = vpop.permute.xlu0 %576  ;;  %v581_v20 = vpop.permute.xlu1 %580 }
 0x35c   :  { %5212 = vmatprep.subr.msk.bf16.mxu1 %vm416_vm3, %v581_v20  ;;  %4852 = vmatprep.mubr.msk.bf16.mxu1 %vm416_vm3, %v577_v18  ;;  %v591_v22 = vsel %vm416_vm3, %v581_v20, 0 }
 0x35f   :  { %v579_v23 = vpop.permute.xlu1 %578 }
 0x361   :  { %4835 = vmatpush3.bf16.xpose.msra.mxu0 %v424_v21  ;;  %4851 = vmatpush3.bf16.xpose.msra.mxu1 %v591_v22 }
 0x368   :  { %4837 = vmatmul.mubr.msk.bf16.vlgmr.msra.gmra.mxu0 %vm416_vm3, %v5916_v11  ;;  %4853 = vmatmul.mubr.msk.bf16.vlgmr.msra.gmra.mxu1 %vm416_vm3, %v579_v23 }
 0x371   :  { %v400_v25 = vpop.f32.mrf.mxu1 }
 0x372   :  { %v5940_v28 = vadd.f32 %v4462_v60, %v400_v25 }
 0x373   :  { %v4830_v26 = vpop.f32.mrf.mxu1 }
 0x375   :  { %v403_v27 = vpop.f32.mrf.mxu1 }
 0x376   :  { %v5942_v29 = vadd.f32 %v4462_v60, %v403_v27 }
 0x377   :  { %v4831_v30 = vpop.f32.mrf.mxu1 }
 0x378   :  { %v409_v31 = vpack.c.bf16 %v5942_v29, %v5940_v28 }
 0x428   :  { %v4838_v34 = vpop.f32.mrf.mxu0  ;;  %v4854_v35 = vpop.f32.mrf.mxu1 }
 0x429   :  { %v472_v43 = vadd.f32 %v4838_v34, %v5946_v38  ;;  %v639_v47 = vadd.f32 %v4854_v35, %v5946_v38 }
 0x42a   :  { %v463_v37 = vpop.f32.mrf.mxu0  ;;  %v630_v39 = vpop.f32.mrf.mxu1 }
 0x42b   :  { %v464_v40 = vadd.f32 %v463_v37, %v5946_v38  ;;  %v631_v49 = vadd.f32 %v630_v39, %v5946_v38  ;;  %v484_v51 = vsel %vm477_vm5, %v472_v43, -inf  ;;  %v650_v55 = vsel %vm477_vm5, %v639_v47, -inf }
 0x42c   :  { %v4839_v41 = vpop.f32.mrf.mxu0  ;;  %v4855_v42 = vpop.f32.mrf.mxu1 }
 0x42d   :  { %v478_v44 = vsel %vm477_vm5, %v464_v40, -inf  ;;  %v644_v56 = vsel %vm477_vm5, %v631_v49, -inf }
 0x42e   :  { %v466_v45 = vpop.f32.mrf.mxu0  ;;  %479 = vmax.xlane.f32.xlu0 %v478_v44  ;;  %v633_v52 = vpop.f32.mrf.mxu1 }
 0x42f   :  { %v467_v46 = vadd.f32 %v466_v45, %v5946_v38  ;;  %v634_v53 = vadd.f32 %v633_v52, %v5946_v38 }
 0x431   :  { %v481_v50 = vsel %vm477_vm5, %v467_v46, -inf  ;;  %v647_v57 = vsel %vm477_vm5, %v634_v53, -inf }
 0x432   :  { %482 = vmax.xlane.f32.xlu1 %v481_v50  ;;  %485 = vmax.xlane.f32.xlu0 %v484_v51 }
 0x436   :  { %651 = vmax.xlane.f32.xlu1 %v650_v55  ;;  %645 = vmax.xlane.f32.xlu0 %v644_v56 }
 0x43a   :  { %648 = vmax.xlane.f32.xlu0 %v647_v57 }
 0x4b7   :  { %v480_v58 = vpop.xlane.xlu0 %479 }
 0x4b8   :  { %v487_v59 = vsub.f32 %v464_v40, %v480_v58 }
 0x4ba   :  { %v490_v0 = vmul.f32 1.442695, %v487_v59 }
 0x4bb   :  { %v483_v60 = vpop.xlane.xlu1 %482  ;;  %v486_v61 = vpop.xlane.xlu0 %485 }
 0x4bc   :  { %v489_v62 = vsub.f32 %v472_v43, %v486_v61  ;;  %v488_v21 = vsub.f32 %v467_v46, %v483_v60 }
 0x4be   :  { %v494_v63 = vmul.f32 1.442695, %v489_v62  ;;  %v492_v23 = vmul.f32 1.442695, %v488_v21 }
 0x4bf   :  { %v652_v2 = vpop.xlane.xlu1 %651  ;;  %v646_v15 = vpop.xlane.xlu0 %645 }
 0x4c0   :  { %v655_v4 = vsub.f32 %v639_v47, %v652_v2  ;;  %5402 = vpow2.f32 %v494_v63  ;;  %v653_v18 = vsub.f32 %v631_v49, %v646_v15 }
 0x4c1   :  { %5404 = vpow2.f32 %v490_v0 }
 0x4c2   :  { %v660_v5 = vmul.f32 1.442695, %v655_v4  ;;  %v656_v22 = vmul.f32 1.442695, %v653_v18 }
 0x4c3   :  { %v649_v16 = vpop.xlane.xlu0 %648 }
 0x4c4   :  { %5406 = vpow2.f32 %v660_v5  ;;  %v654_v17 = vsub.f32 %v634_v53, %v649_v16 }
 0x4c6   :  { %v658_v20 = vmul.f32 1.442695, %v654_v17 }
 0x4c8   :  { %5408 = vpow2.f32 %v658_v20 }
 0x4c9   :  { %5410 = vpow2.f32 %v656_v22 }
 0x4ca   :  { %5412 = vpow2.f32 %v492_v23 }
 0x4cd   :  { %v5960_v6 = vpop.eup %5402 }
 0x4ce   :  { %v502_v7 = vsel %vm477_vm5, %v5960_v6, 0.0  ;;  %v5964_v8 = vpop.eup %5404 }
 0x4cf   :  { %503 = vadd.xlane.f32.xlu0 %v502_v7  ;;  %v496_v13 = vsel %vm477_vm5, %v5964_v8, 0.0 }
 0x4d1   :  { %v5966_v10 = vpop.eup %5406 }
 0x4d2   :  { %v668_v12 = vsel %vm477_vm5, %v5966_v10, 0.0 }
 0x4d3   :  { %669 = vadd.xlane.f32.xlu1 %v668_v12  ;;  %497 = vadd.xlane.f32.xlu0 %v496_v13 }
 0x4d5   :  { %v5409_v25 = vpop.eup %5408 }
 0x4d6   :  { %v5411_v26 = vpop.eup %5410  ;;  %v665_v27 = vsel %vm477_vm5, %v5409_v25, 0.0 }
 0x4d7   :  { %v662_v30 = vsel %vm477_vm5, %v5411_v26, 0.0  ;;  %v5413_v32 = vpop.eup %5412 }
 0x4d8   :  { %v499_v33 = vsel %vm477_vm5, %v5413_v32, 0.0 }
 0x4e4   :  { %513 = vrot.lane.b32.xlu1 %v5910_v3, %s5686_s26 }
 0x4e8   :  { %681 = vrot.lane.b32.xlu1 %v5916_v11, %s5687_s27 }
 0x4e9   :  { %515 = vrot.lane.b32.xlu0 %v5916_v11, %s5686_s26 }
 0x508   :  { %666 = vadd.xlane.f32.xlu0 %v665_v27 }
 0x50c   :  { %663 = vadd.xlane.f32.xlu1 %v662_v30 }
 0x510   :  { %500 = vadd.xlane.f32.xlu1 %v499_v33 }
 0x51e   :  { %747 = vrot.lane.b32.xlu0 %v5916_v11, %s5688_s28 }
 0x521   :  { %679 = vrot.lane.b32.xlu1 %v5910_v3, %s5687_s27 }
 0x522   :  { %741 = vrot.lane.b32.xlu0 %v5910_v3, %s5689_s29 }
 0x525   :  { %745 = vrot.lane.b32.xlu1 %v5910_v3, %s5688_s28 }
 0x529   :  { %743 = vrot.lane.b32.xlu1 %v5916_v11, %s5689_s29 }
 0x558   :  { %v504_v34 = vpop.xlane.xlu0 %503 }
 0x559   :  { %5414 = vrcp.f32 %v504_v34 }
 0x55c   :  { %v670_v35 = vpop.xlane.xlu1 %669  ;;  %v498_v36 = vpop.xlane.xlu0 %497 }
 0x55d   :  { %5416 = vrcp.f32 %v498_v36 }
 0x560   :  { %v514_v37 = vpop.permute.xlu1 %513  ;;  %v516_v39 = vpop.permute.xlu0 %515 }
 0x561   :  { %5210 = vmatprep.subr.msk.bf16.mxu0 %vm524_vm6, %v516_v39  ;;  %v526_v40 = vsel %vm524_vm6, %v516_v39, 0 }
 0x562   :  { %4841 = vmatpush3.bf16.msra.mxu0 %v526_v40 }
 0x563   :  { %4842 = vmatprep.subr.bf16.mxu0 %v514_v37 }
 0x564   :  { %v682_v41 = vpop.permute.xlu1 %681 }
 0x565   :  { %v691_v61 = vsel %vm524_vm6, %v682_v41, 0 }
 0x566   :  { %4843 = vmatpush3.bf16.msra.mxu0 %v514_v37  ;;  %v5415_v45 = vpop.eup %5414 }
 0x567   :  { %5213 = vmatprep.subr.msk.bf16.mxu0 %vm524_vm6, %v682_v41  ;;  %v510_v51 = vmul.f32 %v5415_v45, %v5960_v6 }
 0x569   :  { %v512_v58 = vpack.c.bf16 %v510_v51, %v510_v51 }
 0x56a   :  { %v5417_v46 = vpop.eup %5416 }
 0x56b   :  { %v508_v52 = vmul.f32 %v5417_v46, %v5964_v8 }
 0x591   :  { %v667_v43 = vpop.xlane.xlu0 %666 }
 0x595   :  { %v664_v42 = vpop.xlane.xlu1 %663  ;;  %v748_v63 = vpop.permute.xlu0 %747 }
 0x596   :  { %5418 = vrcp.f32 %v664_v42  ;;  %v759_v5 = vsel %vm416_vm3, %v748_v63, 0 }
 0x597   :  { %5420 = vrcp.f32 %v667_v43 }
 0x599   :  { %v501_v44 = vpop.xlane.xlu1 %500  ;;  %v742_v4 = vpop.permute.xlu0 %741 }
 0x59a   :  { %5422 = vrcp.f32 %v501_v44 }
 0x59b   :  { %5424 = vrcp.f32 %v670_v35 }
 0x59d   :  { %v680_v62 = vpop.permute.xlu1 %679 }
 0x5a1   :  { %v746_v6 = vpop.permute.xlu1 %745 }
 0x5a2   :  { %v756_v7 = vsel %vm416_vm3, %v746_v6, 0 }
 0x5a3   :  { %v5419_v47 = vpop.eup %5418 }
 0x5a4   :  { %v5421_v49 = vpop.eup %5420  ;;  %v674_v55 = vmul.f32 %v5419_v47, %v5411_v26 }
 0x5a5   :  { %v675_v57 = vmul.f32 %v5421_v49, %v5409_v25  ;;  %v744_v8 = vpop.permute.xlu1 %743 }
 0x5a7   :  { %v5423_v50 = vpop.eup %5422  ;;  %v677_v60 = vpack.c.bf16 %v675_v57, %v674_v55 }
 0x5a8   :  { %v509_v53 = vmul.f32 %v5423_v50, %v5413_v32  ;;  %v5425_v59 = vpop.eup %5424 }
 0x5a9   :  { %v676_v0 = vmul.f32 %v5425_v59, %v5966_v10 }
 0x5aa   :  { %v511_v56 = vpack.c.bf16 %v509_v53, %v508_v52 }
 0x5ab   :  { %v678_v2 = vpack.c.bf16 %v676_v0, %v676_v0 }
 0x5ac   :  { %4844 = vmatprep.mubr.msk.bf16.mxu0 %vm477_vm5, %v511_v56 }
 0x5ad   :  { %4845 = vmatmul.mubr.msk.bf16.vlgmr.msra.gmra.mxu0 %vm477_vm5, %v512_v58 }
 0x5ae   :  { %4857 = vmatpush3.bf16.msra.mxu0 %v691_v61  ;;  %4860 = vmatprep.mubr.msk.bf16.mxu0 %vm477_vm5, %v677_v60 }
 0x5af   :  { %4858 = vmatprep.subr.bf16.mxu0 %v680_v62 }
 0x5b2   :  { %4859 = vmatpush3.bf16.msra.mxu0 %v680_v62 }
 0x5b3   :  { %5214 = vmatprep.subr.msk.bf16.mxu0 %vm416_vm3, %v748_v63 }
 0x5b5   :  { %4861 = vmatmul.mubr.msk.bf16.vlgmr.msra.gmra.mxu0 %vm477_vm5, %v678_v2 }
 0x5b6   :  { %4865 = vmatpush3.bf16.xpose.msra.mxu0 %v759_v5  ;;  %4868 = vmatprep.mubr.msk.bf16.mxu0 %vm416_vm3, %v742_v4 }
 0x5b7   :  { %5215 = vmatprep.subr.msk.bf16.mxu0 %vm416_vm3, %v746_v6 }
 0x5be   :  { %4867 = vmatpush3.bf16.xpose.msra.mxu0 %v756_v7 }
 0x5c5   :  { %4869 = vmatmul.mubr.msk.bf16.vlgmr.msra.gmra.mxu0 %vm416_vm3, %v744_v8 }
 0x66d   :  { %v6008_v10 = vpop.f32.mrf.mxu0 }
 0x66f   :  { %v6010_v12 = vpop.f32.mrf.mxu0 }
 0x671   :  { %v4847_v13 = vpop.f32.mrf.mxu0 }
 0x673   :  { %v6012_v15 = vpop.f32.mrf.mxu0 }
 0x675   :  { %v6014_v16 = vpop.f32.mrf.mxu0 }
 0x677   :  { %v6016_v17 = vpop.f32.mrf.mxu0 }
 0x679   :  { %v4863_v18 = vpop.f32.mrf.mxu0 }
 0x67b   :  { %v6018_v20 = vpop.f32.mrf.mxu0 }
 0x67c   :  { %v5274_v21 = vpack.i.bf16 %v6018_v20, %v6016_v17 }
 0x685   :  { %v4870_v22 = vpop.f32.mrf.mxu0 }
 0x686   :  { %v804_v27 = vadd.f32 %v4870_v22, %v5946_v38 }
 0x687   :  { %v795_v23 = vpop.f32.mrf.mxu0 }
 0x688   :  { %v796_v25 = vadd.f32 %v795_v23, %v5946_v38  ;;  %v815_v35 = vsel %vm477_vm5, %v804_v27, -inf }
 0x689   :  { %v4871_v26 = vpop.f32.mrf.mxu0 }
 0x68a   :  { %v809_v30 = vsel %vm477_vm5, %v796_v25, -inf }
 0x68b   :  { %v798_v32 = vpop.f32.mrf.mxu0  ;;  %810 = vmax.xlane.f32.xlu0 %v809_v30 }
 0x68c   :  { %v799_v33 = vadd.f32 %v798_v32, %v5946_v38 }
 0x68e   :  { %v812_v34 = vsel %vm477_vm5, %v799_v33, -inf }
 0x68f   :  { %813 = vmax.xlane.f32.xlu1 %v812_v34  ;;  %816 = vmax.xlane.f32.xlu0 %v815_v35 }
 0x714   :  { %v811_v36 = vpop.xlane.xlu0 %810 }
 0x715   :  { %v818_v37 = vsub.f32 %v796_v25, %v811_v36 }
 0x717   :  { %v821_v39 = vmul.f32 1.442695, %v818_v37 }
 0x718   :  { %v814_v40 = vpop.xlane.xlu1 %813  ;;  %v817_v41 = vpop.xlane.xlu0 %816 }
 0x719   :  { %5426 = vpow2.f32 %v821_v39  ;;  %v819_v42 = vsub.f32 %v799_v33, %v814_v40  ;;  %v820_v43 = vsub.f32 %v804_v27, %v817_v41 }
 0x71b   :  { %v823_v44 = vmul.f32 1.442695, %v819_v42  ;;  %v825_v45 = vmul.f32 1.442695, %v820_v43 }
 0x71d   :  { %5428 = vpow2.f32 %v823_v44 }
 0x71e   :  { %5430 = vpow2.f32 %v825_v45 }
 0x726   :  { %v5427_v46 = vpop.eup %5426 }
 0x727   :  { %v827_v47 = vsel %vm477_vm5, %v5427_v46, 0.0 }
 0x728   :  { %828 = vadd.xlane.f32.xlu0 %v827_v47 }
 0x72a   :  { %v5429_v49 = vpop.eup %5428 }
 0x72b   :  { %v5431_v50 = vpop.eup %5430  ;;  %v830_v51 = vsel %vm477_vm5, %v5429_v49, 0.0 }
 0x72c   :  { %831 = vadd.xlane.f32.xlu0 %v830_v51  ;;  %v833_v52 = vsel %vm477_vm5, %v5431_v50, 0.0 }
 0x72d   :  { %834 = vadd.xlane.f32.xlu1 %v833_v52 }
 0x73e   :  { %844 = vrot.lane.b32.xlu1 %v5910_v3, %s7178_s0 }
 0x742   :  { %912 = vrot.lane.b32.xlu1 %v5916_v11, %s7176_s30  ;;  %846 = vrot.lane.b32.xlu0 %v5916_v11, %s7178_s0 }
 0x746   :  { %910 = vrot.lane.b32.xlu1 %v5910_v3, %s7176_s30  ;;  %906 = vrot.lane.b32.xlu0 %v5910_v3, %s7174_s20 }
 0x74a   :  { %908 = vrot.lane.b32.xlu1 %v5916_v11, %s7174_s20 }
 0x7b1   :  { %v829_v53 = vpop.xlane.xlu0 %828 }
 0x7b2   :  { %5432 = vrcp.f32 %v829_v53 }
 0x7b5   :  { %v832_v55 = vpop.xlane.xlu0 %831 }
 0x7b6   :  { %v835_v56 = vpop.xlane.xlu1 %834  ;;  %5434 = vrcp.f32 %v832_v55 }
 0x7b7   :  { %5436 = vrcp.f32 %v835_v56 }
 0x7b9   :  { %v847_v57 = vpop.permute.xlu0 %846 }
 0x7ba   :  { %v845_v58 = vpop.permute.xlu1 %844  ;;  %5216 = vmatprep.subr.msk.bf16.mxu1 %vm524_vm6, %v847_v57  ;;  %v856_v59 = vsel %vm524_vm6, %v847_v57, 0 }
 0x7bb   :  { %4873 = vmatpush3.bf16.msra.mxu1 %v856_v59 }
 0x7bc   :  { %4874 = vmatprep.subr.bf16.mxu1 %v845_v58 }
 0x7bd   :  { %v907_v7 = vpop.permute.xlu0 %906 }
 0x7be   :  { %v913_v60 = vpop.permute.xlu1 %912 }
 0x7bf   :  { %4875 = vmatpush3.bf16.msra.mxu1 %v845_v58  ;;  %v5433_v61 = vpop.eup %5432  ;;  %v924_v8 = vsel %vm416_vm3, %v913_v60, 0 }
 0x7c0   :  { %5217 = vmatprep.subr.msk.bf16.mxu1 %vm416_vm3, %v913_v60  ;;  %v839_v0 = vmul.f32 %v5433_v61, %v5427_v46  ;;  %v6075_v60 = vrot.slane %v409_v31, 4  ;;  %v1119_v61 = vrot.slane %v5916_v11, 4 }
 0x7c2   :  { %v911_v13 = vpop.permute.xlu1 %910 }
 0x7c3   :  { %v5435_v62 = vpop.eup %5434  ;;  %v921_v18 = vsel %vm416_vm3, %v911_v13, 0 }
 0x7c4   :  { %v5437_v63 = vpop.eup %5436  ;;  %v840_v2 = vmul.f32 %v5435_v62, %v5429_v49  ;;  %v6084_v62 = vsel %vm524_vm6, %v1119_v61, %v6075_v60 }
 0x7c5   :  { %v841_v4 = vmul.f32 %v5437_v63, %v5431_v50 }
 0x7c6   :  { %v842_v5 = vpack.c.bf16 %v840_v2, %v839_v0  ;;  %v909_v22 = vpop.permute.xlu1 %908 }
 0x7c7   :  { %v843_v6 = vpack.c.bf16 %v841_v4, %v841_v4 }
 0x7c8   :  { %4876 = vmatprep.mubr.msk.bf16.mxu1 %vm477_vm5, %v842_v5 }
 0x7c9   :  { %4877 = vmatmul.mubr.msk.bf16.vlgmr.msra.gmra.mxu1 %vm477_vm5, %v843_v6 }
 0x7ca   :  { %4881 = vmatpush3.bf16.xpose.msra.mxu1 %v924_v8  ;;  %4884 = vmatprep.mubr.msk.bf16.mxu1 %vm416_vm3, %v907_v7 }
 0x7cb   :  { %5218 = vmatprep.subr.msk.bf16.mxu1 %vm416_vm3, %v911_v13 }
 0x7d2   :  { %4883 = vmatpush3.bf16.xpose.msra.mxu1 %v921_v18 }
 0x7d9   :  { %4885 = vmatmul.mubr.msk.bf16.vlgmr.msra.gmra.mxu1 %vm416_vm3, %v909_v22 }
 0x889   :  { %v6053_v23 = vpop.f32.mrf.mxu1 }
 0x88b   :  { %v6055_v25 = vpop.f32.mrf.mxu1 }
 0x88d   :  { %v4879_v26 = vpop.f32.mrf.mxu1 }
 0x88f   :  { %v6057_v27 = vpop.f32.mrf.mxu1 }
 0x890   :  { %v5279_v30 = vpack.i.bf16 %v6057_v27, %v6055_v25 }
 0x899   :  { %v4886_v32 = vpop.f32.mrf.mxu1 }
 0x89a   :  { %v969_v36 = vadd.f32 %v4886_v32, %v5946_v38 }
 0x89b   :  { %v960_v33 = vpop.f32.mrf.mxu1 }
 0x89c   :  { %v961_v34 = vadd.f32 %v960_v33, %v5946_v38  ;;  %v980_v42 = vsel %vm477_vm5, %v969_v36, -inf }
 0x89d   :  { %v4887_v35 = vpop.f32.mrf.mxu1 }
 0x89e   :  { %v974_v37 = vsel %vm477_vm5, %v961_v34, -inf }
 0x89f   :  { %v963_v39 = vpop.f32.mrf.mxu1  ;;  %975 = vmax.xlane.f32.xlu0 %v974_v37 }
 0x8a0   :  { %v964_v40 = vadd.f32 %v963_v39, %v5946_v38 }
 0x8a2   :  { %v977_v41 = vsel %vm477_vm5, %v964_v40, -inf }
 0x8a3   :  { %978 = vmax.xlane.f32.xlu1 %v977_v41  ;;  %981 = vmax.xlane.f32.xlu0 %v980_v42 }
 0x928   :  { %v976_v43 = vpop.xlane.xlu0 %975 }
 0x929   :  { %v983_v44 = vsub.f32 %v961_v34, %v976_v43 }
 0x92b   :  { %v986_v45 = vmul.f32 1.442695, %v983_v44 }
 0x92c   :  { %v979_v46 = vpop.xlane.xlu1 %978  ;;  %v982_v47 = vpop.xlane.xlu0 %981 }
 0x92d   :  { %5438 = vpow2.f32 %v986_v45  ;;  %v984_v49 = vsub.f32 %v964_v40, %v979_v46  ;;  %v985_v50 = vsub.f32 %v969_v36, %v982_v47 }
 0x92f   :  { %v988_v51 = vmul.f32 1.442695, %v984_v49  ;;  %v990_v52 = vmul.f32 1.442695, %v985_v50 }
 0x931   :  { %5440 = vpow2.f32 %v988_v51 }
 0x932   :  { %5442 = vpow2.f32 %v990_v52 }
 0x93a   :  { %v5439_v53 = vpop.eup %5438 }
 0x93b   :  { %v992_v55 = vsel %vm477_vm5, %v5439_v53, 0.0 }
 0x93c   :  { %993 = vadd.xlane.f32.xlu0 %v992_v55 }
 0x93e   :  { %v5441_v56 = vpop.eup %5440 }
 0x93f   :  { %v5443_v57 = vpop.eup %5442  ;;  %v995_v58 = vsel %vm477_vm5, %v5441_v56, 0.0 }
 0x940   :  { %996 = vadd.xlane.f32.xlu0 %v995_v58  ;;  %v998_v59 = vsel %vm477_vm5, %v5443_v57, 0.0 }
 0x941   :  { %999 = vadd.xlane.f32.xlu1 %v998_v59 }
 0x952   :  { %1009 = vrot.lane.b32.xlu1 %v5910_v3, %s7172_s1 }
 0x956   :  { %1124 = vrot.lane.b32.xlu1 %v6075_v60, %s5682_s24  ;;  %1011 = vrot.lane.b32.xlu0 %v5916_v11, %s7172_s1 }
 0x95a   :  { %1122 = vrot.lane.b32.xlu1 %v6084_v62, %s5682_s24 }
 0x9c5   :  { %v994_v3 = vpop.xlane.xlu0 %993 }
 0x9c6   :  { %5444 = vrcp.f32 %v994_v3 }
 0x9c9   :  { %v997_v28 = vpop.xlane.xlu0 %996 }
 0x9ca   :  { %v1000_v29 = vpop.xlane.xlu1 %999  ;;  %5446 = vrcp.f32 %v997_v28 }
 0x9cb   :  { %5448 = vrcp.f32 %v1000_v29 }
 0x9cd   :  { %v1012_v31 = vpop.permute.xlu0 %1011 }
 0x9ce   :  { %v1010_v63 = vpop.permute.xlu1 %1009  ;;  %5219 = vmatprep.subr.msk.bf16.mxu0 %vm524_vm6, %v1012_v31  ;;  %v1021_v0 = vsel %vm524_vm6, %v1012_v31, 0 }
 0x9cf   :  { %4889 = vmatpush3.bf16.msra.mxu0 %v1021_v0 }
 0x9d0   :  { %4890 = vmatprep.subr.bf16.mxu0 %v1010_v63 }
 0x9d2   :  { %v1125_v11 = vpop.permute.xlu1 %1124 }
 0x9d3   :  { %4891 = vmatpush3.bf16.msra.mxu0 %v1010_v63  ;;  %v5445_v2 = vpop.eup %5444  ;;  %v1136_v22 = vsel %vm416_vm3, %v1125_v11, 0 }
 0x9d4   :  { %5220 = vmatprep.subr.msk.bf16.mxu0 %vm416_vm3, %v1125_v11  ;;  %v1004_v6 = vmul.f32 %v5445_v2, %v5439_v53 }
 0x9d6   :  { %v1123_v26 = vpop.permute.xlu1 %1122 }
 0x9d7   :  { %v5447_v4 = vpop.eup %5446  ;;  %v1133_v32 = vsel %vm416_vm3, %v1123_v26, 0 }
 0x9d8   :  { %v5449_v5 = vpop.eup %5448  ;;  %v1005_v7 = vmul.f32 %v5447_v4, %v5441_v56 }
 0x9d9   :  { %v1006_v8 = vmul.f32 %v5449_v5, %v5443_v57 }
 0x9da   :  { %v1007_v13 = vpack.c.bf16 %v1005_v7, %v1004_v6 }
 0x9db   :  { %v1008_v18 = vpack.c.bf16 %v1006_v8, %v1006_v8 }
 0x9dc   :  { %4892 = vmatprep.mubr.msk.bf16.mxu0 %vm477_vm5, %v1007_v13 }
 0x9dd   :  { %4893 = vmatmul.mubr.msk.bf16.vlgmr.msra.gmra.mxu0 %vm477_vm5, %v1008_v18 }
 0x9de   :  { %4897 = vmatpush3.bf16.xpose.msra.mxu0 %v1136_v22  ;;  %4900 = vmatprep.mubr.msk.bf16.mxu0 %vm416_vm3, %v6084_v62 }
 0x9df   :  { %5221 = vmatprep.subr.msk.bf16.mxu0 %vm416_vm3, %v1123_v26 }
 0x9e6   :  { %4899 = vmatpush3.bf16.xpose.msra.mxu0 %v1133_v32 }
 0x9ed   :  { %4901 = vmatmul.mubr.msk.bf16.vlgmr.msra.gmra.mxu0 %vm416_vm3, %v6075_v60 }
 0xa9d   :  { %v6100_v33 = vpop.f32.mrf.mxu0 }
 0xa9f   :  { %v6102_v34 = vpop.f32.mrf.mxu0 }
 0xaa1   :  { %v4895_v35 = vpop.f32.mrf.mxu0 }
 0xaa3   :  { %v6104_v36 = vpop.f32.mrf.mxu0 }
 0xaa4   :  { %v5284_v37 = vpack.i.bf16 %v6104_v36, %v6102_v34 }
 0xaad   :  { %v4902_v39 = vpop.f32.mrf.mxu0 }
 0xaae   :  { %v1181_v43 = vadd.f32 %v4902_v39, %v5946_v38 }
 0xaaf   :  { %v1172_v40 = vpop.f32.mrf.mxu0 }
 0xab0   :  { %v1173_v41 = vadd.f32 %v1172_v40, %v5946_v38  ;;  %v1192_v49 = vsel %vm477_vm5, %v1181_v43, -inf }
 0xab1   :  { %v4903_v42 = vpop.f32.mrf.mxu0 }
 0xab2   :  { %v1186_v44 = vsel %vm477_vm5, %v1173_v41, -inf }
 0xab3   :  { %v1175_v45 = vpop.f32.mrf.mxu0  ;;  %1187 = vmax.xlane.f32.xlu0 %v1186_v44 }
 0xab4   :  { %v1176_v46 = vadd.f32 %v1175_v45, %v5946_v38 }
 0xab6   :  { %v1189_v47 = vsel %vm477_vm5, %v1176_v46, -inf }
 0xab7   :  { %1190 = vmax.xlane.f32.xlu1 %v1189_v47  ;;  %1193 = vmax.xlane.f32.xlu0 %v1192_v49 }
 0xb3c   :  { %v1188_v50 = vpop.xlane.xlu0 %1187 }
 0xb3d   :  { %v1195_v51 = vsub.f32 %v1173_v41, %v1188_v50 }
 0xb3f   :  { %v1198_v52 = vmul.f32 1.442695, %v1195_v51 }
 0xb40   :  { %v1191_v53 = vpop.xlane.xlu1 %1190  ;;  %v1194_v55 = vpop.xlane.xlu0 %1193 }
 0xb41   :  { %5450 = vpow2.f32 %v1198_v52  ;;  %v1196_v56 = vsub.f32 %v1176_v46, %v1191_v53  ;;  %v1197_v57 = vsub.f32 %v1181_v43, %v1194_v55 }
 0xb43   :  { %v1200_v58 = vmul.f32 1.442695, %v1196_v56  ;;  %v1202_v59 = vmul.f32 1.442695, %v1197_v57 }
 0xb45   :  { %5452 = vpow2.f32 %v1200_v58 }
 0xb46   :  { %5454 = vpow2.f32 %v1202_v59 }
 0xb4e   :  { %v5451_v61 = vpop.eup %5450 }
 0xb4f   :  { %v1204_v3 = vsel %vm477_vm5, %v5451_v61, 0.0 }
 0xb50   :  { %1205 = vadd.xlane.f32.xlu0 %v1204_v3 }
 0xb52   :  { %v5453_v28 = vpop.eup %5452 }
 0xb53   :  { %v5455_v29 = vpop.eup %5454  ;;  %v1207_v31 = vsel %vm477_vm5, %v5453_v28, 0.0 }
 0xb54   :  { %1208 = vadd.xlane.f32.xlu0 %v1207_v31  ;;  %v1210_v63 = vsel %vm477_vm5, %v5455_v29, 0.0 }
 0xb55   :  { %1211 = vadd.xlane.f32.xlu1 %v1210_v63 }
 0xb66   :  { %1221 = vrot.lane.b32.xlu1 %v6084_v62, %s5686_s26 }
 0xb6a   :  { %1289 = vrot.lane.b32.xlu1 %v6075_v60, %s5683_s25  ;;  %1223 = vrot.lane.b32.xlu0 %v6075_v60, %s5686_s26 }
 0xb6e   :  { %1287 = vrot.lane.b32.xlu1 %v6084_v62, %s5683_s25  ;;  %1283 = vrot.lane.b32.xlu0 %v6084_v62, %s5684_s3 }
 0xb72   :  { %1285 = vrot.lane.b32.xlu1 %v6075_v60, %s5684_s3 }
 0xbd9   :  { %v1206_v0 = vpop.xlane.xlu0 %1205 }
 0xbda   :  { %5456 = vrcp.f32 %v1206_v0 }
 0xbdd   :  { %v1209_v11 = vpop.xlane.xlu0 %1208 }
 0xbde   :  { %v1212_v2 = vpop.xlane.xlu1 %1211  ;;  %5458 = vrcp.f32 %v1209_v11 }
 0xbdf   :  { %5460 = vrcp.f32 %v1212_v2 }
 0xbe1   :  { %v1224_v4 = vpop.permute.xlu0 %1223 }
 0xbe2   :  { %v1222_v5 = vpop.permute.xlu1 %1221  ;;  %5222 = vmatprep.subr.msk.bf16.mxu1 %vm524_vm6, %v1224_v4  ;;  %v1233_v6 = vsel %vm524_vm6, %v1224_v4, 0 }
 0xbe3   :  { %4905 = vmatpush3.bf16.msra.mxu1 %v1233_v6 }
 0xbe4   :  { %4906 = vmatprep.subr.bf16.mxu1 %v1222_v5 }
 0xbe5   :  { %v1284_v40 = vpop.permute.xlu0 %1283 }
 0xbe6   :  { %v1290_v7 = vpop.permute.xlu1 %1289 }
 0xbe7   :  { %4907 = vmatpush3.bf16.msra.mxu1 %v1222_v5  ;;  %v5457_v8 = vpop.eup %5456  ;;  %v1301_v41 = vsel %vm416_vm3, %v1290_v7, 0 }
 0xbe8   :  { %5223 = vmatprep.subr.msk.bf16.mxu1 %vm416_vm3, %v1290_v7  ;;  %v1216_v22 = vmul.f32 %v5457_v8, %v5451_v61 }
 0xbea   :  { %v1288_v42 = vpop.permute.xlu1 %1287 }
 0xbeb   :  { %v5459_v13 = vpop.eup %5458  ;;  %v1298_v43 = vsel %vm416_vm3, %v1288_v42, 0 }
 0xbec   :  { %v5461_v18 = vpop.eup %5460  ;;  %v1217_v26 = vmul.f32 %v5459_v13, %v5453_v28 }
 0xbed   :  { %v1218_v32 = vmul.f32 %v5461_v18, %v5455_v29 }
 0xbee   :  { %v1219_v35 = vpack.c.bf16 %v1217_v26, %v1216_v22  ;;  %v1286_v44 = vpop.permute.xlu1 %1285 }
 0xbef   :  { %v1220_v39 = vpack.c.bf16 %v1218_v32, %v1218_v32 }
 0xbf0   :  { %4908 = vmatprep.mubr.msk.bf16.mxu1 %vm477_vm5, %v1219_v35 }
 0xbf1   :  { %4909 = vmatmul.mubr.msk.bf16.vlgmr.msra.gmra.mxu1 %vm477_vm5, %v1220_v39 }
 0xbf2   :  { %4913 = vmatpush3.bf16.xpose.msra.mxu1 %v1301_v41  ;;  %4916 = vmatprep.mubr.msk.bf16.mxu1 %vm416_vm3, %v1284_v40 }
 0xbf3   :  { %5224 = vmatprep.subr.msk.bf16.mxu1 %vm416_vm3, %v1288_v42 }
 0xbfa   :  { %4915 = vmatpush3.bf16.xpose.msra.mxu1 %v1298_v43 }
 0xc01   :  { %4917 = vmatmul.mubr.msk.bf16.vlgmr.msra.gmra.mxu1 %vm416_vm3, %v1286_v44 }
 0xcb1   :  { %v6139_v45 = vpop.f32.mrf.mxu1 }
 0xcb3   :  { %v6141_v46 = vpop.f32.mrf.mxu1 }
 0xcb5   :  { %v4911_v47 = vpop.f32.mrf.mxu1 }
 0xcb7   :  { %v6143_v49 = vpop.f32.mrf.mxu1 }
 0xcc1   :  { %v4918_v50 = vpop.f32.mrf.mxu1 }
 0xcc2   :  { %v1346_v55 = vadd.f32 %v4918_v50, %v5946_v38 }
 0xcc3   :  { %v1337_v51 = vpop.f32.mrf.mxu1 }
 0xcc4   :  { %v1338_v52 = vadd.f32 %v1337_v51, %v5946_v38  ;;  %v1357_v61 = vsel %vm477_vm5, %v1346_v55, -inf }
 0xcc5   :  { %v4919_v53 = vpop.f32.mrf.mxu1 }
 0xcc6   :  { %v1351_v56 = vsel %vm477_vm5, %v1338_v52, -inf }
 0xcc7   :  { %v1340_v57 = vpop.f32.mrf.mxu1  ;;  %1352 = vmax.xlane.f32.xlu0 %v1351_v56 }
 0xcc8   :  { %v1341_v58 = vadd.f32 %v1340_v57, %v5946_v38 }
 0xcca   :  { %v1354_v59 = vsel %vm477_vm5, %v1341_v58, -inf }
 0xccb   :  { %1355 = vmax.xlane.f32.xlu1 %v1354_v59  ;;  %1358 = vmax.xlane.f32.xlu0 %v1357_v61 }
 0xd50   :  { %v1353_v3 = vpop.xlane.xlu0 %1352 }
 0xd51   :  { %v1360_v28 = vsub.f32 %v1338_v52, %v1353_v3 }
 0xd53   :  { %v1363_v29 = vmul.f32 1.442695, %v1360_v28 }
 0xd54   :  { %v1356_v31 = vpop.xlane.xlu1 %1355  ;;  %v1359_v63 = vpop.xlane.xlu0 %1358 }
 0xd55   :  { %5462 = vpow2.f32 %v1363_v29  ;;  %v1361_v0 = vsub.f32 %v1341_v58, %v1356_v31  ;;  %v1362_v11 = vsub.f32 %v1346_v55, %v1359_v63 }
 0xd57   :  { %v1365_v2 = vmul.f32 1.442695, %v1361_v0  ;;  %v1367_v4 = vmul.f32 1.442695, %v1362_v11 }
 0xd59   :  { %5464 = vpow2.f32 %v1365_v2 }
 0xd5a   :  { %5466 = vpow2.f32 %v1367_v4 }
 0xd62   :  { %v5463_v5 = vpop.eup %5462 }
 0xd63   :  { %v1369_v6 = vsel %vm477_vm5, %v5463_v5, 0.0 }
 0xd64   :  { %1370 = vadd.xlane.f32.xlu0 %v1369_v6 }
 0xd66   :  { %v5465_v7 = vpop.eup %5464 }
 0xd67   :  { %v5467_v8 = vpop.eup %5466  ;;  %v1372_v13 = vsel %vm477_vm5, %v5465_v7, 0.0 }
 0xd68   :  { %1373 = vadd.xlane.f32.xlu0 %v1372_v13  ;;  %v1375_v18 = vsel %vm477_vm5, %v5467_v8, 0.0 }
 0xd69   :  { %1376 = vadd.xlane.f32.xlu1 %v1375_v18 }
 0xd7a   :  { %1386 = vrot.lane.b32.xlu1 %v6084_v62, %s5687_s27 }
 0xd7e   :  { %1454 = vrot.lane.b32.xlu1 %v6075_v60, %s5688_s28  ;;  %1388 = vrot.lane.b32.xlu0 %v6075_v60, %s5687_s27 }
 0xd82   :  { %1452 = vrot.lane.b32.xlu1 %v6084_v62, %s5688_s28  ;;  %1448 = vrot.lane.b32.xlu0 %v6084_v62, %s5689_s29 }
 0xd86   :  { %1450 = vrot.lane.b32.xlu1 %v6075_v60, %s5689_s29 }
 0xded   :  { %v1371_v22 = vpop.xlane.xlu0 %1370 }
 0xdee   :  { %5468 = vrcp.f32 %v1371_v22 }
 0xdf1   :  { %v1374_v26 = vpop.xlane.xlu0 %1373 }
 0xdf2   :  { %v1377_v32 = vpop.xlane.xlu1 %1376  ;;  %5470 = vrcp.f32 %v1374_v26 }
 0xdf3   :  { %5472 = vrcp.f32 %v1377_v32 }
 0xdf5   :  { %v1389_v35 = vpop.permute.xlu0 %1388 }
 0xdf6   :  { %v1387_v39 = vpop.permute.xlu1 %1386  ;;  %5225 = vmatprep.subr.msk.bf16.mxu0 %vm524_vm6, %v1389_v35  ;;  %v1398_v40 = vsel %vm524_vm6, %v1389_v35, 0 }
 0xdf7   :  { %4921 = vmatpush3.bf16.msra.mxu0 %v1398_v40 }
 0xdf8   :  { %4922 = vmatprep.subr.bf16.mxu0 %v1387_v39 }
 0xdf9   :  { %v1449_v55 = vpop.permute.xlu0 %1448 }
 0xdfa   :  { %v1455_v41 = vpop.permute.xlu1 %1454 }
 0xdfb   :  { %4923 = vmatpush3.bf16.msra.mxu0 %v1387_v39  ;;  %v5469_v42 = vpop.eup %5468  ;;  %v1466_v56 = vsel %vm416_vm3, %v1455_v41, 0 }
 0xdfc   :  { %5226 = vmatprep.subr.msk.bf16.mxu0 %vm416_vm3, %v1455_v41  ;;  %v1381_v47 = vmul.f32 %v5469_v42, %v5463_v5 }
 0xdfe   :  { %v1453_v57 = vpop.permute.xlu1 %1452 }
 0xdff   :  { %v5471_v43 = vpop.eup %5470  ;;  %v1463_v58 = vsel %vm416_vm3, %v1453_v57, 0 }
 0xe00   :  { %v5473_v44 = vpop.eup %5472  ;;  %v1382_v50 = vmul.f32 %v5471_v43, %v5465_v7 }
 0xe01   :  { %v1383_v51 = vmul.f32 %v5473_v44, %v5467_v8 }
 0xe02   :  { %v1384_v52 = vpack.c.bf16 %v1382_v50, %v1381_v47  ;;  %v1451_v59 = vpop.permute.xlu1 %1450 }
 0xe03   :  { %v1385_v53 = vpack.c.bf16 %v1383_v51, %v1383_v51 }
 0xe04   :  { %4924 = vmatprep.mubr.msk.bf16.mxu0 %vm477_vm5, %v1384_v52 }
 0xe05   :  { %4925 = vmatmul.mubr.msk.bf16.vlgmr.msra.gmra.mxu0 %vm477_vm5, %v1385_v53 }
 0xe06   :  { %4929 = vmatpush3.bf16.xpose.msra.mxu0 %v1466_v56  ;;  %4932 = vmatprep.mubr.msk.bf16.mxu0 %vm416_vm3, %v1449_v55 }
 0xe07   :  { %5227 = vmatprep.subr.msk.bf16.mxu0 %vm416_vm3, %v1453_v57 }
 0xe0e   :  { %4931 = vmatpush3.bf16.xpose.msra.mxu0 %v1463_v58 }
 0xe15   :  { %4933 = vmatmul.mubr.msk.bf16.vlgmr.msra.gmra.mxu0 %vm416_vm3, %v1451_v59 }
 0xec5   :  { %v6176_v61 = vpop.f32.mrf.mxu0 }
 0xec7   :  { %v6178_v3 = vpop.f32.mrf.mxu0 }
 0xec9   :  { %v4927_v28 = vpop.f32.mrf.mxu0 }
 0xecb   :  { %v6180_v29 = vpop.f32.mrf.mxu0 }
 0xecc   :  { %v5304_v31 = vpack.i.bf16 %v6176_v61, %v6180_v29  ;;  %v5376_v61 = vld [vmem:[%s7162_s14 + $0x18] sm:$0xff]   ;;  %v5377_v29 = vld [vmem:[%s7162_s14 + $0x10] sm:$0xff]  }
 0xed5   :  { %v4934_v63 = vpop.f32.mrf.mxu0 }
 0xed6   :  { %v1511_v4 = vadd.f32 %v4934_v63, %v5946_v38 }
 0xed7   :  { %v1502_v0 = vpop.f32.mrf.mxu0 }
 0xed8   :  { %v1503_v11 = vadd.f32 %v1502_v0, %v5946_v38  ;;  %v1522_v13 = vsel %vm477_vm5, %v1511_v4, -inf }
 0xed9   :  { %v4935_v2 = vpop.f32.mrf.mxu0 }
 0xeda   :  { %v1516_v5 = vsel %vm477_vm5, %v1503_v11, -inf }
 0xedb   :  { %v1505_v6 = vpop.f32.mrf.mxu0  ;;  %1517 = vmax.xlane.f32.xlu0 %v1516_v5 }
 0xedc   :  { %v1506_v7 = vadd.f32 %v1505_v6, %v5946_v38 }
 0xede   :  { %v1519_v8 = vsel %vm477_vm5, %v1506_v7, -inf }
 0xedf   :  { %1520 = vmax.xlane.f32.xlu1 %v1519_v8  ;;  %1523 = vmax.xlane.f32.xlu0 %v1522_v13 }
 0xf64   :  { %v1518_v18 = vpop.xlane.xlu0 %1517 }
 0xf65   :  { %v1525_v22 = vsub.f32 %v1503_v11, %v1518_v18 }
 0xf67   :  { %v1528_v26 = vmul.f32 1.442695, %v1525_v22 }
 0xf68   :  { %v1521_v32 = vpop.xlane.xlu1 %1520  ;;  %v1524_v35 = vpop.xlane.xlu0 %1523 }
 0xf69   :  { %5474 = vpow2.f32 %v1528_v26  ;;  %v1526_v39 = vsub.f32 %v1506_v7, %v1521_v32  ;;  %v1527_v40 = vsub.f32 %v1511_v4, %v1524_v35 }
 0xf6b   :  { %v1530_v41 = vmul.f32 1.442695, %v1526_v39  ;;  %v1532_v42 = vmul.f32 1.442695, %v1527_v40 }
 0xf6d   :  { %5476 = vpow2.f32 %v1530_v41 }
 0xf6e   :  { %5478 = vpow2.f32 %v1532_v42 }
 0xf76   :  { %v5475_v43 = vpop.eup %5474 }
 0xf77   :  { %v1534_v44 = vsel %vm477_vm5, %v5475_v43, 0.0 }
 0xf78   :  { %1535 = vadd.xlane.f32.xlu0 %v1534_v44 }
 0xf7a   :  { %v5477_v47 = vpop.eup %5476 }
 0xf7b   :  { %v5479_v50 = vpop.eup %5478  ;;  %v1537_v51 = vsel %vm477_vm5, %v5477_v47, 0.0 }
 0xf7c   :  { %1538 = vadd.xlane.f32.xlu0 %v1537_v51  ;;  %v1540_v52 = vsel %vm477_vm5, %v5479_v50, 0.0 }
 0xf7d   :  { %1541 = vadd.xlane.f32.xlu1 %v1540_v52 }
 0xf8e   :  { %1551 = vrot.lane.b32.xlu1 %v6084_v62, %s7178_s0 }
 0xf92   :  { %1619 = vrot.lane.b32.xlu1 %v6075_v60, %s7176_s30  ;;  %1553 = vrot.lane.b32.xlu0 %v6075_v60, %s7178_s0  ;;  %s7195_s0 = smov 72  }
 0xf96   :  { %1617 = vrot.lane.b32.xlu1 %v6084_v62, %s7176_s30  ;;  %1613 = vrot.lane.b32.xlu0 %v6084_v62, %s7174_s20 }
 0xf9a   :  { %1615 = vrot.lane.b32.xlu1 %v6075_v60, %s7174_s20 }
0x1001   :  { %v1536_v53 = vpop.xlane.xlu0 %1535 }
0x1002   :  { %5480 = vrcp.f32 %v1536_v53 }
0x1005   :  { %v1539_v55 = vpop.xlane.xlu0 %1538 }
0x1006   :  { %v1542_v56 = vpop.xlane.xlu1 %1541  ;;  %5482 = vrcp.f32 %v1539_v55 }
0x1007   :  { %5484 = vrcp.f32 %v1542_v56 }
0x1009   :  { %v1554_v57 = vpop.permute.xlu0 %1553 }
0x100a   :  { %v1552_v58 = vpop.permute.xlu1 %1551  ;;  %5228 = vmatprep.subr.msk.bf16.mxu1 %vm524_vm6, %v1554_v57  ;;  %v1563_v59 = vsel %vm524_vm6, %v1554_v57, 0 }
0x100b   :  { %4937 = vmatpush3.bf16.msra.mxu1 %v1563_v59 }
0x100c   :  { %4938 = vmatprep.subr.bf16.mxu1 %v1552_v58 }
0x100d   :  { %v1614_v8 = vpop.permute.xlu0 %1613 }
0x100e   :  { %v1620_v28 = vpop.permute.xlu1 %1619 }
0x100f   :  { %4939 = vmatpush3.bf16.msra.mxu1 %v1552_v58  ;;  %v5481_v63 = vpop.eup %5480  ;;  %v1631_v13 = vsel %vm416_vm3, %v1620_v28, 0 }
0x1010   :  { %5229 = vmatprep.subr.msk.bf16.mxu1 %vm416_vm3, %v1620_v28  ;;  %v1546_v2 = vmul.f32 %v5481_v63, %v5475_v43 }
0x1012   :  { %v1618_v18 = vpop.permute.xlu1 %1617 }
0x1013   :  { %v5483_v0 = vpop.eup %5482  ;;  %v1628_v22 = vsel %vm416_vm3, %v1618_v18, 0 }
0x1014   :  { %v5485_v11 = vpop.eup %5484  ;;  %v1547_v4 = vmul.f32 %v5483_v0, %v5477_v47 }
0x1015   :  { %v1548_v5 = vmul.f32 %v5485_v11, %v5479_v50 }
0x1016   :  { %v1549_v6 = vpack.c.bf16 %v1547_v4, %v1546_v2  ;;  %v1616_v26 = vpop.permute.xlu1 %1615 }
0x1017   :  { %v1550_v7 = vpack.c.bf16 %v1548_v5, %v1548_v5 }
0x1018   :  { %4940 = vmatprep.mubr.msk.bf16.mxu1 %vm477_vm5, %v1549_v6 }
0x1019   :  { %4941 = vmatmul.mubr.msk.bf16.vlgmr.msra.gmra.mxu1 %vm477_vm5, %v1550_v7 }
0x101a   :  { %4945 = vmatpush3.bf16.xpose.msra.mxu1 %v1631_v13  ;;  %4948 = vmatprep.mubr.msk.bf16.mxu1 %vm416_vm3, %v1614_v8 }
0x101b   :  { %5230 = vmatprep.subr.msk.bf16.mxu1 %vm416_vm3, %v1618_v18 }
0x1022   :  { %4947 = vmatpush3.bf16.xpose.msra.mxu1 %v1628_v22 }
0x1023   :  { %4976 = vmatprep.subr.bf16.mxu1 %v5680_v1 }
0x1029   :  { %4949 = vmatmul.mubr.msk.bf16.vlgmr.msra.gmra.mxu1 %vm416_vm3, %v1616_v26 }
0x102a   :  { %4980 = vmatprep.mubr.msk.bf16.mxu1 %vm5681_vm0, %v5680_v1 }
0x10d9   :  { %v6218_v32 = vpop.f32.mrf.mxu1 }
0x10db   :  { %v1599_v35 = vpop.f32.mrf.mxu1 }
0x10dc   :  { %v5294_v17 = vpack.i.bf16 %v1599_v35, %v6053_v23 }
0x10dd   :  { %v4943_v39 = vpop.f32.mrf.mxu1 }
0x10df   :  { %v6220_v40 = vpop.f32.mrf.mxu1 }
0x10e0   :  { %v5309_v41 = vpack.i.bf16 %v6218_v32, %v6220_v40  ;;  %v5379_v32 = vld [vmem:[%s7162_s14] sm:$0xff]  }
0x10e9   :  { %v4950_v42 = vpop.f32.mrf.mxu1 }
0x10ea   :  { %v1676_v50 = vadd.f32 %v4950_v42, %v5946_v38 }
0x10eb   :  { %v1667_v43 = vpop.f32.mrf.mxu1 }
0x10ec   :  { %v1668_v44 = vadd.f32 %v1667_v43, %v5946_v38  ;;  %v1687_v56 = vsel %vm477_vm5, %v1676_v50, -inf }
0x10ed   :  { %v4951_v47 = vpop.f32.mrf.mxu1 }
0x10ee   :  { %v1681_v51 = vsel %vm477_vm5, %v1668_v44, -inf  ;;  %v5372_v47 = vld [vmem:[%s7155_s7 + $0x8] sm:$0xff]  }
0x10ef   :  { %v1670_v52 = vpop.f32.mrf.mxu1  ;;  %1682 = vmax.xlane.f32.xlu0 %v1681_v51 }
0x10f0   :  { %v1671_v53 = vadd.f32 %v1670_v52, %v5946_v38 }
0x10f2   :  { %v1684_v55 = vsel %vm477_vm5, %v1671_v53, -inf }
0x10f3   :  { %1685 = vmax.xlane.f32.xlu1 %v1684_v55  ;;  %1688 = vmax.xlane.f32.xlu0 %v1687_v56 }
0x1178   :  { %v1683_v57 = vpop.xlane.xlu0 %1682 }
0x1179   :  { %v1690_v58 = vsub.f32 %v1668_v44, %v1683_v57 }
0x117b   :  { %v1693_v59 = vmul.f32 1.442695, %v1690_v58 }
0x117c   :  { %v1686_v28 = vpop.xlane.xlu1 %1685  ;;  %v1689_v63 = vpop.xlane.xlu0 %1688 }
0x117d   :  { %5486 = vpow2.f32 %v1693_v59  ;;  %v1691_v0 = vsub.f32 %v1671_v53, %v1686_v28  ;;  %v1692_v11 = vsub.f32 %v1676_v50, %v1689_v63  ;;  %v5373_v59 = vld [vmem:[%s7155_s7] sm:$0xff]  }
0x117f   :  { %v1695_v2 = vmul.f32 1.442695, %v1691_v0  ;;  %v1697_v4 = vmul.f32 1.442695, %v1692_v11 }
0x1181   :  { %5488 = vpow2.f32 %v1695_v2 }
0x1182   :  { %5490 = vpow2.f32 %v1697_v4 }
0x118a   :  { %v5487_v5 = vpop.eup %5486 }
0x118b   :  { %v1699_v6 = vsel %vm477_vm5, %v5487_v5, 0.0 }
0x118c   :  { %1700 = vadd.xlane.f32.xlu0 %v1699_v6 }
0x118e   :  { %v5489_v7 = vpop.eup %5488 }
0x118f   :  { %v5491_v8 = vpop.eup %5490  ;;  %v1702_v13 = vsel %vm477_vm5, %v5489_v7, 0.0 }
0x1190   :  { %1703 = vadd.xlane.f32.xlu0 %v1702_v13  ;;  %v1705_v18 = vsel %vm477_vm5, %v5491_v8, 0.0 }
0x1191   :  { %1706 = vadd.xlane.f32.xlu1 %v1705_v18 }
0x11a2   :  { %1716 = vrot.lane.b32.xlu1 %v6084_v62, %s7172_s1  ;;  %v5289_v62 = vpack.i.bf16 %v6178_v3, %v6014_v16 }
0x11a6   :  { %5275 = vrot.lane.b32.xlu1 %v5274_v21, %s7184_s22  ;;  %1718 = vrot.lane.b32.xlu0 %v6075_v60, %s7172_s1 }
0x11aa   :  { %5280 = vrot.lane.b32.xlu1 %v5279_v30, %s7182_s2  ;;  %5285 = vrot.lane.b32.xlu0 %v5284_v37, %s7180_s23 }
0x11ae   :  { %5290 = vrot.lane.b32.xlu1 %v5289_v62, %s7184_s22  ;;  %5295 = vrot.lane.b32.xlu0 %v5294_v17, %s7182_s2 }
0x1215   :  { %v1701_v20 = vpop.xlane.xlu0 %1700 }
0x1216   :  { %5492 = vrcp.f32 %v1701_v20 }
0x1219   :  { %v1704_v21 = vpop.xlane.xlu0 %1703 }
0x121a   :  { %v1707_v25 = vpop.xlane.xlu1 %1706  ;;  %5494 = vrcp.f32 %v1704_v21 }
0x121b   :  { %5496 = vrcp.f32 %v1707_v25 }
0x121d   :  { %v1719_v27 = vpop.permute.xlu0 %1718 }
0x121e   :  { %v1717_v30 = vpop.permute.xlu1 %1716  ;;  %5231 = vmatprep.subr.msk.bf16.mxu0 %vm524_vm6, %v1719_v27  ;;  %v1728_v60 = vsel %vm524_vm6, %v1719_v27, 0 }
0x121f   :  { %4953 = vmatpush3.bf16.msra.mxu0 %v1728_v60 }
0x1220   :  { %4954 = vmatprep.subr.bf16.mxu0 %v1717_v30 }
0x1221   :  { %v5286_v50 = vpop.permute.xlu0 %5285 }
0x1222   :  { %v5276_v16 = vpop.permute.xlu1 %5275  ;;  %v5288_v57 = vunpack.i.h.bf16 %v5286_v50  ;;  %v5287_v58 = vunpack.i.l.bf16 %v5286_v50 }
0x1223   :  { %4955 = vmatpush3.bf16.msra.mxu0 %v1717_v30  ;;  %v5493_v23 = vpop.eup %5492  ;;  %v5278_v3 = vunpack.i.h.bf16 %v5276_v16  ;;  %v5277_v22 = vunpack.i.l.bf16 %v5276_v16 }
0x1224   :  { %4960 = vmatprep.subr.bf16.mxu0 %v5680_v1  ;;  %v1711_v26 = vmul.f32 %v5493_v23, %v5487_v5  ;;  %v6289_v5 = vld [vmem:[%s7156_s8] ss:$0 sm:$0xff] }
0x1225   :  { %v1108_v52 = vsel %vm416_vm3, %v6012_v15, %v5278_v3  ;;  %v1107_v53 = vsel %vm416_vm3, %v6010_v12, %v5277_v22 }
0x1226   :  { %v5281_v34 = vpop.permute.xlu1 %5280 }
0x1227   :  { %v5495_v36 = vpop.eup %5494  ;;  %v5283_v39 = vunpack.i.h.bf16 %v5281_v34  ;;  %v5282_v42 = vunpack.i.l.bf16 %v5281_v34  ;;  %v5296_v34 = vpop.permute.xlu0 %5295 }
0x1228   :  { %v5497_v37 = vpop.eup %5496  ;;  %v1712_v35 = vmul.f32 %v5495_v36, %v5489_v7  ;;  %v6296_v7 = vld [vmem:[%s7157_s9] ss:$0 sm:$0xff]  ;;  %v5298_v3 = vunpack.i.h.bf16 %v5296_v34  ;;  %v5297_v22 = vunpack.i.l.bf16 %v5296_v34 }
0x1229   :  { %v1713_v43 = vmul.f32 %v5497_v37, %v5491_v8  ;;  %v1111_v55 = vsel %vm1110_vm7, %v1107_v53, %v5282_v42  ;;  %v1112_v56 = vsel %vm1110_vm7, %v1108_v52, %v5283_v39 }
0x122a   :  { %v1714_v44 = vpack.c.bf16 %v1712_v35, %v1711_v26  ;;  %v1114_v12 = vsel %vm477_vm5, %v1111_v55, %v5287_v58  ;;  %v1115_v15 = vsel %vm477_vm5, %v1112_v56, %v5288_v57  ;;  %v5291_v16 = vpop.permute.xlu1 %5290 }
0x122b   :  { %v1715_v51 = vpack.c.bf16 %v1713_v43, %v1713_v43  ;;  %v1823_v28 = vpack.c.bf16 %v1115_v15, %v1114_v12  ;;  %v5293_v23 = vunpack.i.h.bf16 %v5291_v16 }
0x122c   :  { %4956 = vmatprep.mubr.msk.bf16.mxu0 %vm477_vm5, %v1714_v44 }
0x122d   :  { %4957 = vmatmul.mubr.msk.bf16.vlgmr.msra.gmra.mxu0 %vm477_vm5, %v1715_v51  ;;  %v1814_v36 = vsel %vm416_vm3, %v6141_v46, %v5293_v23 }
0x122e   :  { %4961 = vmatpush3.bf16.msra.mxu0 %v5372_v47  ;;  %4964 = vmatprep.mubr.msk.bf16.mxu0 %vm5681_vm0, %v5680_v1  ;;  %v1817_v42 = vsel %vm1110_vm7, %v1814_v36, %v5298_v3 }
0x122f   :  { %4962 = vmatprep.subr.bf16.mxu0 %v5680_v1 }
0x1232   :  { %4963 = vmatpush3.bf16.msra.mxu0 %v5373_v59 }
0x1233   :  { %4992 = vmatprep.subr.bf16.mxu0 %v5680_v1 }
0x1235   :  { %4965 = vmatmul.mubr.msk.bf16.vlgmr.msra.gmra.mxu0 %vm216_vm2, %v1823_v28 }
0x1236   :  { %4968 = vmatprep.mubr.msk.bf16.mxu0 %vm5681_vm0, %v5680_v1  ;;  %4993 = vmatpush3.bf16.msra.mxu0 %v5376_v61 }
0x1237   :  { %4994 = vmatprep.subr.bf16.mxu0 %v5680_v1 }
0x123a   :  { %4995 = vmatpush3.bf16.msra.mxu0 %v5377_v29 }
0x123b   :  { %4996 = vmatprep.subr.bf16.mxu0 %v5680_v1 }
0x12ed   :  { %v6280_v63 = vpop.f32.mrf.mxu0 }
0x12ef   :  { %v1764_v0 = vpop.f32.mrf.mxu0 }
0x12f0   :  { %v5299_v11 = vpack.i.bf16 %v1764_v0, %v6100_v33 }
0x12f1   :  { %v4959_v2 = vpop.f32.mrf.mxu0 }
0x12f2   :  { %5300 = vrot.lane.b32.xlu1 %v5299_v11, %s7180_s23 }
0x12f3   :  { %v6284_v4 = vpop.f32.mrf.mxu0 }
0x12f4   :  { %v5314_v6 = vpack.i.bf16 %v6280_v63, %v6284_v4 }
0x12f5   :  { %v1887_v8 = vpop.f32.mrf.mxu0 }
0x12f6   :  { %v1888_v33 = vadd.f32 %v6289_v5, %v1887_v8 }
0x12f7   :  { %v4966_v13 = vpop.f32.mrf.mxu0 }
0x12f8   :  { %v1916_v18 = vmul.f32 %v6296_v7, %v1888_v33 }
0x12f9   :  { %v1890_v62 = vpop.f32.mrf.mxu0 }
0x12fa   :  { %v6301_v17 = vadd.f32 %v1916_v18, %v5831_v9  ;;  %v1891_v25 = vadd.f32 %v6289_v5, %v1890_v62  ;;  %v5292_v9 = vunpack.i.l.bf16 %v5291_v16  ;;  %v5374_v62 = vld [vmem:[%s7160_s12 + $0x8] sm:$0xff]  }
0x12fb   :  { %v4967_v20 = vpop.f32.mrf.mxu0  ;;  %4977 = vmatpush3.bf16.msra.mxu1 %v5374_v62 }
0x12fc   :  { %v1928_v21 = vsel %vm216_vm2, %v6301_v17, 0.0  ;;  %v1917_v27 = vmul.f32 %v6296_v7, %v1891_v25  ;;  %v1109_v37 = vsel %vm416_vm3, %v6008_v10, %v5292_v9  ;;  %4978 = vmatprep.subr.bf16.mxu1 %v5680_v1 }
0x12fd   :  { %1929 = vadd.xlane.f32.xlu0 %v1928_v21  ;;  %v1113_v39 = vsel %vm1110_vm7, %v1109_v37, %v5297_v22 }
0x12fe   :  { %v6308_v30 = vadd.f32 %v1917_v27, %v5838_v14 }
0x1300   :  { %v1931_v60 = vsel %vm216_vm2, %v6308_v30, 0.0 }
0x1316   :  { %1932 = vadd.xlane.f32.xlu1 %v1931_v60 }
0x1364   :  { %v5301_v26 = vpop.permute.xlu1 %5300 }
0x1365   :  { %v5303_v35 = vunpack.i.h.bf16 %v5301_v26  ;;  %v5302_v14 = vunpack.i.l.bf16 %v5301_v26 }
0x1367   :  { %v1116_v43 = vsel %vm477_vm5, %v1113_v39, %v5302_v14  ;;  %v1820_v44 = vsel %vm477_vm5, %v1817_v42, %v5303_v35 }
0x1368   :  { %v1824_v47 = vpack.c.bf16 %v1820_v44, %v1116_v43  ;;  %v6364_v43 = vld [vmem:[%s7158_s10] ss:$0 sm:$0xff] }
0x136a   :  { %4969 = vmatmul.mubr.msk.bf16.gmra.mxu0 %vm216_vm2, %v1824_v47 }
0x136b   :  { %4972 = vmatprep.mubr.msk.bf16.mxu0 %vm5681_vm0, %v5680_v1 }
0x1386   :  { %v1930_v53 = vpop.xlane.xlu0 %1929 }
0x1387   :  { %v1946_v58 = vmul.f32 0.03125, %v1930_v53 }
0x1389   :  { %v1952_v11 = vsub.f32 %v6301_v17, %v1946_v58 }
0x138b   :  { %v1958_v18 = vmul.f32 %v1952_v11, %v1952_v11 }
0x139f   :  { %v1933_v10 = vpop.xlane.xlu1 %1932 }
0x13a0   :  { %v1947_v46 = vmul.f32 0.03125, %v1933_v10 }
0x13a2   :  { %v1953_v50 = vsub.f32 %v6308_v30, %v1947_v46  ;;  %v6370_v46 = vld [vmem:[%s7159_s11] ss:$0 sm:$0xff] }
0x13a4   :  { %v1959_v51 = vmul.f32 %v1953_v50, %v1953_v50 }
0x13a6   :  { %v1967_v52 = vsel %vm216_vm2, %v1959_v51, 0.0 }
0x13a7   :  { %1968 = vadd.xlane.f32.xlu1 %v1967_v52 }
0x142a   :  { %v1895_v55 = vpop.f32.mrf.mxu0 }
0x142b   :  { %v1896_v56 = vadd.f32 %v6289_v5, %v1895_v55 }
0x142c   :  { %v4970_v57 = vpop.f32.mrf.mxu0 }
0x142d   :  { %v1918_v59 = vmul.f32 %v6296_v7, %v1896_v56 }
0x142e   :  { %v1898_v12 = vpop.f32.mrf.mxu0 }
0x142f   :  { %v6328_v15 = vadd.f32 %v1918_v59, %v5845_v19  ;;  %v1899_v28 = vadd.f32 %v6289_v5, %v1898_v12  ;;  %v1964_v19 = vsel %vm216_vm2, %v1958_v18, 0.0 }
0x1430   :  { %v4971_v0 = vpop.f32.mrf.mxu0  ;;  %v1969_v20 = vpop.xlane.xlu1 %1968 }
0x1431   :  { %v1919_v2 = vmul.f32 %v6296_v7, %v1899_v28  ;;  %v1934_v8 = vsel %vm216_vm2, %v6328_v15, 0.0  ;;  %v1983_v21 = vmul.f32 0.03125, %v1969_v20 }
0x1432   :  { %1935 = vadd.xlane.f32.xlu0 %v1934_v8 }
0x1433   :  { %v6336_v33 = vadd.f32 %v1919_v2, %v5852_v24  ;;  %v5375_v24 = vld [vmem:[%s7160_s12] sm:$0xff]   ;;  %v1989_v60 = vadd.f32 1e-06, %v1983_v21 }
0x1434   :  { %4979 = vmatpush3.bf16.msra.mxu1 %v5375_v24 }
0x1435   :  { %v1937_v13 = vsel %vm216_vm2, %v6336_v33, 0.0  ;;  %5012 = vmatprep.subr.bf16.mxu1 %v5680_v1  ;;  %5498 = vrsqrt.f32 %v1989_v60 }
0x1436   :  { %1938 = vadd.xlane.f32.xlu0 %v1937_v13 }
0x143a   :  { %1965 = vadd.xlane.f32.xlu0 %v1964_v19 }
0x1442   :  { %v5499_v39 = vpop.eup %5498 }
0x1443   :  { %v2001_v42 = vmul.f32 %v5499_v39, %v1953_v50 }
0x1445   :  { %v2013_v10 = vmul.f32 %v6364_v43, %v2001_v42 }
0x1447   :  { %v2025_v52 = vadd.f32 %v6370_v46, %v2013_v10 }
0x14bb   :  { %v1936_v25 = vpop.xlane.xlu0 %1935 }
0x14bc   :  { %v1948_v27 = vmul.f32 0.03125, %v1936_v25 }
0x14be   :  { %v6350_v16 = vsub.f32 %v6328_v15, %v1948_v27 }
0x14bf   :  { %v1939_v23 = vpop.xlane.xlu0 %1938 }
0x14c0   :  { %v1949_v9 = vmul.f32 0.03125, %v1939_v23  ;;  %v1960_v34 = vmul.f32 %v6350_v16, %v6350_v16 }
0x14c2   :  { %v6355_v36 = vsub.f32 %v6336_v33, %v1949_v9  ;;  %v1970_v37 = vsel %vm216_vm2, %v1960_v34, 0.0 }
0x14c3   :  { %1971 = vadd.xlane.f32.xlu0 %v1970_v37  ;;  %v1966_v3 = vpop.xlane.xlu0 %1965 }
0x14c4   :  { %v1982_v22 = vmul.f32 0.03125, %v1966_v3  ;;  %v1961_v26 = vmul.f32 %v6355_v36, %v6355_v36 }
0x14c6   :  { %v1988_v35 = vadd.f32 1e-06, %v1982_v22  ;;  %v1973_v14 = vsel %vm216_vm2, %v1961_v26, 0.0 }
0x14c7   :  { %1974 = vadd.xlane.f32.xlu1 %v1973_v14 }
0x14c8   :  { %5500 = vrsqrt.f32 %v1988_v35 }
0x14d5   :  { %v5501_v44 = vpop.eup %5500 }
0x14d6   :  { %v2000_v47 = vmul.f32 %v5501_v44, %v1952_v11 }
0x14d8   :  { %5310 = vrot.lane.b32.xlu1 %v5309_v41, %s7182_s2  ;;  %v2012_v50 = vmul.f32 %v6364_v43, %v2000_v47  ;;  %s7197_s2 = smov 40  }
0x14d9   :  { %5305 = vrot.lane.b32.xlu0 %v5304_v31, %s7184_s22  ;;  %v5378_v31 = vld [vmem:[%s7162_s14 + $0x8] sm:$0xff]   ;;  %s7196_s22 = smov 104  }
0x14da   :  { %v2024_v51 = vadd.f32 %v6370_v46, %v2012_v50  ;;  %4997 = vmatpush3.bf16.msra.mxu0 %v5378_v31 }
0x14db   :  { %4998 = vmatprep.subr.bf16.mxu0 %v5680_v1 }
0x14dc   :  { %5315 = vrot.lane.b32.xlu1 %v5314_v6, %s7180_s23  ;;  %v2030_v53 = vpack.c.bf16 %v2025_v52, %v2024_v51 }
0x14de   :  { %4981 = vmatmul.mubr.msk.bf16.vlgmr.msra.gmra.mxu1 %vm216_vm2, %v2030_v53  ;;  %4999 = vmatpush3.bf16.msra.mxu0 %v5379_v32 }
0x14df   :  { %4984 = vmatprep.mubr.msk.bf16.mxu1 %vm5681_vm0, %v5680_v1 }
0x154c   :  { %v1972_v40 = vpop.xlane.xlu0 %1971 }
0x154d   :  { %v1984_v41 = vmul.f32 0.03125, %v1972_v40 }
0x154f   :  { %v1990_v63 = vadd.f32 1e-06, %v1984_v41 }
0x1550   :  { %v1975_v4 = vpop.xlane.xlu1 %1974  ;;  %v5306_v55 = vpop.permute.xlu0 %5305 }
0x1551   :  { %5502 = vrsqrt.f32 %v1990_v63  ;;  %v1985_v6 = vmul.f32 0.03125, %v1975_v4  ;;  %v5308_v58 = vunpack.i.h.bf16 %v5306_v55  ;;  %v5307_v59 = vunpack.i.l.bf16 %v5306_v55 }
0x1553   :  { %v1991_v56 = vadd.f32 1e-06, %v1985_v6  ;;  %v1816_v11 = vsel %vm416_vm3, %v6139_v45, %v5308_v58  ;;  %v1815_v2 = vsel %vm416_vm3, %v6143_v49, %v5307_v59 }
0x1554   :  { %v5311_v57 = vpop.permute.xlu1 %5310 }
0x1555   :  { %5504 = vrsqrt.f32 %v1991_v56  ;;  %v5313_v12 = vunpack.i.h.bf16 %v5311_v57  ;;  %v5312_v28 = vunpack.i.l.bf16 %v5311_v57 }
0x1557   :  { %v1818_v18 = vsel %vm1110_vm7, %v1815_v2, %v5312_v28  ;;  %v1819_v19 = vsel %vm1110_vm7, %v1816_v11, %v5313_v12 }
0x1558   :  { %v5316_v0 = vpop.permute.xlu1 %5315 }
0x1559   :  { %v5318_v8 = vunpack.i.h.bf16 %v5316_v0  ;;  %v5317_v13 = vunpack.i.l.bf16 %v5316_v0 }
0x155b   :  { %v1821_v62 = vsel %vm477_vm5, %v1818_v18, %v5317_v13  ;;  %v1822_v24 = vsel %vm477_vm5, %v1819_v19, %v5318_v8 }
0x155c   :  { %v1825_v20 = vpack.c.bf16 %v1822_v24, %v1821_v62 }
0x155e   :  { %v5503_v21 = vpop.eup %5502  ;;  %4973 = vmatmul.mubr.msk.bf16.gmra.mxu0 %vm216_vm2, %v1825_v20 }
0x155f   :  { %v2002_v25 = vmul.f32 %v5503_v21, %v6350_v16  ;;  %5000 = vmatprep.mubr.msk.bf16.mxu0 %vm5681_vm0, %v5680_v1  ;;  %v6428_v16 = vld [vmem:[%s7161_s13] ss:$0 sm:$0xff] }
0x1561   :  { %v2014_v27 = vmul.f32 %v6364_v43, %v2002_v25 }
0x1562   :  { %v5505_v45 = vpop.eup %5504 }
0x1563   :  { %v2003_v49 = vmul.f32 %v5505_v45, %v6355_v36  ;;  %v2026_v23 = vadd.f32 %v6370_v46, %v2014_v27 }
0x1565   :  { %v2015_v60 = vmul.f32 %v6364_v43, %v2003_v49 }
0x1567   :  { %v2027_v9 = vadd.f32 %v6370_v46, %v2015_v60 }
0x1569   :  { %v2031_v34 = vpack.c.bf16 %v2027_v9, %v2026_v23 }
0x156b   :  { %4985 = vmatmul.mubr.msk.bf16.gmra.mxu1 %vm216_vm2, %v2031_v34 }
0x156c   :  { %4988 = vmatprep.mubr.msk.bf16.mxu1 %vm5681_vm0, %v5680_v1 }
0x159e   :  { %v2094_v36 = vpop.f32.mrf.mxu1 }
0x159f   :  { %v2095_v37 = vadd.f32 %v6428_v16, %v2094_v36 }
0x15a0   :  { %v4982_v3 = vpop.f32.mrf.mxu1 }
0x15a1   :  { %v2123_v22 = vmul.f32 %v2095_v37, %v2095_v37  ;;  %v2117_v32 = vmul.f32 0.5, %v2095_v37 }
0x15a2   :  { %v2097_v26 = vpop.f32.mrf.mxu1 }
0x15a3   :  { %v2129_v35 = vmul.f32 %v2123_v22, %v2095_v37  ;;  %v2098_v14 = vadd.f32 %v6428_v16, %v2097_v26 }
0x15a4   :  { %v4983_v39 = vpop.f32.mrf.mxu1 }
0x15a5   :  { %v2135_v42 = vmul.f32 0.044715, %v2129_v35  ;;  %v2124_v44 = vmul.f32 %v2098_v14, %v2098_v14  ;;  %v2118_v40 = vmul.f32 0.5, %v2098_v14  ;;  %v6457_v39 = vld [vmem:[%s7163_s15] ss:$0 sm:$0xff] }
0x15a7   :  { %v2141_v47 = vadd.f32 %v2135_v42, %v2095_v37  ;;  %v2130_v10 = vmul.f32 %v2124_v44, %v2098_v14  ;;  %v6462_v42 = vld [vmem:[%s7164_s16] ss:$0 sm:$0xff] }
0x15a9   :  { %v2147_v50 = vmul.f32 0.7978846, %v2141_v47  ;;  %v2136_v51 = vmul.f32 0.044715, %v2130_v10 }
0x15ab   :  { %5506 = vtanh.f32 %v2147_v50  ;;  %v2142_v52 = vadd.f32 %v2136_v51, %v2098_v14 }
0x15ad   :  { %v2148_v53 = vmul.f32 0.7978846, %v2142_v52 }
0x15af   :  { %5508 = vtanh.f32 %v2148_v53 }
0x15b8   :  { %v5507_v61 = vpop.eup %5506 }
0x15b9   :  { %v2159_v29 = vadd.f32 1.0, %v5507_v61 }
0x15bb   :  { %v2165_v63 = vmul.f32 %v2159_v29, %v2117_v32 }
0x15bc   :  { %v5509_v31 = vpop.eup %5508 }
0x15bd   :  { %v2160_v41 = vadd.f32 1.0, %v5509_v31 }
0x15bf   :  { %v2166_v4 = vmul.f32 %v2160_v41, %v2118_v40 }
0x15c1   :  { %v2171_v6 = vpack.c.bf16 %v2166_v4, %v2165_v63 }
0x15c3   :  { %5001 = vmatmul.mubr.msk.bf16.vlgmr.msra.gmra.mxu0 %vm2204_vm8, %v2171_v6 }
0x15c4   :  { %5004 = vmatprep.mubr.msk.bf16.mxu0 %vm5681_vm0, %v5680_v1 }
0x161e   :  { %v1903_v55 = vpop.f32.mrf.mxu0 }
0x161f   :  { %v1904_v56 = vadd.f32 %v6289_v5, %v1903_v55 }
0x1620   :  { %v4974_v57 = vpop.f32.mrf.mxu0 }
0x1621   :  { %v1920_v58 = vmul.f32 %v6296_v7, %v1904_v56 }
0x1622   :  { %v1906_v59 = vpop.f32.mrf.mxu0 }
0x1623   :  { %v6438_v12 = vadd.f32 %v1920_v58, %v5868_v48  ;;  %v1907_v28 = vadd.f32 %v6289_v5, %v1906_v59 }
0x1624   :  { %v4975_v0 = vpop.f32.mrf.mxu0 }
0x1625   :  { %v1921_v11 = vmul.f32 %v6296_v7, %v1907_v28  ;;  %v1940_v2 = vsel %vm216_vm2, %v6438_v12, 0.0 }
0x1626   :  { %1941 = vadd.xlane.f32.xlu1 %v1940_v2 }
0x1627   :  { %v6445_v8 = vadd.f32 %v1921_v11, %v5877_v54 }
0x1629   :  { %v1943_v13 = vsel %vm216_vm2, %v6445_v8, 0.0 }
0x162a   :  { %1944 = vadd.xlane.f32.xlu0 %v1943_v13 }
0x162b   :  { %v2102_v18 = vpop.f32.mrf.mxu1 }
0x162c   :  { %v2103_v48 = vadd.f32 %v6428_v16, %v2102_v18 }
0x162d   :  { %v4986_v19 = vpop.f32.mrf.mxu1 }
0x162e   :  { %v2125_v62 = vmul.f32 %v2103_v48, %v2103_v48  ;;  %v2119_v37 = vmul.f32 0.5, %v2103_v48 }
0x162f   :  { %v2105_v5 = vpop.f32.mrf.mxu1 }
0x1630   :  { %v2131_v24 = vmul.f32 %v2125_v62, %v2103_v48  ;;  %v2106_v7 = vadd.f32 %v6428_v16, %v2105_v5 }
0x1631   :  { %v4987_v20 = vpop.f32.mrf.mxu1 }
0x1632   :  { %v2137_v21 = vmul.f32 0.044715, %v2131_v24  ;;  %v2126_v25 = vmul.f32 %v2106_v7, %v2106_v7  ;;  %v2120_v3 = vmul.f32 0.5, %v2106_v7 }
0x1634   :  { %v2143_v45 = vadd.f32 %v2137_v21, %v2103_v48  ;;  %v2132_v49 = vmul.f32 %v2126_v25, %v2106_v7 }
0x1636   :  { %v2149_v54 = vmul.f32 0.7978846, %v2143_v45  ;;  %v2138_v27 = vmul.f32 0.044715, %v2132_v49 }
0x1638   :  { %5510 = vtanh.f32 %v2149_v54  ;;  %v2144_v60 = vadd.f32 %v2138_v27, %v2106_v7 }
0x163a   :  { %v2150_v23 = vmul.f32 0.7978846, %v2144_v60  ;;  %v5380_v60 = vld [vmem:[%s7153_s5 + $0x18] sm:$0xff]  }
0x163b   :  { %5013 = vmatpush3.bf16.msra.mxu1 %v5380_v60 }
0x163c   :  { %5512 = vtanh.f32 %v2150_v23  ;;  %v5381_v23 = vld [vmem:[%s7153_s5 + $0x10] sm:$0xff]   ;;  %5014 = vmatprep.subr.bf16.mxu1 %v5680_v1  ;;  %s5697_s5 = smov [#allocation2]  }
0x163d   :  { %s4443_s30 = sshll.u32 %s5697_s5, 4  ;;  %s4444_s30 = int_to_ptr.vmem [resolvable:$true] %s4443_s30 }
0x163e   :  { %p5663_p1 = scmp.lt.s32.totalorder %s4444_s30, %s4444_s30 }
0x163f   :  { %5015 = vmatpush3.bf16.msra.mxu1 %v5381_v23 }
0x1645   :  { %v5511_v9 = vpop.eup %5510 }
0x1646   :  { %v2161_v34 = vadd.f32 1.0, %v5511_v9 }
0x1648   :  { %v2167_v26 = vmul.f32 %v2161_v34, %v2119_v37 }
0x1649   :  { %v5513_v36 = vpop.eup %5512 }
0x164a   :  { %v2162_v22 = vadd.f32 1.0, %v5513_v36 }
0x164c   :  { %v2168_v35 = vmul.f32 %v2162_v22, %v2120_v3 }
0x164e   :  { %v2172_v14 = vpack.c.bf16 %v2168_v35, %v2167_v26 }
0x1650   :  { %5005 = vmatmul.mubr.msk.bf16.gmra.mxu0 %vm2204_vm8, %v2172_v14 }
0x1651   :  { %5008 = vmatprep.mubr.msk.bf16.mxu0 %vm5681_vm0, %v5680_v1 }
0x1683   :  { %v2248_v44 = vpop.f32.mrf.mxu0 }
0x1684   :  { %v2249_v47 = vadd.f32 %v6457_v39, %v2248_v44 }
0x1685   :  { %v5002_v10 = vpop.f32.mrf.mxu0 }
0x1686   :  { %v2277_v50 = vmul.f32 %v6462_v42, %v2249_v47 }
0x1687   :  { %v2251_v51 = vpop.f32.mrf.mxu0 }
0x1688   :  { %v6467_v52 = vadd.f32 %v2277_v50, %v6301_v17  ;;  %v2252_v53 = vadd.f32 %v6457_v39, %v2251_v51 }
0x1689   :  { %v5003_v61 = vpop.f32.mrf.mxu0 }
0x168a   :  { %v2278_v29 = vmul.f32 %v6462_v42, %v2252_v53  ;;  %v2333_v31 = vsel %vm216_vm2, %v6467_v52, 0.0 }
0x168b   :  { %2334 = vadd.xlane.f32.xlu0 %v2333_v31 }
0x168c   :  { %v6474_v32 = vadd.f32 %v2278_v29, %v6308_v30 }
0x168e   :  { %v2336_v40 = vsel %vm216_vm2, %v6474_v32, 0.0 }
0x168f   :  { %2337 = vadd.xlane.f32.xlu0 %v2336_v40 }
0x16af   :  { %v1942_v41 = vpop.xlane.xlu1 %1941 }
0x16b0   :  { %v1950_v63 = vmul.f32 0.03125, %v1942_v41 }
0x16b2   :  { %v6480_v55 = vsub.f32 %v6438_v12, %v1950_v63 }
0x16b3   :  { %v1945_v17 = vpop.xlane.xlu0 %1944 }
0x16b4   :  { %v1951_v57 = vmul.f32 0.03125, %v1945_v17  ;;  %v1962_v13 = vmul.f32 %v6480_v55, %v6480_v55 }
0x16b6   :  { %v1957_v18 = vsub.f32 %v6445_v8, %v1951_v57  ;;  %v1976_v7 = vsel %vm216_vm2, %v1962_v13, 0.0 }
0x16b8   :  { %v1963_v45 = vmul.f32 %v1957_v18, %v1957_v18 }
0x16ba   :  { %v1979_v54 = vsel %vm216_vm2, %v1963_v45, 0.0 }
0x1710   :  { %v2256_v4 = vpop.f32.mrf.mxu0 }
0x1711   :  { %v2257_v6 = vadd.f32 %v6457_v39, %v2256_v4 }
0x1712   :  { %v5006_v56 = vpop.f32.mrf.mxu0 }
0x1713   :  { %v2279_v58 = vmul.f32 %v6462_v42, %v2257_v6 }
0x1714   :  { %v2335_v59 = vpop.xlane.xlu0 %2334  ;;  %v2259_v30 = vpop.f32.mrf.mxu0 }
0x1715   :  { %v6484_v28 = vadd.f32 %v2279_v58, %v6328_v15  ;;  %v2351_v0 = vmul.f32 0.03125, %v2335_v59  ;;  %v2260_v11 = vadd.f32 %v6457_v39, %v2259_v30 }
0x1716   :  { %v5007_v2 = vpop.f32.mrf.mxu0 }
0x1717   :  { %v6491_v48 = vsub.f32 %v6467_v52, %v2351_v0  ;;  %v2280_v19 = vmul.f32 %v6462_v42, %v2260_v11  ;;  %v2339_v62 = vsel %vm216_vm2, %v6484_v28, 0.0 }
0x1718   :  { %v2338_v5 = vpop.xlane.xlu0 %2337  ;;  %2340 = vadd.xlane.f32.xlu1 %v2339_v62  ;;  %v6528_v62 = vld [vmem:[%s7193_s21 + $0x1] ss:$0 sm:$0xff] }
0x1719   :  { %v6497_v15 = vadd.f32 %v2280_v19, %v6336_v33  ;;  %v2352_v24 = vmul.f32 0.03125, %v2338_v5  ;;  %v2363_v25 = vmul.f32 %v6491_v48, %v6491_v48 }
0x171b   :  { %v2358_v20 = vsub.f32 %v6474_v32, %v2352_v24  ;;  %v2342_v21 = vsel %vm216_vm2, %v6497_v15, 0.0  ;;  %v2369_v49 = vsel %vm216_vm2, %v2363_v25, 0.0 }
0x171c   :  { %1977 = vadd.xlane.f32.xlu1 %v1976_v7  ;;  %2343 = vadd.xlane.f32.xlu0 %v2342_v21 }
0x171d   :  { %v2364_v33 = vmul.f32 %v2358_v20, %v2358_v20 }
0x171f   :  { %v2372_v27 = vsel %vm216_vm2, %v2364_v33, 0.0 }
0x1720   :  { %2370 = vadd.xlane.f32.xlu1 %v2369_v49  ;;  %1980 = vadd.xlane.f32.xlu0 %v1979_v54 }
0x1724   :  { %2373 = vadd.xlane.f32.xlu0 %v2372_v27 }
0x17a1   :  { %v2341_v9 = vpop.xlane.xlu1 %2340 }
0x17a2   :  { %v2353_v34 = vmul.f32 0.03125, %v2341_v9 }
0x17a4   :  { %v2359_v36 = vsub.f32 %v6484_v28, %v2353_v34 }
0x17a5   :  { %v1978_v37 = vpop.xlane.xlu1 %1977  ;;  %v2344_v3 = vpop.xlane.xlu0 %2343 }
0x17a6   :  { %v1986_v22 = vmul.f32 0.03125, %v1978_v37  ;;  %v2354_v26 = vmul.f32 0.03125, %v2344_v3  ;;  %v2365_v35 = vmul.f32 %v2359_v36, %v2359_v36 }
0x17a8   :  { %v1992_v14 = vadd.f32 1e-06, %v1986_v22  ;;  %v2360_v44 = vsub.f32 %v6497_v15, %v2354_v26  ;;  %v2375_v47 = vsel %vm216_vm2, %v2365_v35, 0.0 }
0x17a9   :  { %2376 = vadd.xlane.f32.xlu1 %v2375_v47  ;;  %v2371_v10 = vpop.xlane.xlu1 %2370  ;;  %v1981_v50 = vpop.xlane.xlu0 %1980 }
0x17aa   :  { %5514 = vrsqrt.f32 %v1992_v14  ;;  %v2387_v51 = vmul.f32 0.03125, %v2371_v10  ;;  %v1987_v53 = vmul.f32 0.03125, %v1981_v50  ;;  %v2366_v61 = vmul.f32 %v2360_v44, %v2360_v44 }
0x17ac   :  { %v1993_v29 = vadd.f32 1e-06, %v1987_v53  ;;  %v2378_v31 = vsel %vm216_vm2, %v2366_v61, 0.0  ;;  %v2393_v40 = vadd.f32 1e-06, %v2387_v51 }
0x17ad   :  { %2379 = vadd.xlane.f32.xlu0 %v2378_v31  ;;  %v2374_v41 = vpop.xlane.xlu0 %2373  ;;  %v6557_v31 = vld [vmem:[%s7154_s6 + $0x1] ss:$0 sm:$0xff]  ;;  %s7194_s6 = smov 48  }
0x17ae   :  { %v2388_v63 = vmul.f32 0.03125, %v2374_v41  ;;  %5516 = vrsqrt.f32 %v1993_v29 }
0x17af   :  { %5518 = vrsqrt.f32 %v2393_v40 }
0x17b0   :  { %v2394_v17 = vadd.f32 1e-06, %v2388_v63 }
0x17b2   :  { %5520 = vrsqrt.f32 %v2394_v17 }
0x17b7   :  { %v5515_v4 = vpop.eup %5514 }
0x17b8   :  { %v2004_v6 = vmul.f32 %v5515_v4, %v6480_v55 }
0x17ba   :  { %v2016_v58 = vmul.f32 %v6364_v43, %v2004_v6 }
0x17bb   :  { %v5517_v56 = vpop.eup %5516 }
0x17bc   :  { %v2005_v57 = vmul.f32 %v5517_v56, %v1957_v18  ;;  %v5519_v59 = vpop.eup %5518  ;;  %v2028_v13 = vadd.f32 %v6370_v46, %v2016_v58 }
0x17bd   :  { %v2405_v2 = vmul.f32 %v5519_v59, %v6491_v48 }
0x17be   :  { %v2017_v0 = vmul.f32 %v6364_v43, %v2005_v57  ;;  %v6538_v43 = vld [vmem:[%s7152_s4 + $0x1] ss:$0 sm:$0xff] }
0x17bf   :  { %v5521_v30 = vpop.eup %5520  ;;  %v2417_v5 = vmul.f32 %v6528_v62, %v2405_v2 }
0x17c0   :  { %v2406_v11 = vmul.f32 %v5521_v30, %v2358_v20  ;;  %v2029_v19 = vadd.f32 %v6370_v46, %v2017_v0 }
0x17c1   :  { %v2429_v48 = vadd.f32 %v6538_v43, %v2417_v5 }
0x17c2   :  { %v2418_v55 = vmul.f32 %v6528_v62, %v2406_v11  ;;  %v2032_v18 = vpack.c.bf16 %v2029_v19, %v2028_v13 }
0x17c4   :  { %4989 = vmatmul.mubr.msk.bf16.gmra.mxu1 %vm216_vm2, %v2032_v18  ;;  %v2430_v46 = vadd.f32 %v6538_v43, %v2418_v55 }
0x17c5   :  { %5016 = vmatprep.mubr.msk.bf16.mxu1 %vm5681_vm0, %v5680_v1 }
0x17c6   :  { %v2435_v24 = vpack.c.bf16 %v2430_v46, %v2429_v48 }
0x17cc   :  { %5017 = vmatmul.mubr.msk.bf16.vlgmr.msra.gmra.mxu1 %vm216_vm2, %v2435_v24 }
0x17cd   :  { %5020 = vmatprep.mubr.msk.bf16.mxu1 %vm5681_vm0, %v5680_v1 }
0x1832   :  { %v2377_v7 = vpop.xlane.xlu1 %2376 }
0x1833   :  { %v2389_v20 = vmul.f32 0.03125, %v2377_v7 }
0x1835   :  { %v2395_v21 = vadd.f32 1e-06, %v2389_v20 }
0x1836   :  { %v2380_v25 = vpop.xlane.xlu0 %2379 }
0x1837   :  { %5522 = vrsqrt.f32 %v2395_v21  ;;  %v2390_v45 = vmul.f32 0.03125, %v2380_v25 }
0x1839   :  { %v2396_v49 = vadd.f32 1e-06, %v2390_v45 }
0x183b   :  { %5524 = vrsqrt.f32 %v2396_v49 }
0x1844   :  { %v5523_v54 = vpop.eup %5522 }
0x1845   :  { %v2407_v33 = vmul.f32 %v5523_v54, %v2359_v36 }
0x1847   :  { %v2419_v23 = vmul.f32 %v6528_v62, %v2407_v33 }
0x1848   :  { %v5525_v27 = vpop.eup %5524 }
0x1849   :  { %v2408_v60 = vmul.f32 %v5525_v27, %v2360_v44  ;;  %v2431_v34 = vadd.f32 %v6538_v43, %v2419_v23 }
0x184b   :  { %v2420_v9 = vmul.f32 %v6528_v62, %v2408_v60 }
0x184d   :  { %v2432_v37 = vadd.f32 %v6538_v43, %v2420_v9 }
0x184f   :  { %v2436_v3 = vpack.c.bf16 %v2432_v37, %v2431_v34 }
0x1851   :  { %5021 = vmatmul.mubr.msk.bf16.gmra.mxu1 %vm216_vm2, %v2436_v3 }
0x1852   :  { %5024 = vmatprep.mubr.msk.bf16.mxu1 %vm5681_vm0, %v5680_v1 }
0x1884   :  { %v2110_v22 = vpop.f32.mrf.mxu1 }
0x1885   :  { %v2111_v26 = vadd.f32 %v6428_v16, %v2110_v22 }
0x1886   :  { %v4990_v36 = vpop.f32.mrf.mxu1 }
0x1887   :  { %v2127_v35 = vmul.f32 %v2111_v26, %v2111_v26  ;;  %v2121_v11 = vmul.f32 0.5, %v2111_v26 }
0x1888   :  { %v2113_v14 = vpop.f32.mrf.mxu1 }
0x1889   :  { %v2133_v44 = vmul.f32 %v2127_v35, %v2111_v26  ;;  %v2114_v47 = vadd.f32 %v6428_v16, %v2113_v14 }
0x188a   :  { %v4991_v10 = vpop.f32.mrf.mxu1 }
0x188b   :  { %v2139_v50 = vmul.f32 0.044715, %v2133_v44  ;;  %v2128_v51 = vmul.f32 %v2114_v47, %v2114_v47  ;;  %v2122_v2 = vmul.f32 0.5, %v2114_v47 }
0x188c   :  { %v2499_v53 = vpop.f32.mrf.mxu1 }
0x188d   :  { %v2145_v61 = vadd.f32 %v2139_v50, %v2111_v26  ;;  %v2134_v29 = vmul.f32 %v2128_v51, %v2114_v47  ;;  %v2500_v6 = vadd.f32 %v6557_v31, %v2499_v53 }
0x188e   :  { %v5018_v40 = vpop.f32.mrf.mxu1 }
0x188f   :  { %v2151_v41 = vmul.f32 0.7978846, %v2145_v61  ;;  %v2140_v63 = vmul.f32 0.044715, %v2134_v29 }
0x1890   :  { %v2502_v17 = vpop.f32.mrf.mxu1 }
0x1891   :  { %5526 = vtanh.f32 %v2151_v41  ;;  %v2146_v4 = vadd.f32 %v2140_v63, %v2114_v47  ;;  %v2503_v16 = vadd.f32 %v6557_v31, %v2502_v17 }
0x1892   :  { %v5019_v56 = vpop.f32.mrf.mxu1 }
0x1893   :  { %v2152_v57 = vmul.f32 0.7978846, %v2146_v4  ;;  %v6561_v58 = vpack.c.bf16 %v2503_v16, %v2500_v6 }
0x1895   :  { %5528 = vtanh.f32 %v2152_v57  ;;  %2527 = vrot.lane.b32.xlu0 %v6561_v58, %s5682_s24 }
0x189e   :  { %v5527_v59 = vpop.eup %5526 }
0x189f   :  { %v2163_v30 = vadd.f32 1.0, %v5527_v59 }
0x18a1   :  { %v2169_v19 = vmul.f32 %v2163_v30, %v2121_v11 }
0x18a2   :  { %v5529_v0 = vpop.eup %5528 }
0x18a3   :  { %v2164_v13 = vadd.f32 1.0, %v5529_v0 }
0x18a5   :  { %v2170_v55 = vmul.f32 %v2164_v13, %v2122_v2 }
0x18a7   :  { %v2173_v18 = vpack.c.bf16 %v2170_v55, %v2169_v19 }
0x18a9   :  { %5009 = vmatmul.mubr.msk.bf16.gmra.mxu0 %vm2204_vm8, %v2173_v18 }
0x18aa   :  { %5032 = vmatprep.mubr.msk.bf16.mxu0 %vm416_vm3, %v6561_v58 }
0x1911   :  { %v2507_v5 = vpop.f32.mrf.mxu1 }
0x1912   :  { %v2508_v24 = vadd.f32 %v6557_v31, %v2507_v5 }
0x1913   :  { %v5022_v46 = vpop.f32.mrf.mxu1 }
0x1915   :  { %v2510_v48 = vpop.f32.mrf.mxu1 }
0x1916   :  { %v2511_v7 = vadd.f32 %v6557_v31, %v2510_v48 }
0x1917   :  { %v5023_v20 = vpop.f32.mrf.mxu1 }
0x1918   :  { %v6570_v21 = vpack.c.bf16 %v2511_v7, %v2508_v24 }
0x191a   :  { %2690 = vrot.lane.b32.xlu0 %v6570_v21, %s5684_s3  ;;  %2529 = vrot.lane.b32.xlu1 %v6570_v21, %s5682_s24 }
0x191e   :  { %2694 = vrot.lane.b32.xlu1 %v6570_v21, %s5683_s25 }
0x1922   :  { %2692 = vrot.lane.b32.xlu1 %v6561_v58, %s5683_s25 }
0x1926   :  { %2688 = vrot.lane.b32.xlu1 %v6561_v58, %s5684_s3 }
0x1969   :  { %v2264_v25 = vpop.f32.mrf.mxu0 }
0x196a   :  { %v2265_v45 = vadd.f32 %v6457_v39, %v2264_v25 }
0x196b   :  { %v5010_v49 = vpop.f32.mrf.mxu0 }
0x196c   :  { %v2281_v54 = vmul.f32 %v6462_v42, %v2265_v45 }
0x196d   :  { %v2267_v33 = vpop.f32.mrf.mxu0 }
0x196e   :  { %v6585_v27 = vadd.f32 %v2281_v54, %v6438_v12  ;;  %v2268_v60 = vadd.f32 %v6457_v39, %v2267_v33  ;;  %v2528_v39 = vpop.permute.xlu0 %2527 }
0x196f   :  { %v5011_v23 = vpop.f32.mrf.mxu0  ;;  %v2538_v26 = vsel %vm416_vm3, %v2528_v39, 0 }
0x1970   :  { %v2282_v9 = vmul.f32 %v6462_v42, %v2268_v60  ;;  %v2345_v34 = vsel %vm216_vm2, %v6585_v27, 0.0 }
0x1971   :  { %2346 = vadd.xlane.f32.xlu1 %v2345_v34 }
0x1972   :  { %v6592_v37 = vadd.f32 %v2282_v9, %v6445_v8 }
0x1974   :  { %v2348_v3 = vsel %vm216_vm2, %v6592_v37, 0.0 }
0x1975   :  { %2349 = vadd.xlane.f32.xlu0 %v2348_v3 }
0x198c   :  { %v2530_v22 = vpop.permute.xlu1 %2529  ;;  %v2691_v44 = vpop.permute.xlu0 %2690 }
0x198d   :  { %5232 = vmatprep.subr.msk.bf16.mxu0 %vm416_vm3, %v2530_v22  ;;  %v2541_v12 = vsel %vm416_vm3, %v2530_v22, 0 }
0x198e   :  { %5029 = vmatpush3.bf16.xpose.msra.mxu0 %v2541_v12 }
0x198f   :  { %5233 = vmatprep.subr.msk.bf16.mxu0 %vm416_vm3, %v2528_v39 }
0x1990   :  { %v2695_v42 = vpop.permute.xlu1 %2694 }
0x1991   :  { %v2706_v35 = vsel %vm416_vm3, %v2695_v42, 0 }
0x1994   :  { %v2693_v36 = vpop.permute.xlu1 %2692 }
0x1995   :  { %v2703_v14 = vsel %vm416_vm3, %v2693_v36, 0 }
0x1996   :  { %5031 = vmatpush3.bf16.xpose.msra.mxu0 %v2538_v26 }
0x1997   :  { %5235 = vmatprep.subr.msk.bf16.mxu0 %vm416_vm3, %v2695_v42 }
0x1998   :  { %v2689_v8 = vpop.permute.xlu1 %2688 }
0x199d   :  { %5033 = vmatmul.mubr.msk.bf16.vlgmr.msra.gmra.mxu0 %vm416_vm3, %v6570_v21 }
0x199e   :  { %5045 = vmatpush3.bf16.xpose.msra.mxu0 %v2706_v35  ;;  %5048 = vmatprep.mubr.msk.bf16.mxu0 %vm416_vm3, %v2689_v8 }
0x199f   :  { %5236 = vmatprep.subr.msk.bf16.mxu0 %vm416_vm3, %v2693_v36 }
0x19a6   :  { %5047 = vmatpush3.bf16.xpose.msra.mxu0 %v2703_v14 }
0x19ad   :  { %5049 = vmatmul.mubr.msk.bf16.vlgmr.msra.gmra.mxu0 %vm416_vm3, %v2691_v44 }
0x19fa   :  { %v2347_v47 = vpop.xlane.xlu1 %2346 }
0x19fb   :  { %v2355_v10 = vmul.f32 0.03125, %v2347_v47 }
0x19fd   :  { %v6609_v50 = vsub.f32 %v6585_v27, %v2355_v10 }
0x19fe   :  { %v2350_v57 = vpop.xlane.xlu0 %2349 }
0x19ff   :  { %v2367_v41 = vmul.f32 %v6609_v50, %v6609_v50  ;;  %v2356_v30 = vmul.f32 0.03125, %v2350_v57 }
0x1a01   :  { %v2381_v16 = vsel %vm216_vm2, %v2367_v41, 0.0  ;;  %v6622_v13 = vsub.f32 %v6592_v37, %v2356_v30 }
0x1a03   :  { %v2368_v24 = vmul.f32 %v6622_v13, %v6622_v13 }
0x1a05   :  { %v2384_v7 = vsel %vm216_vm2, %v2368_v24, 0.0 }
0x1a5d   :  { %v5034_v51 = vpop.f32.mrf.mxu0 }
0x1a5e   :  { %v2586_v53 = vadd.f32 %v5034_v51, %v5946_v38 }
0x1a5f   :  { %v2577_v61 = vpop.f32.mrf.mxu0 }
0x1a60   :  { %v2578_v29 = vadd.f32 %v2577_v61, %v5946_v38  ;;  %v2597_v40 = vsel %vm477_vm5, %v2586_v53, -inf }
0x1a61   :  { %2598 = vmax.xlane.f32.xlu1 %v2597_v40  ;;  %v5035_v63 = vpop.f32.mrf.mxu0 }
0x1a62   :  { %v2591_v17 = vsel %vm477_vm5, %v2578_v29, -inf }
0x1a63   :  { %v2580_v4 = vpop.f32.mrf.mxu0  ;;  %2592 = vmax.xlane.f32.xlu0 %v2591_v17 }
0x1a64   :  { %v2581_v6 = vadd.f32 %v2580_v4, %v5946_v38 }
0x1a65   :  { %2382 = vadd.xlane.f32.xlu1 %v2381_v16 }
0x1a66   :  { %v2594_v56 = vsel %vm477_vm5, %v2581_v6, -inf }
0x1a67   :  { %2595 = vmax.xlane.f32.xlu0 %v2594_v56 }
0x1a6d   :  { %v5050_v59 = vpop.f32.mrf.mxu0 }
0x1a6e   :  { %v2751_v19 = vadd.f32 %v5050_v59, %v5946_v38 }
0x1a6f   :  { %v2742_v0 = vpop.f32.mrf.mxu0 }
0x1a70   :  { %v2743_v11 = vadd.f32 %v2742_v0, %v5946_v38  ;;  %v2762_v48 = vsel %vm477_vm5, %v2751_v19, -inf }
0x1a71   :  { %v5051_v2 = vpop.f32.mrf.mxu0 }
0x1a72   :  { %v2756_v55 = vsel %vm477_vm5, %v2743_v11, -inf }
0x1a73   :  { %v2745_v18 = vpop.f32.mrf.mxu0  ;;  %2757 = vmax.xlane.f32.xlu0 %v2756_v55 }
0x1a74   :  { %v6627_v5 = vadd.f32 %v2745_v18, %v5946_v38 }
0x1a76   :  { %v2759_v46 = vsel %vm477_vm5, %v6627_v5, -inf }
0x1a77   :  { %2760 = vmax.xlane.f32.xlu1 %v2759_v46  ;;  %2763 = vmax.xlane.f32.xlu0 %v2762_v48 }
0x1a7b   :  { %2385 = vadd.xlane.f32.xlu0 %v2384_v7 }
0x1a88   :  { %2628 = vrot.lane.b32.xlu1 %v6570_v21, %s5686_s26 }
0x1aea   :  { %v2599_v20 = vpop.xlane.xlu1 %2598 }
0x1aeb   :  { %v2602_v25 = vsub.f32 %v2586_v53, %v2599_v20 }
0x1aec   :  { %v2593_v45 = vpop.xlane.xlu0 %2592 }
0x1aed   :  { %v2607_v49 = vmul.f32 1.442695, %v2602_v25  ;;  %v2600_v54 = vsub.f32 %v2578_v29, %v2593_v45 }
0x1aee   :  { %v2383_v34 = vpop.xlane.xlu1 %2382 }
0x1aef   :  { %5530 = vpow2.f32 %v2607_v49  ;;  %v2603_v33 = vmul.f32 1.442695, %v2600_v54  ;;  %v2391_v3 = vmul.f32 0.03125, %v2383_v34 }
0x1af0   :  { %v2596_v60 = vpop.xlane.xlu0 %2595 }
0x1af1   :  { %5532 = vpow2.f32 %v2603_v33  ;;  %v2601_v23 = vsub.f32 %v2581_v6, %v2596_v60  ;;  %v2397_v26 = vadd.f32 1e-06, %v2391_v3 }
0x1af3   :  { %v2605_v9 = vmul.f32 1.442695, %v2601_v23 }
0x1af5   :  { %5534 = vpow2.f32 %v2605_v9 }
0x1af6   :  { %5536 = vrsqrt.f32 %v2397_v26 }
0x1afc   :  { %v6637_v22 = vpop.eup %5530  ;;  %v2758_v12 = vpop.xlane.xlu0 %2757 }
0x1afd   :  { %v2615_v39 = vsel %vm477_vm5, %v6637_v22, 0.0  ;;  %v2765_v36 = vsub.f32 %v2743_v11, %v2758_v12 }
0x1afe   :  { %v5533_v42 = vpop.eup %5532  ;;  %2616 = vadd.xlane.f32.xlu1 %v2615_v39 }
0x1aff   :  { %v2609_v44 = vsel %vm477_vm5, %v5533_v42, 0.0  ;;  %v2768_v53 = vmul.f32 1.442695, %v2765_v36 }
0x1b00   :  { %v2761_v8 = vpop.xlane.xlu1 %2760  ;;  %v2764_v35 = vpop.xlane.xlu0 %2763 }
0x1b01   :  { %v2767_v14 = vsub.f32 %v2751_v19, %v2764_v35  ;;  %v2766_v55 = vsub.f32 %v6627_v5, %v2761_v8 }
0x1b02   :  { %v5535_v47 = vpop.eup %5534  ;;  %2610 = vadd.xlane.f32.xlu1 %v2609_v44 }
0x1b03   :  { %v2772_v10 = vmul.f32 1.442695, %v2767_v14  ;;  %v2612_v51 = vsel %vm477_vm5, %v5535_v47, 0.0  ;;  %v5537_v17 = vpop.eup %5536  ;;  %v2770_v18 = vmul.f32 1.442695, %v2766_v55 }
0x1b04   :  { %v2629_v61 = vpop.permute.xlu1 %2628  ;;  %2613 = vadd.xlane.f32.xlu0 %v2612_v51  ;;  %v2386_v29 = vpop.xlane.xlu0 %2385  ;;  %v2409_v6 = vmul.f32 %v5537_v17, %v6609_v50 }
0x1b05   :  { %v2392_v40 = vmul.f32 0.03125, %v2386_v29  ;;  %5234 = vmatprep.subr.msk.bf16.mxu1 %vm524_vm6, %v2629_v61  ;;  %v2638_v41 = vsel %vm524_vm6, %v2629_v61, 0  ;;  %5538 = vpow2.f32 %v2772_v10 }
0x1b06   :  { %5037 = vmatpush3.bf16.msra.mxu1 %v2638_v41  ;;  %5540 = vpow2.f32 %v2768_v53  ;;  %v2421_v30 = vmul.f32 %v6528_v62, %v2409_v6 }
0x1b07   :  { %v2398_v63 = vadd.f32 1e-06, %v2392_v40 }
0x1b08   :  { %v2433_v50 = vadd.f32 %v6538_v43, %v2421_v30 }
0x1b09   :  { %5542 = vrsqrt.f32 %v2398_v63 }
0x1b0a   :  { %5544 = vpow2.f32 %v2770_v18 }
0x1b12   :  { %v6645_v4 = vpop.eup %5538 }
0x1b13   :  { %2793 = vrot.lane.b32.xlu1 %v6570_v21, %s5687_s27  ;;  %v2780_v16 = vsel %vm477_vm5, %v6645_v4, 0.0  ;;  %v5541_v56 = vpop.eup %5540 }
0x1b14   :  { %2781 = vadd.xlane.f32.xlu0 %v2780_v16  ;;  %v2774_v0 = vsel %vm477_vm5, %v5541_v56, 0.0 }
0x1b16   :  { %v5543_v57 = vpop.eup %5542 }
0x1b17   :  { %2791 = vrot.lane.b32.xlu1 %v6561_v58, %s5687_s27  ;;  %v2410_v59 = vmul.f32 %v5543_v57, %v6622_v13  ;;  %v5545_v13 = vpop.eup %5544 }
0x1b18   :  { %2775 = vadd.xlane.f32.xlu0 %v2774_v0 }
0x1b19   :  { %v2422_v11 = vmul.f32 %v6528_v62, %v2410_v59  ;;  %v2777_v62 = vsel %vm477_vm5, %v5545_v13, 0.0 }
0x1b1b   :  { %v2434_v2 = vadd.f32 %v6538_v43, %v2422_v11 }
0x1b1d   :  { %v2437_v19 = vpack.c.bf16 %v2434_v2, %v2433_v50 }
0x1b1f   :  { %5025 = vmatmul.mubr.msk.bf16.gmra.mxu1 %vm216_vm2, %v2437_v19 }
0x1b2e   :  { %2626 = vrot.lane.b32.xlu0 %v6561_v58, %s5686_s26 }
0x1b32   :  { %2857 = vrot.lane.b32.xlu0 %v6561_v58, %s5688_s28 }
0x1b36   :  { %2855 = vrot.lane.b32.xlu0 %v6570_v21, %s5689_s29 }
0x1b3b   :  { %2778 = vadd.xlane.f32.xlu1 %v2777_v62 }
0x1b4c   :  { %2859 = vrot.lane.b32.xlu1 %v6570_v21, %s5688_s28 }
0x1b50   :  { %2853 = vrot.lane.b32.xlu1 %v6561_v58, %s5689_s29 }
0x1b87   :  { %v2617_v43 = vpop.xlane.xlu1 %2616 }
0x1b8b   :  { %v2611_v5 = vpop.xlane.xlu1 %2610 }
0x1b8c   :  { %5546 = vrcp.f32 %v2611_v5 }
0x1b8d   :  { %v2614_v46 = vpop.xlane.xlu0 %2613 }
0x1b8e   :  { %5548 = vrcp.f32 %v2614_v46 }
0x1b8f   :  { %5550 = vrcp.f32 %v2617_v43  ;;  %v2794_v60 = vpop.permute.xlu1 %2793 }
0x1b90   :  { %v2803_v34 = vsel %vm524_vm6, %v2794_v60, 0 }
0x1b93   :  { %v2792_v3 = vpop.permute.xlu1 %2791 }
0x1b99   :  { %v5547_v48 = vpop.eup %5546 }
0x1b9a   :  { %v2621_v7 = vmul.f32 %v5547_v48, %v5533_v42 }
0x1b9b   :  { %v5549_v24 = vpop.eup %5548 }
0x1b9c   :  { %v2622_v20 = vmul.f32 %v5549_v24, %v5535_v47  ;;  %v5551_v49 = vpop.eup %5550 }
0x1b9d   :  { %v2782_v25 = vpop.xlane.xlu0 %2781  ;;  %v2623_v33 = vmul.f32 %v5551_v49, %v6637_v22 }
0x1b9e   :  { %v2624_v45 = vpack.c.bf16 %v2622_v20, %v2621_v7  ;;  %5552 = vrcp.f32 %v2782_v25 }
0x1b9f   :  { %v2625_v9 = vpack.c.bf16 %v2623_v33, %v2623_v33 }
0x1ba0   :  { %5040 = vmatprep.mubr.msk.bf16.mxu1 %vm477_vm5, %v2624_v45 }
0x1ba1   :  { %v2776_v54 = vpop.xlane.xlu0 %2775 }
0x1ba2   :  { %5554 = vrcp.f32 %v2776_v54 }
0x1ba5   :  { %v2627_v23 = vpop.permute.xlu0 %2626 }
0x1ba6   :  { %5038 = vmatprep.subr.bf16.mxu1 %v2627_v23 }
0x1ba7   :  { %5039 = vmatpush3.bf16.msra.mxu1 %v2627_v23 }
0x1ba8   :  { %5237 = vmatprep.subr.msk.bf16.mxu1 %vm524_vm6, %v2794_v60 }
0x1ba9   :  { %v2858_v51 = vpop.permute.xlu0 %2857 }
0x1baa   :  { %5041 = vmatmul.mubr.msk.bf16.vlgmr.msra.gmra.mxu1 %vm477_vm5, %v2625_v9  ;;  %v2868_v61 = vsel %vm416_vm3, %v2858_v51, 0 }
0x1bab   :  { %5053 = vmatpush3.bf16.msra.mxu1 %v2803_v34  ;;  %v5553_v39 = vpop.eup %5552 }
0x1bac   :  { %5054 = vmatprep.subr.bf16.mxu1 %v2792_v3  ;;  %v2788_v36 = vmul.f32 %v5553_v39, %v6645_v4 }
0x1bad   :  { %v2856_v6 = vpop.permute.xlu0 %2855 }
0x1bae   :  { %v2790_v44 = vpack.c.bf16 %v2788_v36, %v2788_v36 }
0x1baf   :  { %5055 = vmatpush3.bf16.msra.mxu1 %v2792_v3  ;;  %v5555_v42 = vpop.eup %5554 }
0x1bb0   :  { %v2786_v8 = vmul.f32 %v5555_v42, %v5541_v56 }
0x1bc4   :  { %v2779_v12 = vpop.xlane.xlu1 %2778 }
0x1bc5   :  { %5556 = vrcp.f32 %v2779_v12 }
0x1bc8   :  { %v2860_v22 = vpop.permute.xlu1 %2859 }
0x1bc9   :  { %5238 = vmatprep.subr.msk.bf16.mxu1 %vm416_vm3, %v2860_v22  ;;  %v2871_v47 = vsel %vm416_vm3, %v2860_v22, 0 }
0x1bcc   :  { %v2854_v10 = vpop.permute.xlu1 %2853 }
0x1bd2   :  { %v5557_v26 = vpop.eup %5556 }
0x1bd3   :  { %v2787_v35 = vmul.f32 %v5557_v26, %v5545_v13 }
0x1bd5   :  { %v2789_v14 = vpack.c.bf16 %v2787_v35, %v2786_v8 }
0x1bd7   :  { %5056 = vmatprep.mubr.msk.bf16.mxu1 %vm477_vm5, %v2789_v14 }
0x1bd8   :  { %5057 = vmatmul.mubr.msk.bf16.vlgmr.msra.gmra.mxu1 %vm477_vm5, %v2790_v44 }
0x1bd9   :  { %5061 = vmatpush3.bf16.xpose.msra.mxu1 %v2871_v47  ;;  %5064 = vmatprep.mubr.msk.bf16.mxu1 %vm416_vm3, %v2854_v10 }
0x1bda   :  { %5239 = vmatprep.subr.msk.bf16.mxu1 %vm416_vm3, %v2858_v51 }
0x1bdf   :  { %v2515_v53 = vpop.f32.mrf.mxu1 }
0x1be0   :  { %v6687_v41 = vadd.f32 %v6557_v31, %v2515_v53 }
0x1be1   :  { %5063 = vmatpush3.bf16.xpose.msra.mxu1 %v2868_v61  ;;  %v5026_v29 = vpop.f32.mrf.mxu1 }
0x1be3   :  { %v2518_v40 = vpop.f32.mrf.mxu1 }
0x1be4   :  { %v6690_v63 = vadd.f32 %v6557_v31, %v2518_v40 }
0x1be5   :  { %v5027_v17 = vpop.f32.mrf.mxu1 }
0x1be6   :  { %v2524_v4 = vpack.c.bf16 %v6690_v63, %v6687_v41 }
0x1be8   :  { %5065 = vmatmul.mubr.msk.bf16.vlgmr.msra.gmra.mxu1 %vm416_vm3, %v2856_v6 }
0x1c6a   :  { %v6695_v16 = vpop.f32.mrf.mxu1 }
0x1c6c   :  { %v6697_v56 = vpop.f32.mrf.mxu1 }
0x1c6e   :  { %v5043_v57 = vpop.f32.mrf.mxu1 }
0x1c70   :  { %v6699_v59 = vpop.f32.mrf.mxu1 }
0x1c98   :  { %v6701_v30 = vpop.f32.mrf.mxu1 }
0x1c9a   :  { %v6703_v0 = vpop.f32.mrf.mxu1 }
0x1c9c   :  { %v5059_v31 = vpop.f32.mrf.mxu1 }
0x1c9e   :  { %v6705_v11 = vpop.f32.mrf.mxu1 }
0x1c9f   :  { %v5319_v50 = vpack.i.bf16 %v6705_v11, %v6703_v0 }
0x1ca8   :  { %v5066_v2 = vpop.f32.mrf.mxu1 }
0x1ca9   :  { %v2916_v5 = vadd.f32 %v5066_v2, %v5946_v38 }
0x1caa   :  { %v2907_v19 = vpop.f32.mrf.mxu1 }
0x1cab   :  { %v2908_v55 = vadd.f32 %v2907_v19, %v5946_v38  ;;  %v2927_v48 = vsel %vm477_vm5, %v2916_v5, -inf }
0x1cac   :  { %v5067_v18 = vpop.f32.mrf.mxu1 }
0x1cad   :  { %v2921_v13 = vsel %vm477_vm5, %v2908_v55, -inf }
0x1cae   :  { %v2910_v62 = vpop.f32.mrf.mxu1  ;;  %2922 = vmax.xlane.f32.xlu1 %v2921_v13 }
0x1caf   :  { %v2911_v43 = vadd.f32 %v2910_v62, %v5946_v38 }
0x1cb1   :  { %v2924_v46 = vsel %vm477_vm5, %v2911_v43, -inf }
0x1cb2   :  { %2925 = vmax.xlane.f32.xlu0 %v2924_v46 }
0x1cb6   :  { %2928 = vmax.xlane.f32.xlu0 %v2927_v48 }
0x1cbf   :  { %2958 = vrot.lane.b32.xlu1 %v6570_v21, %s7194_s6 }
0x1d37   :  { %v2923_v24 = vpop.xlane.xlu1 %2922 }
0x1d38   :  { %v2930_v49 = vsub.f32 %v2908_v55, %v2923_v24 }
0x1d3a   :  { %v2933_v23 = vmul.f32 1.442695, %v2930_v49 }
0x1d3b   :  { %v2926_v7 = vpop.xlane.xlu0 %2925  ;;  %v2959_v20 = vpop.permute.xlu1 %2958 }
0x1d3c   :  { %v2931_v25 = vsub.f32 %v2911_v43, %v2926_v7  ;;  %v2968_v45 = vsel %vm524_vm6, %v2959_v20, 0  ;;  %5240 = vmatprep.subr.msk.bf16.mxu0 %vm524_vm6, %v2959_v20 }
0x1d3d   :  { %5069 = vmatpush3.bf16.msra.mxu0 %v2968_v45 }
0x1d3e   :  { %v2935_v54 = vmul.f32 1.442695, %v2931_v25 }
0x1d3f   :  { %v2929_v33 = vpop.xlane.xlu0 %2928 }
0x1d40   :  { %5558 = vpow2.f32 %v2935_v54  ;;  %v2932_v60 = vsub.f32 %v2916_v5, %v2929_v33 }
0x1d42   :  { %v2937_v9 = vmul.f32 1.442695, %v2932_v60 }
0x1d44   :  { %5560 = vpow2.f32 %v2937_v9 }
0x1d45   :  { %5562 = vpow2.f32 %v2933_v23 }
0x1d4d   :  { %v5559_v34 = vpop.eup %5558 }
0x1d4e   :  { %v2942_v3 = vsel %vm477_vm5, %v5559_v34, 0.0 }
0x1d4f   :  { %2943 = vadd.xlane.f32.xlu1 %v2942_v3 }
0x1d51   :  { %v5561_v12 = vpop.eup %5560 }
0x1d52   :  { %v2945_v22 = vsel %vm477_vm5, %v5561_v12, 0.0  ;;  %v5563_v39 = vpop.eup %5562 }
0x1d53   :  { %2946 = vadd.xlane.f32.xlu0 %v2945_v22  ;;  %v2939_v42 = vsel %vm477_vm5, %v5563_v39, 0.0 }
0x1d57   :  { %2940 = vadd.xlane.f32.xlu0 %v2939_v42 }
0x1d60   :  { %3024 = vrot.lane.b32.xlu1 %v6570_v21, %s7195_s0 }
0x1d64   :  { %3022 = vrot.lane.b32.xlu1 %v6561_v58, %s7195_s0 }
0x1d68   :  { %3018 = vrot.lane.b32.xlu1 %v6561_v58, %s7196_s22 }
0x1d6d   :  { %2956 = vrot.lane.b32.xlu0 %v6561_v58, %s7194_s6 }
0x1d71   :  { %3020 = vrot.lane.b32.xlu0 %v6570_v21, %s7196_s22 }
0x1dd8   :  { %v2944_v26 = vpop.xlane.xlu1 %2943 }
0x1ddc   :  { %v2947_v36 = vpop.xlane.xlu0 %2946  ;;  %v3025_v14 = vpop.permute.xlu1 %3024 }
0x1ddd   :  { %5564 = vrcp.f32 %v2947_v36  ;;  %v3036_v6 = vsel %vm416_vm3, %v3025_v14, 0 }
0x1dde   :  { %5566 = vrcp.f32 %v2944_v26 }
0x1de0   :  { %v2941_v8 = vpop.xlane.xlu0 %2940  ;;  %v3023_v51 = vpop.permute.xlu1 %3022 }
0x1de1   :  { %5568 = vrcp.f32 %v2941_v8  ;;  %v3033_v31 = vsel %vm416_vm3, %v3023_v51, 0 }
0x1de4   :  { %v2957_v35 = vpop.permute.xlu0 %2956  ;;  %v3019_v57 = vpop.permute.xlu1 %3018 }
0x1de5   :  { %5070 = vmatprep.subr.bf16.mxu0 %v2957_v35 }
0x1de6   :  { %5071 = vmatpush3.bf16.msra.mxu0 %v2957_v35 }
0x1de7   :  { %5241 = vmatprep.subr.msk.bf16.mxu0 %vm416_vm3, %v3025_v14 }
0x1de8   :  { %v3021_v2 = vpop.permute.xlu0 %3020 }
0x1dea   :  { %v5565_v44 = vpop.eup %5564 }
0x1deb   :  { %v5567_v47 = vpop.eup %5566  ;;  %v2953_v53 = vmul.f32 %v5565_v44, %v5561_v12 }
0x1dec   :  { %v2952_v29 = vmul.f32 %v5567_v47, %v5559_v34  ;;  %v6764_v47 = vrot.slane %v2524_v4, 4 }
0x1ded   :  { %v2955_v17 = vpack.c.bf16 %v2953_v53, %v2953_v53 }
0x1dee   :  { %v5569_v10 = vpop.eup %5568 }
0x1def   :  { %v2951_v61 = vmul.f32 %v5569_v10, %v5563_v39  ;;  %v3229_v10 = vrot.slane %v6570_v21, 4 }
0x1df1   :  { %v2954_v40 = vpack.c.bf16 %v2952_v29, %v2951_v61 }
0x1df3   :  { %5072 = vmatprep.mubr.msk.bf16.mxu0 %vm477_vm5, %v2954_v40 }
0x1df4   :  { %5073 = vmatmul.mubr.msk.bf16.vlgmr.msra.gmra.mxu0 %vm477_vm5, %v2955_v17 }
0x1df5   :  { %5077 = vmatpush3.bf16.xpose.msra.mxu0 %v3036_v6  ;;  %5080 = vmatprep.mubr.msk.bf16.mxu0 %vm416_vm3, %v3019_v57 }
0x1df6   :  { %5242 = vmatprep.subr.msk.bf16.mxu0 %vm416_vm3, %v3023_v51  ;;  %v6771_v51 = vsel %vm524_vm6, %v3229_v10, %v6764_v47 }
0x1dfd   :  { %5079 = vmatpush3.bf16.xpose.msra.mxu0 %v3033_v31 }
0x1e04   :  { %5081 = vmatmul.mubr.msk.bf16.vlgmr.msra.gmra.mxu0 %vm416_vm3, %v3021_v2 }
0x1eb4   :  { %v6740_v19 = vpop.f32.mrf.mxu0 }
0x1eb6   :  { %v6742_v55 = vpop.f32.mrf.mxu0 }
0x1eb8   :  { %v5075_v18 = vpop.f32.mrf.mxu0 }
0x1eba   :  { %v6744_v13 = vpop.f32.mrf.mxu0 }
0x1ebb   :  { %v5324_v62 = vpack.i.bf16 %v6744_v13, %v6742_v55 }
0x1ec4   :  { %v5082_v43 = vpop.f32.mrf.mxu0 }
0x1ec5   :  { %v3081_v25 = vadd.f32 %v5082_v43, %v5946_v38 }
0x1ec6   :  { %v3072_v5 = vpop.f32.mrf.mxu0 }
0x1ec7   :  { %v3073_v46 = vadd.f32 %v3072_v5, %v5946_v38  ;;  %v3092_v49 = vsel %vm477_vm5, %v3081_v25, -inf }
0x1ec8   :  { %v5083_v48 = vpop.f32.mrf.mxu0 }
0x1ec9   :  { %v3086_v24 = vsel %vm477_vm5, %v3073_v46, -inf }
0x1eca   :  { %v3075_v7 = vpop.f32.mrf.mxu0  ;;  %3087 = vmax.xlane.f32.xlu1 %v3086_v24 }
0x1ecb   :  { %v3076_v20 = vadd.f32 %v3075_v7, %v5946_v38 }
0x1ecd   :  { %v3089_v45 = vsel %vm477_vm5, %v3076_v20, -inf }
0x1ece   :  { %3090 = vmax.xlane.f32.xlu0 %v3089_v45 }
0x1ed2   :  { %3093 = vmax.xlane.f32.xlu0 %v3092_v49 }
0x1edb   :  { %3123 = vrot.lane.b32.xlu1 %v6570_v21, %s7197_s2 }
0x1f53   :  { %v3088_v54 = vpop.xlane.xlu1 %3087 }
0x1f54   :  { %v3095_v34 = vsub.f32 %v3073_v46, %v3088_v54 }
0x1f56   :  { %v3098_v39 = vmul.f32 1.442695, %v3095_v34 }
0x1f57   :  { %v3091_v33 = vpop.xlane.xlu0 %3090  ;;  %v3124_v60 = vpop.permute.xlu1 %3123 }
0x1f58   :  { %v3096_v23 = vsub.f32 %v3076_v20, %v3091_v33  ;;  %v3133_v9 = vsel %vm524_vm6, %v3124_v60, 0  ;;  %5243 = vmatprep.subr.msk.bf16.mxu1 %vm524_vm6, %v3124_v60 }
0x1f59   :  { %5085 = vmatpush3.bf16.msra.mxu1 %v3133_v9 }
0x1f5a   :  { %v3100_v3 = vmul.f32 1.442695, %v3096_v23 }
0x1f5b   :  { %v3094_v12 = vpop.xlane.xlu0 %3093 }
0x1f5c   :  { %5570 = vpow2.f32 %v3100_v3  ;;  %v3097_v22 = vsub.f32 %v3081_v25, %v3094_v12 }
0x1f5e   :  { %v3102_v42 = vmul.f32 1.442695, %v3097_v22 }
0x1f60   :  { %5572 = vpow2.f32 %v3102_v42 }
0x1f61   :  { %5574 = vpow2.f32 %v3098_v39 }
0x1f69   :  { %v5571_v26 = vpop.eup %5570 }
0x1f6a   :  { %v3107_v36 = vsel %vm477_vm5, %v5571_v26, 0.0 }
0x1f6b   :  { %3108 = vadd.xlane.f32.xlu1 %v3107_v36 }
0x1f6d   :  { %v5573_v8 = vpop.eup %5572 }
0x1f6e   :  { %v3110_v35 = vsel %vm477_vm5, %v5573_v8, 0.0  ;;  %v5575_v14 = vpop.eup %5574 }
0x1f6f   :  { %3111 = vadd.xlane.f32.xlu0 %v3110_v35  ;;  %v3104_v44 = vsel %vm477_vm5, %v5575_v14, 0.0 }
0x1f73   :  { %3105 = vadd.xlane.f32.xlu0 %v3104_v44 }
0x1f7c   :  { %3234 = vrot.lane.b32.xlu1 %v6764_v47, %s5682_s24 }
0x1f80   :  { %3232 = vrot.lane.b32.xlu1 %v6771_v51, %s5682_s24  ;;  %s7198_s24 = smov 8  }
0x1f89   :  { %3121 = vrot.lane.b32.xlu0 %v6561_v58, %s7197_s2 }
0x1ff4   :  { %v3109_v53 = vpop.xlane.xlu1 %3108 }
0x1ff8   :  { %v3112_v61 = vpop.xlane.xlu0 %3111  ;;  %v3235_v4 = vpop.permute.xlu1 %3234 }
0x1ff9   :  { %5576 = vrcp.f32 %v3112_v61  ;;  %v3246_v2 = vsel %vm416_vm3, %v3235_v4, 0 }
0x1ffa   :  { %5578 = vrcp.f32 %v3109_v53 }
0x1ffc   :  { %v3106_v41 = vpop.xlane.xlu0 %3105  ;;  %v3233_v18 = vpop.permute.xlu1 %3232 }
0x1ffd   :  { %5580 = vrcp.f32 %v3106_v41  ;;  %v3243_v43 = vsel %vm416_vm3, %v3233_v18, 0 }
0x2000   :  { %v3122_v63 = vpop.permute.xlu0 %3121 }
0x2001   :  { %5086 = vmatprep.subr.bf16.mxu1 %v3122_v63 }
0x2002   :  { %5087 = vmatpush3.bf16.msra.mxu1 %v3122_v63 }
0x2003   :  { %5244 = vmatprep.subr.msk.bf16.mxu1 %vm416_vm3, %v3235_v4 }
0x2006   :  { %v5577_v21 = vpop.eup %5576 }
0x2007   :  { %v5579_v29 = vpop.eup %5578  ;;  %v3118_v17 = vmul.f32 %v5577_v21, %v5573_v8 }
0x2008   :  { %v3117_v57 = vmul.f32 %v5579_v29, %v5571_v26 }
0x2009   :  { %v3120_v58 = vpack.c.bf16 %v3118_v17, %v3118_v17 }
0x200a   :  { %v5581_v40 = vpop.eup %5580 }
0x200b   :  { %v3116_v6 = vmul.f32 %v5581_v40, %v5575_v14 }
0x200d   :  { %v3119_v31 = vpack.c.bf16 %v3117_v57, %v3116_v6 }
0x200f   :  { %5088 = vmatprep.mubr.msk.bf16.mxu1 %vm477_vm5, %v3119_v31 }
0x2010   :  { %5089 = vmatmul.mubr.msk.bf16.vlgmr.msra.gmra.mxu1 %vm477_vm5, %v3120_v58 }
0x2011   :  { %5093 = vmatpush3.bf16.xpose.msra.mxu1 %v3246_v2  ;;  %5096 = vmatprep.mubr.msk.bf16.mxu1 %vm416_vm3, %v6771_v51 }
0x2012   :  { %5245 = vmatprep.subr.msk.bf16.mxu1 %vm416_vm3, %v3233_v18 }
0x2019   :  { %5095 = vmatpush3.bf16.xpose.msra.mxu1 %v3243_v43 }
0x2020   :  { %5097 = vmatmul.mubr.msk.bf16.vlgmr.msra.gmra.mxu1 %vm416_vm3, %v6764_v47 }
0x20d0   :  { %v6787_v5 = vpop.f32.mrf.mxu1 }
0x20d2   :  { %v6789_v46 = vpop.f32.mrf.mxu1 }
0x20d4   :  { %v5091_v48 = vpop.f32.mrf.mxu1 }
0x20d6   :  { %v6791_v24 = vpop.f32.mrf.mxu1 }
0x20d7   :  { %v5329_v7 = vpack.i.bf16 %v6791_v24, %v6789_v46 }
0x20e0   :  { %v5098_v20 = vpop.f32.mrf.mxu1 }
0x20e1   :  { %v3291_v23 = vadd.f32 %v5098_v20, %v5946_v38 }
0x20e2   :  { %v3282_v25 = vpop.f32.mrf.mxu1 }
0x20e3   :  { %v3283_v45 = vadd.f32 %v3282_v25, %v5946_v38  ;;  %v3302_v34 = vsel %vm477_vm5, %v3291_v23, -inf }
0x20e4   :  { %v5099_v49 = vpop.f32.mrf.mxu1 }
0x20e5   :  { %v3296_v54 = vsel %vm477_vm5, %v3283_v45, -inf }
0x20e6   :  { %v3285_v33 = vpop.f32.mrf.mxu1  ;;  %3297 = vmax.xlane.f32.xlu1 %v3296_v54 }
0x20e7   :  { %v3286_v60 = vadd.f32 %v3285_v33, %v5946_v38 }
0x20e9   :  { %v3299_v9 = vsel %vm477_vm5, %v3286_v60, -inf }
0x20ea   :  { %3300 = vmax.xlane.f32.xlu0 %v3299_v9 }
0x20ee   :  { %3303 = vmax.xlane.f32.xlu0 %v3302_v34 }
0x20f7   :  { %3333 = vrot.lane.b32.xlu1 %v6764_v47, %s5686_s26 }
0x216f   :  { %v3298_v3 = vpop.xlane.xlu1 %3297 }
0x2170   :  { %v3305_v26 = vsub.f32 %v3283_v45, %v3298_v3 }
0x2172   :  { %v3308_v14 = vmul.f32 1.442695, %v3305_v26 }
0x2173   :  { %v3301_v12 = vpop.xlane.xlu0 %3300  ;;  %v3334_v22 = vpop.permute.xlu1 %3333 }
0x2174   :  { %v3306_v39 = vsub.f32 %v3286_v60, %v3301_v12  ;;  %v3343_v42 = vsel %vm524_vm6, %v3334_v22, 0  ;;  %5246 = vmatprep.subr.msk.bf16.mxu0 %vm524_vm6, %v3334_v22 }
0x2175   :  { %5101 = vmatpush3.bf16.msra.mxu0 %v3343_v42 }
0x2176   :  { %v3310_v36 = vmul.f32 1.442695, %v3306_v39 }
0x2177   :  { %v3304_v8 = vpop.xlane.xlu0 %3303 }
0x2178   :  { %5582 = vpow2.f32 %v3310_v36  ;;  %v3307_v35 = vsub.f32 %v3291_v23, %v3304_v8 }
0x217a   :  { %v3312_v44 = vmul.f32 1.442695, %v3307_v35 }
0x217c   :  { %5584 = vpow2.f32 %v3312_v44 }
0x217d   :  { %5586 = vpow2.f32 %v3308_v14 }
0x2185   :  { %v5583_v10 = vpop.eup %5582 }
0x2186   :  { %v3317_v53 = vsel %vm477_vm5, %v5583_v10, 0.0 }
0x2187   :  { %3318 = vadd.xlane.f32.xlu1 %v3317_v53 }
0x2189   :  { %v5585_v61 = vpop.eup %5584 }
0x218a   :  { %v3320_v41 = vsel %vm477_vm5, %v5585_v61, 0.0  ;;  %v5587_v63 = vpop.eup %5586 }
0x218b   :  { %3321 = vadd.xlane.f32.xlu0 %v3320_v41  ;;  %v3314_v4 = vsel %vm477_vm5, %v5587_v63, 0.0 }
0x218f   :  { %3315 = vadd.xlane.f32.xlu0 %v3314_v4 }
0x2198   :  { %3399 = vrot.lane.b32.xlu1 %v6764_v47, %s5683_s25 }
0x219c   :  { %3397 = vrot.lane.b32.xlu1 %v6771_v51, %s5683_s25  ;;  %s7199_s25 = smov 16  }
0x21a0   :  { %3393 = vrot.lane.b32.xlu1 %v6771_v51, %s5684_s3 }
0x21a5   :  { %3331 = vrot.lane.b32.xlu0 %v6771_v51, %s5686_s26 }
0x21a9   :  { %3395 = vrot.lane.b32.xlu0 %v6764_v47, %s5684_s3  ;;  %s7200_s3 = smov 24  }
0x2210   :  { %v3319_v21 = vpop.xlane.xlu1 %3318 }
0x2214   :  { %v3322_v29 = vpop.xlane.xlu0 %3321  ;;  %v3400_v6 = vpop.permute.xlu1 %3399 }
0x2215   :  { %5588 = vrcp.f32 %v3322_v29  ;;  %v3411_v45 = vsel %vm416_vm3, %v3400_v6, 0 }
0x2216   :  { %5590 = vrcp.f32 %v3319_v21 }
0x2218   :  { %v3316_v40 = vpop.xlane.xlu0 %3315  ;;  %v3398_v2 = vpop.permute.xlu1 %3397 }
0x2219   :  { %5592 = vrcp.f32 %v3316_v40  ;;  %v3408_v54 = vsel %vm416_vm3, %v3398_v2, 0 }
0x221c   :  { %v3332_v17 = vpop.permute.xlu0 %3331  ;;  %v3394_v49 = vpop.permute.xlu1 %3393 }
0x221d   :  { %5102 = vmatprep.subr.bf16.mxu0 %v3332_v17 }
0x221e   :  { %5103 = vmatpush3.bf16.msra.mxu0 %v3332_v17 }
0x221f   :  { %5247 = vmatprep.subr.msk.bf16.mxu0 %vm416_vm3, %v3400_v6 }
0x2220   :  { %v3396_v33 = vpop.permute.xlu0 %3395 }
0x2222   :  { %v5589_v57 = vpop.eup %5588 }
0x2223   :  { %v5591_v31 = vpop.eup %5590  ;;  %v3328_v18 = vmul.f32 %v5589_v57, %v5585_v61 }
0x2224   :  { %v3327_v48 = vmul.f32 %v5591_v31, %v5583_v10 }
0x2225   :  { %v3330_v25 = vpack.c.bf16 %v3328_v18, %v3328_v18 }
0x2226   :  { %v5593_v58 = vpop.eup %5592 }
0x2227   :  { %v3326_v43 = vmul.f32 %v5593_v58, %v5587_v63 }
0x2229   :  { %v3329_v20 = vpack.c.bf16 %v3327_v48, %v3326_v43 }
0x222b   :  { %5104 = vmatprep.mubr.msk.bf16.mxu0 %vm477_vm5, %v3329_v20 }
0x222c   :  { %5105 = vmatmul.mubr.msk.bf16.vlgmr.msra.gmra.mxu0 %vm477_vm5, %v3330_v25 }
0x222d   :  { %5109 = vmatpush3.bf16.xpose.msra.mxu0 %v3411_v45  ;;  %5112 = vmatprep.mubr.msk.bf16.mxu0 %vm416_vm3, %v3394_v49 }
0x222e   :  { %5248 = vmatprep.subr.msk.bf16.mxu0 %vm416_vm3, %v3398_v2 }
0x2235   :  { %5111 = vmatpush3.bf16.xpose.msra.mxu0 %v3408_v54 }
0x223c   :  { %5113 = vmatmul.mubr.msk.bf16.vlgmr.msra.gmra.mxu0 %vm416_vm3, %v3396_v33 }
0x22ec   :  { %v6826_v60 = vpop.f32.mrf.mxu0 }
0x22ee   :  { %v6828_v23 = vpop.f32.mrf.mxu0 }
0x22f0   :  { %v5107_v9 = vpop.f32.mrf.mxu0 }
0x22f2   :  { %v6830_v34 = vpop.f32.mrf.mxu0 }
0x22fc   :  { %v5114_v3 = vpop.f32.mrf.mxu0 }
0x22fd   :  { %v3456_v8 = vadd.f32 %v5114_v3, %v5946_v38 }
0x22fe   :  { %v3447_v12 = vpop.f32.mrf.mxu0 }
0x22ff   :  { %v3448_v22 = vadd.f32 %v3447_v12, %v5946_v38  ;;  %v3467_v14 = vsel %vm477_vm5, %v3456_v8, -inf }
0x2300   :  { %v5115_v39 = vpop.f32.mrf.mxu0 }
0x2301   :  { %v3461_v42 = vsel %vm477_vm5, %v3448_v22, -inf }
0x2302   :  { %v3450_v26 = vpop.f32.mrf.mxu0  ;;  %3462 = vmax.xlane.f32.xlu1 %v3461_v42 }
0x2303   :  { %v3451_v36 = vadd.f32 %v3450_v26, %v5946_v38 }
0x2305   :  { %v3464_v35 = vsel %vm477_vm5, %v3451_v36, -inf }
0x2306   :  { %3465 = vmax.xlane.f32.xlu0 %v3464_v35 }
0x230a   :  { %3468 = vmax.xlane.f32.xlu0 %v3467_v14 }
0x2313   :  { %3498 = vrot.lane.b32.xlu1 %v6764_v47, %s5687_s27 }
0x238b   :  { %v3463_v44 = vpop.xlane.xlu1 %3462 }
0x238c   :  { %v3470_v63 = vsub.f32 %v3448_v22, %v3463_v44 }
0x238e   :  { %v3473_v40 = vmul.f32 1.442695, %v3470_v63 }
0x238f   :  { %v3466_v10 = vpop.xlane.xlu0 %3465  ;;  %v3499_v53 = vpop.permute.xlu1 %3498 }
0x2390   :  { %v3471_v61 = vsub.f32 %v3451_v36, %v3466_v10  ;;  %v3508_v41 = vsel %vm524_vm6, %v3499_v53, 0  ;;  %5249 = vmatprep.subr.msk.bf16.mxu1 %vm524_vm6, %v3499_v53 }
0x2391   :  { %5117 = vmatpush3.bf16.msra.mxu1 %v3508_v41 }
0x2392   :  { %v3475_v4 = vmul.f32 1.442695, %v3471_v61 }
0x2393   :  { %v3469_v21 = vpop.xlane.xlu0 %3468 }
0x2394   :  { %5594 = vpow2.f32 %v3475_v4  ;;  %v3472_v29 = vsub.f32 %v3456_v8, %v3469_v21 }
0x2396   :  { %v3477_v17 = vmul.f32 1.442695, %v3472_v29 }
0x2398   :  { %5596 = vpow2.f32 %v3477_v17 }
0x2399   :  { %5598 = vpow2.f32 %v3473_v40 }
0x23a1   :  { %v5595_v6 = vpop.eup %5594 }
0x23a2   :  { %v3482_v57 = vsel %vm477_vm5, %v5595_v6, 0.0 }
0x23a3   :  { %3483 = vadd.xlane.f32.xlu1 %v3482_v57 }
0x23a5   :  { %v5597_v31 = vpop.eup %5596 }
0x23a6   :  { %v3485_v58 = vsel %vm477_vm5, %v5597_v31, 0.0  ;;  %v5599_v2 = vpop.eup %5598 }
0x23a7   :  { %3486 = vadd.xlane.f32.xlu0 %v3485_v58  ;;  %v3479_v18 = vsel %vm477_vm5, %v5599_v2, 0.0 }
0x23ab   :  { %3480 = vadd.xlane.f32.xlu0 %v3479_v18 }
0x23b4   :  { %3564 = vrot.lane.b32.xlu1 %v6764_v47, %s5688_s28 }
0x23b8   :  { %3562 = vrot.lane.b32.xlu1 %v6771_v51, %s5688_s28 }
0x23bc   :  { %3558 = vrot.lane.b32.xlu1 %v6771_v51, %s5689_s29 }
0x23c1   :  { %3496 = vrot.lane.b32.xlu0 %v6771_v51, %s5687_s27 }
0x23c5   :  { %3560 = vrot.lane.b32.xlu0 %v6764_v47, %s5689_s29 }
0x242c   :  { %v3484_v43 = vpop.xlane.xlu1 %3483 }
0x2430   :  { %v3487_v48 = vpop.xlane.xlu0 %3486  ;;  %v3565_v45 = vpop.permute.xlu1 %3564 }
0x2431   :  { %5600 = vrcp.f32 %v3487_v48  ;;  %v3576_v26 = vsel %vm416_vm3, %v3565_v45, 0 }
0x2432   :  { %5602 = vrcp.f32 %v3484_v43 }
0x2434   :  { %v3481_v20 = vpop.xlane.xlu0 %3480  ;;  %v3563_v9 = vpop.permute.xlu1 %3562 }
0x2435   :  { %5604 = vrcp.f32 %v3481_v20  ;;  %v3573_v8 = vsel %vm416_vm3, %v3563_v9, 0 }
0x2438   :  { %v3497_v25 = vpop.permute.xlu0 %3496  ;;  %v3559_v36 = vpop.permute.xlu1 %3558 }
0x2439   :  { %5118 = vmatprep.subr.bf16.mxu1 %v3497_v25 }
0x243a   :  { %5119 = vmatpush3.bf16.msra.mxu1 %v3497_v25 }
0x243b   :  { %5250 = vmatprep.subr.msk.bf16.mxu1 %vm416_vm3, %v3565_v45 }
0x243c   :  { %v3561_v35 = vpop.permute.xlu0 %3560 }
0x243e   :  { %v5601_v49 = vpop.eup %5600 }
0x243f   :  { %v5603_v54 = vpop.eup %5602  ;;  %v3493_v3 = vmul.f32 %v5601_v49, %v5597_v31 }
0x2440   :  { %v3492_v22 = vmul.f32 %v5603_v54, %v5595_v6 }
0x2441   :  { %v3495_v42 = vpack.c.bf16 %v3493_v3, %v3493_v3 }
0x2442   :  { %v5605_v33 = vpop.eup %5604 }
0x2443   :  { %v3491_v12 = vmul.f32 %v5605_v33, %v5599_v2 }
0x2445   :  { %v3494_v39 = vpack.c.bf16 %v3492_v22, %v3491_v12 }
0x2447   :  { %5120 = vmatprep.mubr.msk.bf16.mxu1 %vm477_vm5, %v3494_v39 }
0x2448   :  { %5121 = vmatmul.mubr.msk.bf16.vlgmr.msra.gmra.mxu1 %vm477_vm5, %v3495_v42 }
0x2449   :  { %5125 = vmatpush3.bf16.xpose.msra.mxu1 %v3576_v26  ;;  %5128 = vmatprep.mubr.msk.bf16.mxu1 %vm416_vm3, %v3559_v36 }
0x244a   :  { %5251 = vmatprep.subr.msk.bf16.mxu1 %vm416_vm3, %v3563_v9 }
0x2451   :  { %5127 = vmatpush3.bf16.xpose.msra.mxu1 %v3573_v8 }
0x2458   :  { %5129 = vmatmul.mubr.msk.bf16.vlgmr.msra.gmra.mxu1 %vm416_vm3, %v3561_v35 }
0x2508   :  { %v6863_v14 = vpop.f32.mrf.mxu1 }
0x250a   :  { %v6865_v44 = vpop.f32.mrf.mxu1 }
0x250c   :  { %v5123_v10 = vpop.f32.mrf.mxu1 }
0x250e   :  { %v6867_v53 = vpop.f32.mrf.mxu1 }
0x250f   :  { %v5349_v61 = vpack.i.bf16 %v6863_v14, %v6867_v53 }
0x2518   :  { %v5130_v41 = vpop.f32.mrf.mxu1 }
0x2519   :  { %v3621_v6 = vadd.f32 %v5130_v41, %v5946_v38 }
0x251a   :  { %v3612_v63 = vpop.f32.mrf.mxu1 }
0x251b   :  { %v3613_v4 = vadd.f32 %v3612_v63, %v5946_v38  ;;  %v3632_v31 = vsel %vm477_vm5, %v3621_v6, -inf }
0x251c   :  { %v5131_v21 = vpop.f32.mrf.mxu1 }
0x251d   :  { %v3626_v29 = vsel %vm477_vm5, %v3613_v4, -inf }
0x251e   :  { %v3615_v40 = vpop.f32.mrf.mxu1  ;;  %3627 = vmax.xlane.f32.xlu1 %v3626_v29 }
0x251f   :  { %v3616_v17 = vadd.f32 %v3615_v40, %v5946_v38 }
0x2521   :  { %v3629_v57 = vsel %vm477_vm5, %v3616_v17, -inf }
0x2522   :  { %3630 = vmax.xlane.f32.xlu0 %v3629_v57 }
0x2526   :  { %3633 = vmax.xlane.f32.xlu0 %v3632_v31 }
0x252f   :  { %3663 = vrot.lane.b32.xlu1 %v6764_v47, %s7194_s6 }
0x25a7   :  { %v3628_v58 = vpop.xlane.xlu1 %3627 }
0x25a8   :  { %v3635_v20 = vsub.f32 %v3613_v4, %v3628_v58 }
0x25aa   :  { %v3638_v54 = vmul.f32 1.442695, %v3635_v20 }
0x25ab   :  { %v3631_v2 = vpop.xlane.xlu0 %3630  ;;  %v3664_v18 = vpop.permute.xlu1 %3663 }
0x25ac   :  { %v3636_v43 = vsub.f32 %v3616_v17, %v3631_v2  ;;  %v3673_v48 = vsel %vm524_vm6, %v3664_v18, 0  ;;  %5252 = vmatprep.subr.msk.bf16.mxu0 %vm524_vm6, %v3664_v18 }
0x25ad   :  { %5133 = vmatpush3.bf16.msra.mxu0 %v3673_v48 }
0x25ae   :  { %v3640_v25 = vmul.f32 1.442695, %v3636_v43 }
0x25af   :  { %v3634_v45 = vpop.xlane.xlu0 %3633 }
0x25b0   :  { %5606 = vpow2.f32 %v3640_v25  ;;  %v3637_v49 = vsub.f32 %v3621_v6, %v3634_v45 }
0x25b2   :  { %v3642_v33 = vmul.f32 1.442695, %v3637_v49 }
0x25b4   :  { %5608 = vpow2.f32 %v3642_v33 }
0x25b5   :  { %5610 = vpow2.f32 %v3638_v54 }
0x25bd   :  { %v5607_v9 = vpop.eup %5606 }
0x25be   :  { %v3647_v3 = vsel %vm477_vm5, %v5607_v9, 0.0 }
0x25bf   :  { %3648 = vadd.xlane.f32.xlu1 %v3647_v3 }
0x25c1   :  { %v5609_v12 = vpop.eup %5608 }
0x25c2   :  { %v3650_v22 = vsel %vm477_vm5, %v5609_v12, 0.0  ;;  %v5611_v39 = vpop.eup %5610 }
0x25c3   :  { %3651 = vadd.xlane.f32.xlu0 %v3650_v22  ;;  %v3644_v42 = vsel %vm477_vm5, %v5611_v39, 0.0 }
0x25c7   :  { %3645 = vadd.xlane.f32.xlu0 %v3644_v42 }
0x25d0   :  { %3729 = vrot.lane.b32.xlu1 %v6764_v47, %s7195_s0 }
0x25d4   :  { %3727 = vrot.lane.b32.xlu1 %v6771_v51, %s7195_s0 }
0x25d8   :  { %3723 = vrot.lane.b32.xlu1 %v6771_v51, %s7196_s22 }
0x25dd   :  { %3661 = vrot.lane.b32.xlu0 %v6771_v51, %s7194_s6 }
0x25e1   :  { %3725 = vrot.lane.b32.xlu0 %v6764_v47, %s7196_s22 }
0x2648   :  { %v3649_v26 = vpop.xlane.xlu1 %3648 }
0x264c   :  { %v3652_v36 = vpop.xlane.xlu0 %3651  ;;  %v3730_v10 = vpop.permute.xlu1 %3729 }
0x264d   :  { %5612 = vrcp.f32 %v3652_v36  ;;  %v3741_v31 = vsel %vm416_vm3, %v3730_v10, 0 }
0x264e   :  { %5614 = vrcp.f32 %v3649_v26 }
0x2650   :  { %v3646_v8 = vpop.xlane.xlu0 %3645  ;;  %v3728_v21 = vpop.permute.xlu1 %3727 }
0x2651   :  { %5616 = vrcp.f32 %v3646_v8  ;;  %v3738_v2 = vsel %vm416_vm3, %v3728_v21, 0 }
0x2654   :  { %v3662_v35 = vpop.permute.xlu0 %3661  ;;  %v3724_v58 = vpop.permute.xlu1 %3723 }
0x2655   :  { %5134 = vmatprep.subr.bf16.mxu0 %v3662_v35 }
0x2656   :  { %5135 = vmatpush3.bf16.msra.mxu0 %v3662_v35 }
0x2657   :  { %5253 = vmatprep.subr.msk.bf16.mxu0 %vm416_vm3, %v3730_v10 }
0x2658   :  { %v3726_v18 = vpop.permute.xlu0 %3725 }
0x265a   :  { %v5613_v41 = vpop.eup %5612 }
0x265b   :  { %v5615_v63 = vpop.eup %5614  ;;  %v3658_v29 = vmul.f32 %v5613_v41, %v5609_v12 }
0x265c   :  { %v3657_v17 = vmul.f32 %v5615_v63, %v5607_v9 }
0x265d   :  { %v3660_v57 = vpack.c.bf16 %v3658_v29, %v3658_v29 }
0x265e   :  { %v5617_v4 = vpop.eup %5616 }
0x265f   :  { %v3656_v40 = vmul.f32 %v5617_v4, %v5611_v39 }
0x2661   :  { %v3659_v6 = vpack.c.bf16 %v3657_v17, %v3656_v40 }
0x2663   :  { %5136 = vmatprep.mubr.msk.bf16.mxu0 %vm477_vm5, %v3659_v6 }
0x2664   :  { %5137 = vmatmul.mubr.msk.bf16.vlgmr.msra.gmra.mxu0 %vm477_vm5, %v3660_v57 }
0x2665   :  { %5141 = vmatpush3.bf16.xpose.msra.mxu0 %v3741_v31  ;;  %5144 = vmatprep.mubr.msk.bf16.mxu0 %vm416_vm3, %v3724_v58  ;;  %v5334_v58 = vpack.i.bf16 %v6865_v44, %v6701_v30 }
0x2666   :  { %5254 = vmatprep.subr.msk.bf16.mxu0 %vm416_vm3, %v3728_v21 }
0x266d   :  { %5143 = vmatpush3.bf16.xpose.msra.mxu0 %v3738_v2 }
0x266e   :  { %5172 = vmatprep.subr.bf16.mxu0 %v5680_v1 }
0x2674   :  { %5145 = vmatmul.mubr.msk.bf16.vlgmr.msra.gmra.mxu0 %vm416_vm3, %v3726_v18 }
0x2675   :  { %5176 = vmatprep.mubr.msk.bf16.mxu0 %vm5681_vm0, %v5680_v1 }
0x2724   :  { %v6905_v43 = vpop.f32.mrf.mxu0 }
0x2726   :  { %v3709_v48 = vpop.f32.mrf.mxu0 }
0x2728   :  { %v5139_v20 = vpop.f32.mrf.mxu0 }
0x272a   :  { %v6907_v25 = vpop.f32.mrf.mxu0 }
0x272b   :  { %v5354_v45 = vpack.i.bf16 %v6905_v43, %v6907_v25 }
0x2734   :  { %v5146_v49 = vpop.f32.mrf.mxu0 }
0x2735   :  { %v3786_v39 = vadd.f32 %v5146_v49, %v5946_v38 }
0x2736   :  { %v3777_v54 = vpop.f32.mrf.mxu0 }
0x2737   :  { %v3778_v33 = vadd.f32 %v3777_v54, %v5946_v38  ;;  %v3797_v26 = vsel %vm477_vm5, %v3786_v39, -inf }
0x2738   :  { %v5147_v9 = vpop.f32.mrf.mxu0 }
0x2739   :  { %v3791_v3 = vsel %vm477_vm5, %v3778_v33, -inf }
0x273a   :  { %v3780_v12 = vpop.f32.mrf.mxu0  ;;  %3792 = vmax.xlane.f32.xlu1 %v3791_v3 }
0x273b   :  { %v3781_v22 = vadd.f32 %v3780_v12, %v5946_v38 }
0x273d   :  { %v3794_v42 = vsel %vm477_vm5, %v3781_v22, -inf }
0x273e   :  { %3795 = vmax.xlane.f32.xlu0 %v3794_v42 }
0x2742   :  { %3798 = vmax.xlane.f32.xlu0 %v3797_v26 }
0x27c3   :  { %v3793_v36 = vpop.xlane.xlu1 %3792 }
0x27c4   :  { %v3800_v10 = vsub.f32 %v3778_v33, %v3793_v36 }
0x27c6   :  { %v3803_v21 = vmul.f32 1.442695, %v3800_v10 }
0x27c7   :  { %v3796_v8 = vpop.xlane.xlu0 %3795 }
0x27c8   :  { %v3801_v35 = vsub.f32 %v3781_v22, %v3796_v8  ;;  %v5383_v22 = vld [vmem:[%s7155_s7 + $0x10] sm:$0xff]  }
0x27ca   :  { %v3805_v41 = vmul.f32 1.442695, %v3801_v35 }
0x27cb   :  { %v3799_v63 = vpop.xlane.xlu0 %3798 }
0x27cc   :  { %5618 = vpow2.f32 %v3805_v41  ;;  %v3802_v4 = vsub.f32 %v3786_v39, %v3799_v63 }
0x27ce   :  { %v3807_v29 = vmul.f32 1.442695, %v3802_v4 }
0x27d0   :  { %5620 = vpow2.f32 %v3807_v29 }
0x27d1   :  { %5622 = vpow2.f32 %v3803_v21 }
0x27d9   :  { %v5619_v40 = vpop.eup %5618 }
0x27da   :  { %v3812_v38 = vsel %vm477_vm5, %v5619_v40, 0.0 }
0x27db   :  { %3813 = vadd.xlane.f32.xlu1 %v3812_v38 }
0x27dd   :  { %v5621_v17 = vpop.eup %5620 }
0x27de   :  { %v3815_v6 = vsel %vm477_vm5, %v5621_v17, 0.0  ;;  %v5623_v57 = vpop.eup %5622 }
0x27df   :  { %3816 = vadd.xlane.f32.xlu0 %v3815_v6  ;;  %v3809_v31 = vsel %vm477_vm5, %v5623_v57, 0.0 }
0x27e3   :  { %3810 = vadd.xlane.f32.xlu0 %v3809_v31 }
0x27ec   :  { %3828 = vrot.lane.b32.xlu1 %v6764_v47, %s7197_s2  ;;  %v5339_v47 = vpack.i.bf16 %v3709_v48, %v6740_v19  ;;  %v5382_v48 = vld [vmem:[%s7155_s7 + $0x18] sm:$0xff]  }
0x27f0   :  { %5320 = vrot.lane.b32.xlu1 %v5319_v50, %s7198_s24 }
0x27f4   :  { %5325 = vrot.lane.b32.xlu1 %v5324_v62, %s7199_s25 }
0x27f8   :  { %5330 = vrot.lane.b32.xlu1 %v5329_v7, %s7200_s3 }
0x27f9   :  { %3826 = vrot.lane.b32.xlu0 %v6771_v51, %s7197_s2 }
0x27fc   :  { %5340 = vrot.lane.b32.xlu1 %v5339_v47, %s7199_s25 }
0x27fd   :  { %5335 = vrot.lane.b32.xlu0 %v5334_v58, %s7198_s24 }
0x2800   :  { %5350 = vrot.lane.b32.xlu1 %v5349_v61, %s7198_s24 }
0x2864   :  { %v3814_v0 = vpop.xlane.xlu1 %3813 }
0x2868   :  { %v3817_v11 = vpop.xlane.xlu0 %3816  ;;  %v3829_v50 = vpop.permute.xlu1 %3828 }
0x2869   :  { %v3838_v55 = vsel %vm524_vm6, %v3829_v50, 0  ;;  %5255 = vmatprep.subr.msk.bf16.mxu1 %vm524_vm6, %v3829_v50  ;;  %5624 = vrcp.f32 %v3817_v11 }
0x286a   :  { %5149 = vmatpush3.bf16.msra.mxu1 %v3838_v55  ;;  %5626 = vrcp.f32 %v3814_v0 }
0x286c   :  { %v3811_v30 = vpop.xlane.xlu0 %3810  ;;  %v5321_v19 = vpop.permute.xlu1 %5320 }
0x286d   :  { %5628 = vrcp.f32 %v3811_v30  ;;  %v5323_v61 = vunpack.i.h.bf16 %v5321_v19  ;;  %v5322_v2 = vunpack.i.l.bf16 %v5321_v19 }
0x286f   :  { %v3220_v3 = vsel %vm416_vm3, %v6699_v59, %v5323_v61  ;;  %v3219_v12 = vsel %vm416_vm3, %v6697_v56, %v5322_v2 }
0x2870   :  { %v3827_v13 = vpop.permute.xlu0 %3826  ;;  %v5326_v62 = vpop.permute.xlu1 %5325 }
0x2871   :  { %5150 = vmatprep.subr.bf16.mxu1 %v3827_v13  ;;  %v5328_v20 = vunpack.i.h.bf16 %v5326_v62  ;;  %v5327_v49 = vunpack.i.l.bf16 %v5326_v62 }
0x2872   :  { %5151 = vmatpush3.bf16.msra.mxu1 %v3827_v13 }
0x2873   :  { %5156 = vmatprep.subr.bf16.mxu1 %v5680_v1  ;;  %v3222_v39 = vsel %vm1110_vm7, %v3219_v12, %v5327_v49  ;;  %v3223_v42 = vsel %vm1110_vm7, %v3220_v3, %v5328_v20 }
0x2874   :  { %v5331_v53 = vpop.permute.xlu1 %5330  ;;  %v5336_v0 = vpop.permute.xlu0 %5335 }
0x2875   :  { %v5333_v33 = vunpack.i.h.bf16 %v5331_v53  ;;  %v5332_v9 = vunpack.i.l.bf16 %v5331_v53  ;;  %v5338_v11 = vunpack.i.h.bf16 %v5336_v0  ;;  %v5337_v50 = vunpack.i.l.bf16 %v5336_v0  ;;  %v5384_v0 = vld [vmem:[%s7160_s12 + $0x18] sm:$0xff]  }
0x2876   :  { %v5625_v51 = vpop.eup %5624  ;;  %5173 = vmatpush3.bf16.msra.mxu0 %v5384_v0 }
0x2877   :  { %v5627_v46 = vpop.eup %5626  ;;  %v3823_v7 = vmul.f32 %v5625_v51, %v5621_v17  ;;  %v3225_v26 = vsel %vm477_vm5, %v3222_v39, %v5332_v9  ;;  %v3226_v59 = vsel %vm477_vm5, %v3223_v42, %v5333_v33  ;;  %v6987_v17 = vld [vmem:[%s7157_s9 + $0x1] ss:$0 sm:$0xff]  ;;  %v3924_v13 = vsel %vm416_vm3, %v6828_v23, %v5338_v11  ;;  %5174 = vmatprep.subr.bf16.mxu0 %v5680_v1 }
0x2878   :  { %v3822_v44 = vmul.f32 %v5627_v46, %v5619_v40  ;;  %v3933_v56 = vpack.c.bf16 %v3226_v59, %v3225_v26  ;;  %v5341_v58 = vpop.permute.xlu1 %5340  ;;  %v3221_v62 = vsel %vm416_vm3, %v6695_v16, %v5337_v50 }
0x2879   :  { %v3825_v54 = vpack.c.bf16 %v3823_v7, %v3823_v7  ;;  %v5343_v55 = vunpack.i.h.bf16 %v5341_v58  ;;  %v5342_v30 = vunpack.i.l.bf16 %v5341_v58 }
0x287a   :  { %v5629_v24 = vpop.eup %5628 }
0x287b   :  { %v3821_v14 = vmul.f32 %v5629_v24, %v5623_v57  ;;  %v3224_v24 = vsel %vm1110_vm7, %v3221_v62, %v5342_v30 }
0x287c   :  { %v5351_v19 = vpop.permute.xlu1 %5350 }
0x287d   :  { %v3824_v18 = vpack.c.bf16 %v3822_v44, %v3821_v14  ;;  %v5353_v7 = vunpack.i.h.bf16 %v5351_v19  ;;  %v5352_v14 = vunpack.i.l.bf16 %v5351_v19 }
0x287f   :  { %5152 = vmatprep.mubr.msk.bf16.mxu1 %vm477_vm5, %v3824_v18  ;;  %v3926_v16 = vsel %vm416_vm3, %v6826_v60, %v5353_v7 }
0x2880   :  { %5153 = vmatmul.mubr.msk.bf16.vlgmr.msra.gmra.mxu1 %vm477_vm5, %v3825_v54  ;;  %v3925_v54 = vsel %vm416_vm3, %v6830_v34, %v5352_v14 }
0x2881   :  { %5157 = vmatpush3.bf16.msra.mxu1 %v5382_v48  ;;  %5160 = vmatprep.mubr.msk.bf16.mxu1 %vm5681_vm0, %v5680_v1 }
0x2882   :  { %5158 = vmatprep.subr.bf16.mxu1 %v5680_v1 }
0x2885   :  { %5159 = vmatpush3.bf16.msra.mxu1 %v5383_v22 }
0x2886   :  { %5188 = vmatprep.subr.bf16.mxu1 %v5680_v1 }
0x2888   :  { %5161 = vmatmul.mubr.msk.bf16.vlgmr.msra.gmra.mxu1 %vm216_vm2, %v3933_v56 }
0x2889   :  { %5164 = vmatprep.mubr.msk.bf16.mxu1 %vm5681_vm0, %v5680_v1 }
0x2940   :  { %v5154_v36 = vpop.f32.mrf.mxu1 }
0x2942   :  { %v3874_v8 = vpop.f32.mrf.mxu1 }
0x2943   :  { %v5344_v35 = vpack.i.bf16 %v3874_v8, %v6787_v5  ;;  %v6981_v5 = vld [vmem:[%s7156_s8 + $0x1] ss:$0 sm:$0xff]  ;;  %s5658_s8 = scalar_lea.vmem %s4444_s30, 32 }
0x2944   :  { %v5155_v10 = vpop.f32.mrf.mxu1  ;;  %p5659_p0 = scmp.ne.s32.totalorder %s4444_s30, %s5658_s8  ;;  %p5664_p2 = scmp.lt.s32.totalorder %s5658_s8, %s5658_s8 }
0x2945   :  { %5345 = vrot.lane.b32.xlu0 %v5344_v35, %s7200_s3 }
0x2946   :  { %v3877_v41 = vpop.f32.mrf.mxu1  ;;  %p5665_p3 = por %p5664_p2, %p5663_p1 }
0x2947   :  { %v5359_v63 = vpack.i.bf16 %v5154_v36, %v3877_v41 }
0x2948   :  { %v3997_v4 = vpop.f32.mrf.mxu1  ;;  %p5666_p4 = pnand %p5665_p3, %p5659_p0 }
0x2949   :  { %5355 = vrot.lane.b32.xlu0 %v5354_v45, %s7199_s25  ;;  %5360 = vrot.lane.b32.xlu1 %v5359_v63, %s7200_s3  ;;  %v3998_v38 = vadd.f32 %v6981_v5, %v3997_v4 }
0x294a   :  { %v5162_v21 = vpop.f32.mrf.mxu1 }
0x294b   :  { %v4026_v43 = vmul.f32 %v6987_v17, %v3998_v38 }
0x294c   :  { %v4000_v29 = vpop.f32.mrf.mxu1 }
0x294d   :  { %v4001_v25 = vadd.f32 %v6981_v5, %v4000_v29  ;;  %v6992_v45 = vadd.f32 %v4026_v43, %v6467_v52 }
0x294e   :  { %v5163_v40 = vpop.f32.mrf.mxu1 }
0x294f   :  { %v4027_v6 = vmul.f32 %v6987_v17, %v4001_v25  ;;  %v4038_v57 = vsel %vm216_vm2, %v6992_v45, 0.0 }
0x2951   :  { %v4033_v31 = vadd.f32 %v4027_v6, %v6474_v32  ;;  %v3927_v32 = vsel %vm1110_vm7, %v3924_v13, %v5343_v55 }
0x2953   :  { %v4041_v47 = vsel %vm216_vm2, %v4033_v31, 0.0 }
0x2968   :  { %4039 = vadd.xlane.f32.xlu0 %v4038_v57 }
0x296d   :  { %4042 = vadd.xlane.f32.xlu1 %v4041_v47 }
0x29b7   :  { %v5346_v52 = vpop.permute.xlu0 %5345 }
0x29b8   :  { %v5348_v51 = vunpack.i.h.bf16 %v5346_v52  ;;  %v5347_v46 = vunpack.i.l.bf16 %v5346_v52 }
0x29ba   :  { %v3227_v44 = vsel %vm477_vm5, %v3224_v24, %v5347_v46  ;;  %v3930_v53 = vsel %vm477_vm5, %v3927_v32, %v5348_v51 }
0x29bb   :  { %v3934_v61 = vpack.c.bf16 %v3930_v53, %v3227_v44  ;;  %v5356_v2 = vpop.permute.xlu0 %5355  ;;  %v5361_v18 = vpop.permute.xlu1 %5360 }
0x29bc   :  { %v5358_v48 = vunpack.i.h.bf16 %v5356_v2  ;;  %v5357_v23 = vunpack.i.l.bf16 %v5356_v2  ;;  %v5363_v20 = vunpack.i.h.bf16 %v5361_v18  ;;  %v5362_v49 = vunpack.i.l.bf16 %v5361_v18 }
0x29bd   :  { %5165 = vmatmul.mubr.msk.bf16.gmra.mxu1 %vm216_vm2, %v3934_v61 }
0x29be   :  { %v3928_v33 = vsel %vm1110_vm7, %v3925_v54, %v5357_v23  ;;  %v3929_v9 = vsel %vm1110_vm7, %v3926_v16, %v5358_v48  ;;  %5168 = vmatprep.mubr.msk.bf16.mxu1 %vm5681_vm0, %v5680_v1  ;;  %v7065_v16 = vld [vmem:[%s7158_s10 + $0x1] ss:$0 sm:$0xff] }
0x29bf   :  { %v3931_v3 = vsel %vm477_vm5, %v3928_v33, %v5362_v49  ;;  %v3932_v12 = vsel %vm477_vm5, %v3929_v9, %v5363_v20 }
0x29c0   :  { %v3935_v22 = vpack.c.bf16 %v3932_v12, %v3931_v3 }
0x29c5   :  { %5169 = vmatmul.mubr.msk.bf16.gmra.mxu1 %vm216_vm2, %v3935_v22 }
0x29c6   :  { %5196 = vmatprep.mubr.msk.bf16.mxu1 %vm5681_vm0, %v5680_v1 }
0x29f1   :  { %v4040_v59 = vpop.xlane.xlu0 %4039 }
0x29f2   :  { %v4056_v35 = vmul.f32 0.03125, %v4040_v59 }
0x29f4   :  { %v4062_v29 = vsub.f32 %v6992_v45, %v4056_v35 }
0x29f6   :  { %v4043_v60 = vpop.xlane.xlu1 %4042 }
0x29f7   :  { %v4057_v34 = vmul.f32 0.03125, %v4043_v60 }
0x29f9   :  { %v7021_v39 = vsub.f32 %v4033_v31, %v4057_v34  ;;  %v4068_v31 = vmul.f32 %v4062_v29, %v4062_v29  ;;  %v5386_v34 = vld [vmem:[%s7162_s14 + $0x38] sm:$0xff]  }
0x29fa   :  { %5189 = vmatpush3.bf16.msra.mxu1 %v5386_v34 }
0x29fb   :  { %v4069_v42 = vmul.f32 %v7021_v39, %v7021_v39  ;;  %v4074_v58 = vsel %vm216_vm2, %v4068_v31, 0.0  ;;  %5190 = vmatprep.subr.bf16.mxu1 %v5680_v1 }
0x29fd   :  { %v4077_v26 = vsel %vm216_vm2, %v4069_v42, 0.0  ;;  %v5388_v42 = vld [vmem:[%s7162_s14 + $0x28] sm:$0xff]  }
0x29fe   :  { %4078 = vadd.xlane.f32.xlu1 %v4077_v26  ;;  %v5389_v26 = vld [vmem:[%s7162_s14 + $0x20] sm:$0xff]  }
0x2a7d   :  { %v4005_v56 = vpop.f32.mrf.mxu1 }
0x2a7e   :  { %v4006_v36 = vadd.f32 %v6981_v5, %v4005_v56 }
0x2a7f   :  { %v5166_v8 = vpop.f32.mrf.mxu1 }
0x2a80   :  { %v4028_v10 = vmul.f32 %v6987_v17, %v4006_v36 }
0x2a81   :  { %v4008_v41 = vpop.f32.mrf.mxu1 }
0x2a82   :  { %v4009_v63 = vadd.f32 %v6981_v5, %v4008_v41  ;;  %v4034_v4 = vadd.f32 %v4028_v10, %v6484_v28 }
0x2a83   :  { %v5167_v21 = vpop.f32.mrf.mxu1 }
0x2a84   :  { %v4029_v40 = vmul.f32 %v6987_v17, %v4009_v63  ;;  %v4044_v38 = vsel %vm216_vm2, %v4034_v4, 0.0 }
0x2a85   :  { %4045 = vadd.xlane.f32.xlu0 %v4044_v38  ;;  %v4013_v43 = vpop.f32.mrf.mxu1 }
0x2a86   :  { %v7034_v25 = vadd.f32 %v4029_v40, %v6497_v15  ;;  %v5385_v15 = vld [vmem:[%s7160_s12 + $0x10] sm:$0xff]   ;;  %v4014_v50 = vadd.f32 %v6981_v5, %v4013_v43 }
0x2a87   :  { %v5170_v6 = vpop.f32.mrf.mxu1  ;;  %5175 = vmatpush3.bf16.msra.mxu0 %v5385_v15  ;;  %v4079_v11 = vpop.xlane.xlu1 %4078 }
0x2a88   :  { %v4047_v57 = vsel %vm216_vm2, %v7034_v25, 0.0  ;;  %v4093_v55 = vmul.f32 0.03125, %v4079_v11  ;;  %v4030_v52 = vmul.f32 %v6987_v17, %v4014_v50 }
0x2a89   :  { %4048 = vadd.xlane.f32.xlu0 %v4047_v57  ;;  %v4016_v47 = vpop.f32.mrf.mxu1 }
0x2a8a   :  { %v4099_v13 = vadd.f32 1e-06, %v4093_v55  ;;  %v4017_v62 = vadd.f32 %v6981_v5, %v4016_v47  ;;  %v4036_v7 = vadd.f32 %v4030_v52, %v6585_v27 }
0x2a8b   :  { %v5171_v28 = vpop.f32.mrf.mxu1 }
0x2a8c   :  { %5630 = vrsqrt.f32 %v4099_v13  ;;  %v4031_v14 = vmul.f32 %v6987_v17, %v4017_v62  ;;  %v4050_v23 = vsel %vm216_vm2, %v4036_v7, 0.0 }
0x2a8d   :  { %4075 = vadd.xlane.f32.xlu0 %v4074_v58 }
0x2a8e   :  { %v4037_v20 = vadd.f32 %v4031_v14, %v6592_v37  ;;  %v7071_v37 = vld [vmem:[%s7159_s11 + $0x1] ss:$0 sm:$0xff] }
0x2a90   :  { %v4053_v27 = vsel %vm216_vm2, %v4037_v20, 0.0 }
0x2a99   :  { %v5631_v17 = vpop.eup %5630 }
0x2a9a   :  { %v4111_v49 = vmul.f32 %v5631_v17, %v7021_v39  ;;  %v5387_v39 = vld [vmem:[%s7162_s14 + $0x30] sm:$0xff]  }
0x2a9b   :  { %5191 = vmatpush3.bf16.msra.mxu1 %v5387_v39 }
0x2a9c   :  { %v4123_v9 = vmul.f32 %v7065_v16, %v4111_v49  ;;  %5192 = vmatprep.subr.bf16.mxu1 %v5680_v1 }
0x2a9e   :  { %v4135_v22 = vadd.f32 %v7071_v37, %v4123_v9 }
0x2a9f   :  { %5193 = vmatpush3.bf16.msra.mxu1 %v5388_v42 }
0x2aa0   :  { %5194 = vmatprep.subr.bf16.mxu1 %v5680_v1 }
0x2aa3   :  { %5195 = vmatpush3.bf16.msra.mxu1 %v5389_v26 }
0x2b0e   :  { %v4046_v30 = vpop.xlane.xlu0 %4045 }
0x2b0f   :  { %v4058_v19 = vmul.f32 0.03125, %v4046_v30  ;;  %v7107_v30 = vld [vmem:[%s7161_s13 + $0x1] ss:$0 sm:$0xff] }
0x2b11   :  { %v7049_v51 = vsub.f32 %v4034_v4, %v4058_v19 }
0x2b12   :  { %v4049_v46 = vpop.xlane.xlu0 %4048 }
0x2b13   :  { %v4059_v32 = vmul.f32 0.03125, %v4049_v46  ;;  %v4070_v24 = vmul.f32 %v7049_v51, %v7049_v51 }
0x2b15   :  { %v4065_v44 = vsub.f32 %v7034_v25, %v4059_v32  ;;  %v4080_v53 = vsel %vm216_vm2, %v4070_v24, 0.0 }
0x2b16   :  { %4081 = vadd.xlane.f32.xlu0 %v4080_v53  ;;  %v4076_v61 = vpop.xlane.xlu0 %4075 }
0x2b17   :  { %v4092_v2 = vmul.f32 0.03125, %v4076_v61  ;;  %v4071_v5 = vmul.f32 %v4065_v44, %v4065_v44 }
0x2b19   :  { %v4098_v18 = vadd.f32 1e-06, %v4092_v2  ;;  %v4083_v48 = vsel %vm216_vm2, %v4071_v5, 0.0 }
0x2b1a   :  { %4084 = vadd.xlane.f32.xlu1 %v4083_v48  ;;  %4051 = vadd.xlane.f32.xlu0 %v4050_v23 }
0x2b1b   :  { %5632 = vrsqrt.f32 %v4098_v18 }
0x2b1e   :  { %4054 = vadd.xlane.f32.xlu1 %v4053_v27 }
0x2b28   :  { %v5633_v54 = vpop.eup %5632 }
0x2b29   :  { %v4110_v33 = vmul.f32 %v5633_v54, %v4062_v29 }
0x2b2b   :  { %v4122_v3 = vmul.f32 %v7065_v16, %v4110_v33 }
0x2b2d   :  { %v4134_v12 = vadd.f32 %v7071_v37, %v4122_v3 }
0x2b2f   :  { %v4140_v60 = vpack.c.bf16 %v4135_v22, %v4134_v12 }
0x2b31   :  { %5177 = vmatmul.mubr.msk.bf16.vlgmr.msra.gmra.mxu0 %vm216_vm2, %v4140_v60 }
0x2b32   :  { %5180 = vmatprep.mubr.msk.bf16.mxu0 %vm5681_vm0, %v5680_v1 }
0x2b9f   :  { %v4082_v59 = vpop.xlane.xlu0 %4081 }
0x2ba0   :  { %v4094_v56 = vmul.f32 0.03125, %v4082_v59 }
0x2ba2   :  { %v4100_v36 = vadd.f32 1e-06, %v4094_v56 }
0x2ba3   :  { %v4085_v8 = vpop.xlane.xlu1 %4084  ;;  %v4052_v35 = vpop.xlane.xlu0 %4051 }
0x2ba4   :  { %5634 = vrsqrt.f32 %v4100_v36  ;;  %v4095_v10 = vmul.f32 0.03125, %v4085_v8  ;;  %v4060_v41 = vmul.f32 0.03125, %v4052_v35 }
0x2ba6   :  { %v4101_v63 = vadd.f32 1e-06, %v4095_v10  ;;  %v4066_v4 = vsub.f32 %v4036_v7, %v4060_v41 }
0x2ba7   :  { %v4055_v21 = vpop.xlane.xlu1 %4054 }
0x2ba8   :  { %5636 = vrsqrt.f32 %v4101_v63  ;;  %v4061_v29 = vmul.f32 0.03125, %v4055_v21  ;;  %v4072_v40 = vmul.f32 %v4066_v4, %v4066_v4 }
0x2baa   :  { %v4067_v38 = vsub.f32 %v4037_v20, %v4061_v29  ;;  %v4086_v43 = vsel %vm216_vm2, %v4072_v40, 0.0 }
0x2bab   :  { %4087 = vadd.xlane.f32.xlu0 %v4086_v43 }
0x2bac   :  { %v4073_v6 = vmul.f32 %v4067_v38, %v4067_v38 }
0x2bae   :  { %v4089_v57 = vsel %vm216_vm2, %v4073_v6, 0.0 }
0x2baf   :  { %4090 = vadd.xlane.f32.xlu1 %v4089_v57 }
0x2bb1   :  { %v5635_v31 = vpop.eup %5634 }
0x2bb2   :  { %v4112_v47 = vmul.f32 %v5635_v31, %v7049_v51 }
0x2bb4   :  { %v4124_v0 = vmul.f32 %v7065_v16, %v4112_v47 }
0x2bb5   :  { %v5637_v28 = vpop.eup %5636 }
0x2bb6   :  { %v4113_v58 = vmul.f32 %v5637_v28, %v4065_v44  ;;  %v4136_v11 = vadd.f32 %v7071_v37, %v4124_v0 }
0x2bb8   :  { %v4125_v15 = vmul.f32 %v7065_v16, %v4113_v58 }
0x2bba   :  { %v4137_v50 = vadd.f32 %v7071_v37, %v4125_v15 }
0x2bbc   :  { %v4141_v55 = vpack.c.bf16 %v4137_v50, %v4136_v11 }
0x2bbe   :  { %5181 = vmatmul.mubr.msk.bf16.gmra.mxu0 %vm216_vm2, %v4141_v55 }
0x2bbf   :  { %5184 = vmatprep.mubr.msk.bf16.mxu0 %vm5681_vm0, %v5680_v1 }
0x2bf1   :  { %v4204_v19 = vpop.f32.mrf.mxu0 }
0x2bf2   :  { %v4205_v52 = vadd.f32 %v7107_v30, %v4204_v19 }
0x2bf3   :  { %v5178_v13 = vpop.f32.mrf.mxu0 }
0x2bf4   :  { %v4233_v62 = vmul.f32 %v4205_v52, %v4205_v52  ;;  %v4227_v27 = vmul.f32 0.5, %v4205_v52 }
0x2bf5   :  { %v4207_v51 = vpop.f32.mrf.mxu0 }
0x2bf6   :  { %v4239_v46 = vmul.f32 %v4233_v62, %v4205_v52  ;;  %v4208_v32 = vadd.f32 %v7107_v30, %v4207_v51 }
0x2bf7   :  { %v5179_v24 = vpop.f32.mrf.mxu0 }
0x2bf8   :  { %v4245_v7 = vmul.f32 0.044715, %v4239_v46  ;;  %v4234_v14 = vmul.f32 %v4208_v32, %v4208_v32  ;;  %v4228_v17 = vmul.f32 0.5, %v4208_v32  ;;  %v4609_v46 = vld [vmem:[%s7163_s15 + $0x1] ss:$0 sm:$0xff] }
0x2bfa   :  { %v4251_v44 = vadd.f32 %v4245_v7, %v4205_v52  ;;  %v4240_v53 = vmul.f32 %v4234_v14, %v4208_v32 }
0x2bfc   :  { %v4257_v61 = vmul.f32 0.7978846, %v4251_v44  ;;  %v4246_v2 = vmul.f32 0.044715, %v4240_v53 }
0x2bfe   :  { %5638 = vtanh.f32 %v4257_v61  ;;  %v4252_v5 = vadd.f32 %v4246_v2, %v4208_v32  ;;  %v4617_v32 = vld [vmem:[%s7164_s16 + $0x1] ss:$0 sm:$0xff] }
0x2c00   :  { %v4258_v18 = vmul.f32 0.7978846, %v4252_v5 }
0x2c02   :  { %5640 = vtanh.f32 %v4258_v18 }
0x2c0b   :  { %v5639_v48 = vpop.eup %5638 }
0x2c0c   :  { %v4269_v23 = vadd.f32 1.0, %v5639_v48 }
0x2c0e   :  { %v4275_v54 = vmul.f32 %v4269_v23, %v4227_v27 }
0x2c0f   :  { %v5641_v20 = vpop.eup %5640 }
0x2c10   :  { %v4270_v49 = vadd.f32 1.0, %v5641_v20 }
0x2c12   :  { %v4276_v33 = vmul.f32 %v4270_v49, %v4228_v17 }
0x2c14   :  { %v4281_v9 = vpack.c.bf16 %v4276_v33, %v4275_v54 }
0x2c16   :  { %5197 = vmatmul.mubr.msk.bf16.vlgmr.msra.gmra.mxu1 %vm2204_vm8, %v4281_v9 }
0x2c17   :  { %5200 = vmatprep.mubr.msk.bf16.mxu1 %vm5681_vm0, %v5680_v1 }
0x2c34   :  { %v4088_v3 = vpop.xlane.xlu0 %4087 }
0x2c35   :  { %v4096_v12 = vmul.f32 0.03125, %v4088_v3 }
0x2c37   :  { %v4102_v22 = vadd.f32 1e-06, %v4096_v12 }
0x2c38   :  { %v4091_v60 = vpop.xlane.xlu1 %4090 }
0x2c39   :  { %5642 = vrsqrt.f32 %v4102_v22  ;;  %v4097_v34 = vmul.f32 0.03125, %v4091_v60 }
0x2c3b   :  { %v4103_v39 = vadd.f32 1e-06, %v4097_v34 }
0x2c3d   :  { %5644 = vrsqrt.f32 %v4103_v39 }
0x2c46   :  { %v5643_v42 = vpop.eup %5642 }
0x2c47   :  { %v4114_v26 = vmul.f32 %v5643_v42, %v4066_v4 }
0x2c49   :  { %v4126_v36 = vmul.f32 %v7065_v16, %v4114_v26 }
0x2c4a   :  { %v5645_v59 = vpop.eup %5644 }
0x2c4b   :  { %v4115_v56 = vmul.f32 %v5645_v59, %v4067_v38  ;;  %v4138_v35 = vadd.f32 %v7071_v37, %v4126_v36 }
0x2c4d   :  { %v4127_v8 = vmul.f32 %v7065_v16, %v4115_v56 }
0x2c4f   :  { %v4139_v10 = vadd.f32 %v7071_v37, %v4127_v8 }
0x2c51   :  { %v4142_v41 = vpack.c.bf16 %v4139_v10, %v4138_v35 }
0x2c53   :  { %5185 = vmatmul.mubr.msk.bf16.gmra.mxu0 %vm216_vm2, %v4142_v41 }
0x2c7e   :  { %v4212_v63 = vpop.f32.mrf.mxu0 }
0x2c7f   :  { %v4213_v21 = vadd.f32 %v7107_v30, %v4212_v63 }
0x2c80   :  { %v5182_v29 = vpop.f32.mrf.mxu0 }
0x2c81   :  { %v4235_v40 = vmul.f32 %v4213_v21, %v4213_v21  ;;  %v4229_v55 = vmul.f32 0.5, %v4213_v21 }
0x2c82   :  { %v4215_v43 = vpop.f32.mrf.mxu0 }
0x2c83   :  { %v4241_v4 = vmul.f32 %v4235_v40, %v4213_v21  ;;  %v4216_v38 = vadd.f32 %v7107_v30, %v4215_v43 }
0x2c84   :  { %v5183_v6 = vpop.f32.mrf.mxu0 }
0x2c85   :  { %v4247_v57 = vmul.f32 0.044715, %v4241_v4  ;;  %v4236_v31 = vmul.f32 %v4216_v38, %v4216_v38  ;;  %v4230_v19 = vmul.f32 0.5, %v4216_v38 }
0x2c87   :  { %v4253_v16 = vadd.f32 %v4247_v57, %v4213_v21  ;;  %v4242_v47 = vmul.f32 %v4236_v31, %v4216_v38 }
0x2c89   :  { %v4259_v28 = vmul.f32 0.7978846, %v4253_v16  ;;  %v4248_v58 = vmul.f32 0.044715, %v4242_v47 }
0x2c8b   :  { %5646 = vtanh.f32 %v4259_v28  ;;  %v4254_v37 = vadd.f32 %v4248_v58, %v4216_v38 }
0x2c8d   :  { %v4260_v0 = vmul.f32 0.7978846, %v4254_v37 }
0x2c8f   :  { %5648 = vtanh.f32 %v4260_v0 }
0x2c98   :  { %v5647_v15 = vpop.eup %5646 }
0x2c99   :  { %v4271_v11 = vadd.f32 1.0, %v5647_v15 }
0x2c9b   :  { %v4277_v13 = vmul.f32 %v4271_v11, %v4229_v55 }
0x2c9c   :  { %v5649_v50 = vpop.eup %5648 }
0x2c9d   :  { %v4272_v52 = vadd.f32 1.0, %v5649_v50 }
0x2c9f   :  { %v4278_v62 = vmul.f32 %v4272_v52, %v4230_v19 }
0x2ca1   :  { %v4282_v51 = vpack.c.bf16 %v4278_v62, %v4277_v13 }
0x2ca3   :  { %5201 = vmatmul.mubr.msk.bf16.gmra.mxu1 %vm2204_vm8, %v4282_v51 }
0x2ca4   :  { %5204 = vmatprep.mubr.msk.bf16.mxu1 %vm5681_vm0, %v5680_v1 }
0x2cd6   :  { %v4357_v24 = vpop.f32.mrf.mxu1 }
0x2cd7   :  { %v4358_v7 = vadd.f32 %v4609_v46, %v4357_v24  ;;  %v4618_v24 = vld [vmem:[%s7165_s17] ss:$0 sm:$0xff] }
0x2cd8   :  { %v5198_v14 = vpop.f32.mrf.mxu1 }
0x2cd9   :  { %v4382_v44 = vmul.f32 %v4617_v32, %v4358_v7 }
0x2cda   :  { %v4360_v53 = vpop.f32.mrf.mxu1 }
0x2cdb   :  { %v4384_v61 = vadd.f32 %v4382_v44, %v6992_v45  ;;  %v4619_v53 = vld [vmem:[%s7166_s18] ss:$0 sm:$0xff] }
0x2cdc   :  { %v5199_v2 = vpop.f32.mrf.mxu1 }
0x2cdd   :  { %v4388_v5 = vsel %vm216_vm2, %v4384_v61, 0.0 }
0x2cde   :  { %4389 = vadd.xlane.f32.xlu1 %v4388_v5 }
0x2d13   :  { %v4220_v1 = vpop.f32.mrf.mxu0 }
0x2d14   :  { %v4221_v18 = vadd.f32 %v7107_v30, %v4220_v1 }
0x2d15   :  { %v5186_v48 = vpop.f32.mrf.mxu0 }
0x2d16   :  { %v4237_v23 = vmul.f32 %v4221_v18, %v4221_v18  ;;  %v4231_v26 = vmul.f32 0.5, %v4221_v18 }
0x2d17   :  { %v4223_v20 = vpop.f32.mrf.mxu0 }
0x2d18   :  { %v4243_v27 = vmul.f32 %v4237_v23, %v4221_v18  ;;  %v4224_v17 = vadd.f32 %v7107_v30, %v4223_v20 }
0x2d19   :  { %v5187_v49 = vpop.f32.mrf.mxu0 }
0x2d1a   :  { %v4249_v54 = vmul.f32 0.044715, %v4243_v27  ;;  %v4238_v33 = vmul.f32 %v4224_v17, %v4224_v17  ;;  %v4232_v59 = vmul.f32 0.5, %v4224_v17 }
0x2d1c   :  { %v4255_v9 = vadd.f32 %v4249_v54, %v4221_v18  ;;  %v4244_v3 = vmul.f32 %v4238_v33, %v4224_v17 }
0x2d1e   :  { %v4261_v12 = vmul.f32 0.7978846, %v4255_v9  ;;  %v4250_v45 = vmul.f32 0.044715, %v4244_v3 }
0x2d20   :  { %5650 = vtanh.f32 %v4261_v12  ;;  %v4256_v22 = vadd.f32 %v4250_v45, %v4224_v17 }
0x2d22   :  { %v4262_v60 = vmul.f32 0.7978846, %v4256_v22 }
0x2d24   :  { %5652 = vtanh.f32 %v4262_v60 }
0x2d2d   :  { %v5651_v34 = vpop.eup %5650 }
0x2d2e   :  { %v4273_v39 = vadd.f32 1.0, %v5651_v34 }
0x2d30   :  { %v4279_v36 = vmul.f32 %v4273_v39, %v4231_v26 }
0x2d31   :  { %v5653_v42 = vpop.eup %5652 }
0x2d32   :  { %v4274_v56 = vadd.f32 1.0, %v5653_v42 }
0x2d34   :  { %v4280_v8 = vmul.f32 %v4274_v56, %v4232_v59 }
0x2d36   :  { %v4283_v30 = vpack.c.bf16 %v4280_v8, %v4279_v36 }
0x2d38   :  { %5205 = vmatmul.mubr.msk.bf16.gmra.mxu1 %vm2204_vm8, %v4283_v30 }
0x2d63   :  { %v4364_v35 = vpop.f32.mrf.mxu1 }
0x2d65   :  { %v5202_v10 = vpop.f32.mrf.mxu1 }
0x2d67   :  { %v4390_v41 = vpop.xlane.xlu1 %4389  ;;  %v4366_v63 = vpop.f32.mrf.mxu1 }
0x2d68   :  { %v4394_v21 = vmul.f32 0.03125, %v4390_v41  ;;  %v4367_v29 = vadd.f32 %v4609_v46, %v4366_v63 }
0x2d69   :  { %v5203_v40 = vpop.f32.mrf.mxu1 }
0x2d6a   :  { %v4396_v43 = vsub.f32 %v4384_v61, %v4394_v21  ;;  %v4383_v4 = vmul.f32 %v4617_v32, %v4367_v29 }
0x2d6c   :  { %v4398_v38 = vmul.f32 %v4396_v43, %v4396_v43  ;;  %v4385_v6 = vadd.f32 %v4383_v4, %v7034_v25 }
0x2d6e   :  { %v4400_v57 = vsel %vm216_vm2, %v4398_v38, 0.0  ;;  %v4391_v31 = vsel %vm216_vm2, %v4385_v6, 0.0 }
0x2d6f   :  { %4401 = vadd.xlane.f32.xlu1 %v4400_v57  ;;  %4392 = vadd.xlane.f32.xlu0 %v4391_v31 }
0x2df8   :  { %v4393_v16 = vpop.xlane.xlu0 %4392  ;;  %v4371_v28 = vpop.f32.mrf.mxu1 }
0x2df9   :  { %v4395_v47 = vmul.f32 0.03125, %v4393_v16  ;;  %v4402_v55 = vpop.xlane.xlu1 %4401 }
0x2dfa   :  { %v5206_v37 = vpop.f32.mrf.mxu1  ;;  %v4406_v19 = vmul.f32 0.03125, %v4402_v55 }
0x2dfb   :  { %v4397_v58 = vsub.f32 %v4385_v6, %v4395_v47 }
0x2dfc   :  { %v4373_v0 = vpop.f32.mrf.mxu1  ;;  %v4408_v25 = vadd.f32 1e-06, %v4406_v19 }
0x2dfd   :  { %v4399_v15 = vmul.f32 %v4397_v58, %v4397_v58 }
0x2dfe   :  { %v5207_v11 = vpop.f32.mrf.mxu1  ;;  %5654 = vrsqrt.f32 %v4408_v25 }
0x2dff   :  { %v4403_v50 = vsel %vm216_vm2, %v4399_v15, 0.0 }
0x2e00   :  { %4404 = vadd.xlane.f32.xlu0 %v4403_v50 }
0x2e0b   :  { %v5655_v51 = vpop.eup %5654 }
0x2e0c   :  { %v4412_v46 = vmul.f32 %v5655_v51, %v4396_v43 }
0x2e0e   :  { %v4420_v14 = vmul.f32 %v4618_v24, %v4412_v46 }
0x2e10   :  { %v4428_v2 = vadd.f32 %v4619_v53, %v4420_v14 }
0x2e89   :  { %v4405_v52 = vpop.xlane.xlu0 %4404 }
0x2e8a   :  { %v4407_v13 = vmul.f32 0.03125, %v4405_v52 }
0x2e8c   :  { %v4409_v62 = vadd.f32 1e-06, %v4407_v13 }
0x2e8e   :  { %5656 = vrsqrt.f32 %v4409_v62 }
0x2e9b   :  { %v5657_v32 = vpop.eup %5656 }
0x2e9c   :  { %v4413_v7 = vmul.f32 %v5657_v32, %v4397_v58 }
0x2e9e   :  { %v4421_v44 = vmul.f32 %v4618_v24, %v4413_v7 }
0x2ea0   :  { %v4429_v61 = vadd.f32 %v4619_v53, %v4421_v44 }
0x2ea2   :  { %v4431_v5 = vrot.slane %v4429_v61, 7 }
0x2ea4   :  { %v4434_v1 = vsel %vm4433_vm9, %v4428_v2, %v4431_v5 }
0x2ea5   :  { %4436 = vst.msk [vmem:[#allocation2] sm:$0x3] %vm4435_vm10, %v4434_v1 }
0x2ea6   :  { %5669 = shalt.err (!%p5666_p4)
}
0x2ea7   :  { %4446 = dma.vmem_to_hbm [thread:$0]  %s4444_s30, 32, %s7167_s19, [#allocation3]  }
0x2ea8   :  { %5678 = dma.done.wait [#allocation3], 32  }
0x2ea9   :  { %5679 = vsyncadd [#allocation3], 4294967264 }
0x2eaa   :  { %4450 = vsyncpa [#allocation3], 1 }

</bundles_post_ra>
